<compile_context>
chip_gen: v7x
topology: tpu7x:2x2x1
jax: 0.10.0
libtpu: 0.0.40
codegen_flags: <defaults>
</compile_context>

<pallas_src>
import math
import jax
import jax.numpy as jnp
from jax.experimental import pallas as pl
from jax.experimental.pallas import tpu as pltpu

# ---- small GPT config (consistent with the PyTorch module) ----
B = 2            # batch
T = 8            # sequence length (== block_size)
C = 32           # n_embd
N_HEAD = 4
HEAD_DIM = C // N_HEAD
N_LAYER = 2
VOCAB = 64
BLOCK_SIZE = T
LN_EPS = 1e-5

BT = B * T            # rows of the flattened residual stream
S = B * N_HEAD        # combined (batch, head) dim for attention, s = b*N_HEAD + h


def _layernorm(x, g, b):
    mean = jnp.mean(x, axis=-1, keepdims=True)
    var = jnp.mean((x - mean) ** 2, axis=-1, keepdims=True)
    return (x - mean) * jax.lax.rsqrt(var + LN_EPS) * g + b


def _gelu_exact(x):
    # nn.GELU() default is the exact (erf) formulation.
    return 0.5 * x * (1.0 + jax.lax.erf(x * (1.0 / math.sqrt(2.0))))


# ----------------------------------------------------------------------------
# Fused GPT kernel: one grid step computes the entire forward pass.
# ----------------------------------------------------------------------------
def gpt_kernel(x_ref,
               ln1g_ref, ln1b_ref,
               wq_ref, bq_ref, wk_ref, bk_ref, wv_ref, bv_ref,
               wp_ref, bp_ref,
               ln2g_ref, ln2b_ref,
               wfc_ref, bfc_ref, wfcp_ref, bfcp_ref,
               lnfg_ref, lnfb_ref, wte_ref,
               blockout_ref, attw_ref, attout_ref, out_ref, logits_ref):
    x = x_ref[...].reshape(BT, C)                       # flatten (B, T) -> rows

    # Causal additive bias, built once: 0 on/below the diagonal, -1e30 above.
    row = jax.lax.broadcasted_iota(jnp.int32, (T, T), 0)
    col = jax.lax.broadcasted_iota(jnp.int32, (T, T), 1)
    mask_bias = jnp.where(col <= row, 0.0, -1e30).astype(jnp.float32)

    def rep_heads(ref, l):
        # (N_HEAD, a, b) per-head weight slice -> (S, a, b), s = b*N_HEAD + h
        w = ref[l]
        return jnp.broadcast_to(w[None], (B,) + w.shape).reshape((S,) + w.shape[1:])

    for l in range(N_LAYER):                            # static unroll over layers
        # ---- ln_1 ----
        xn = _layernorm(x, ln1g_ref[l], ln1b_ref[l])    # (BT, C)
        # replicate the normalized stream per head -> (S, T, C)
        xn_s = jnp.broadcast_to(xn.reshape(B, 1, T, C),
                                (B, N_HEAD, T, C)).reshape(S, T, C)

        # ---- QKV, batched over all (batch, head) pairs; scale folded into Wq/bq ----
        q = jnp.einsum('stc,scd->std', xn_s, rep_heads(wq_ref, l),
                       preferred_element_type=jnp.float32) + rep_heads(bq_ref, l)
        k = jnp.einsum('stc,scd->std', xn_s, rep_heads(wk_ref, l),
                       preferred_element_type=jnp.float32) + rep_heads(bk_ref, l)
        v = jnp.einsum('stc,scd->std', xn_s, rep_heads(wv_ref, l),
                       preferred_element_type=jnp.float32) + rep_heads(bv_ref, l)

        # ---- causal softmax attention: two batched dot_generals for all heads ----
        att = jnp.einsum('sqd,skd->sqk', q, k,
                         preferred_element_type=jnp.float32) + mask_bias[None]
        att = att - jnp.max(att, axis=-1, keepdims=True)
        att = jnp.exp(att)
        att = att / jnp.sum(att, axis=-1, keepdims=True)
        attw_ref[l] = att                               # one (S, T, T) store per layer

        y = jnp.einsum('sqk,skd->sqd', att, v,
                       preferred_element_type=jnp.float32)          # (S, T, HEAD_DIM)

        # ---- c_proj: per-head partial projections summed over heads (== concat @ Wp) ----
        y_proj = jnp.einsum('sqd,sdc->sqc', y, rep_heads(wp_ref, l),
                            preferred_element_type=jnp.float32)     # (S, T, C)
        y4 = y_proj.reshape(B, N_HEAD, T, C)
        attn_out = y4[:, 0]
        for h in range(1, N_HEAD):
            attn_out = attn_out + y4[:, h]               # (B, T, C)
        attn_out = attn_out.reshape(BT, C) + bp_ref[l]   # add c_proj bias, flat rows
        attout_ref[l] = attn_out

        # ---- residual 1 / ln_2 / MLP / residual 2 (all on flat (BT, C) rows) ----
        x = x + attn_out
        x2n = _layernorm(x, ln2g_ref[l], ln2b_ref[l])
        hdn = jnp.dot(x2n, wfc_ref[l], preferred_element_type=jnp.float32) + bfc_ref[l]
        hdn = _gelu_exact(hdn)
        mlp = jnp.dot(hdn, wfcp_ref[l], preferred_element_type=jnp.float32) + bfcp_ref[l]
        x = x + mlp
        blockout_ref[l] = x

    # ---- ln_f + tied lm_head on the last token of every sequence ----
    y_f = _layernorm(x, lnfg_ref[...], lnfb_ref[...])    # (BT, C)
    out_ref[...] = y_f
    last = y_f.reshape(B, T, C)[:, T - 1, :]             # (B, C)
    logits_ref[...] = jax.lax.dot_general(                # contract on C (no wte.T on host)
        last, wte_ref[...], (((1,), (1,)), ((), ())),
        preferred_element_type=jnp.float32)


def run_gpt(x, kp, lnf_g, lnf_b, wte):
    inputs = (x,
              kp["ln1_g"], kp["ln1_b"],
              kp["w_q"], kp["b_q"], kp["w_k"], kp["b_k"], kp["w_v"], kp["b_v"],
              kp["w_p"], kp["b_p"],
              kp["ln2_g"], kp["ln2_b"],
              kp["w_fc"], kp["b_fc"], kp["w_fcp"], kp["b_fcp"],
              lnf_g, lnf_b, wte)

    def full_spec(shape):
        nd = len(shape)
        return pl.BlockSpec(shape, lambda i, _nd=nd: (0,) * _nd)

    out_shape = (
        jax.ShapeDtypeStruct((N_LAYER, BT, C), jnp.float32),      # per-layer block outputs
        jax.ShapeDtypeStruct((N_LAYER, S, T, T), jnp.float32),    # per-layer attention maps
        jax.ShapeDtypeStruct((N_LAYER, BT, C), jnp.float32),      # per-layer attn outputs
        jax.ShapeDtypeStruct((BT, C), jnp.float32),               # ln_f output
        jax.ShapeDtypeStruct((B, VOCAB), jnp.float32),            # lm_head logits (last token)
    )

    return pl.pallas_call(
        gpt_kernel,
        grid=(1,),                                      # fully fused: one grid step
        in_specs=[full_spec(a.shape) for a in inputs],
        out_specs=tuple(full_spec(s.shape) for s in out_shape),
        out_shape=out_shape,
        compiler_params=pltpu.CompilerParams(
            dimension_semantics=("arbitrary",)),
    )(*inputs)


# ----------------------------------------------------------------------------
# Parameter init (PyTorch layout) + one-time kernel-ready packing (plain-JAX glue)
# ----------------------------------------------------------------------------
def init_params(key):
    std = 0.02
    proj_std = 0.02 / math.sqrt(2 * N_LAYER)
    keys = jax.random.split(key, 2 + N_LAYER)
    wte = (jax.random.normal(keys[0], (VOCAB, C)) * std).astype(jnp.float32)
    wpe = (jax.random.normal(keys[1], (BLOCK_SIZE, C)) * std).astype(jnp.float32)
    blocks = []
    for l in range(N_LAYER):
        k = jax.random.split(keys[2 + l], 4)
        blocks.append(dict(
            ln1_g=jnp.ones((1, C), jnp.float32),
            ln1_b=jnp.zeros((1, C), jnp.float32),
            w_qkv=(jax.random.normal(k[0], (C, 3 * C)) * std).astype(jnp.float32),
            b_qkv=jnp.zeros((1, 3 * C), jnp.float32),
            w_proj=(jax.random.normal(k[1], (C, C)) * proj_std).astype(jnp.float32),
            b_proj=jnp.zeros((1, C), jnp.float32),
            ln2_g=jnp.ones((1, C), jnp.float32),
            ln2_b=jnp.zeros((1, C), jnp.float32),
            w_fc=(jax.random.normal(k[2], (C, 4 * C)) * std).astype(jnp.float32),
            b_fc=jnp.zeros((1, 4 * C), jnp.float32),
            w_fc_proj=(jax.random.normal(k[3], (4 * C, C)) * proj_std).astype(jnp.float32),
            b_fc_proj=jnp.zeros((1, C), jnp.float32),
        ))
    return dict(wte=wte, wpe=wpe, blocks=blocks,
                lnf_g=jnp.ones((1, C), jnp.float32),
                lnf_b=jnp.zeros((1, C), jnp.float32))


def _pack_params(params):
    """Rearrange PyTorch-layout params into layer-stacked, per-head kernel arrays."""
    scale = 1.0 / math.sqrt(HEAD_DIM)

    def heads_w(w):   # (C, C) slice -> (N_HEAD, C, HEAD_DIM)
        return jnp.transpose(w.reshape(C, N_HEAD, HEAD_DIM), (1, 0, 2))

    def heads_b(b):   # (C,) slice -> (N_HEAD, 1, HEAD_DIM)
        return b.reshape(N_HEAD, 1, HEAD_DIM)

    keys = ("ln1_g", "ln1_b", "w_q", "b_q", "w_k", "b_k", "w_v", "b_v",
            "w_p", "b_p", "ln2_g", "ln2_b", "w_fc", "b_fc", "w_fcp", "b_fcp")
    acc = {k: [] for k in keys}
    for blk in params["blocks"]:
        wqkv, bqkv = blk["w_qkv"], blk["b_qkv"][0]
        acc["w_q"].append(heads_w(wqkv[:, 0:C]) * scale)      # fold 1/sqrt(hd) into Q
        acc["b_q"].append(heads_b(bqkv[0:C]) * scale)
        acc["w_k"].append(heads_w(wqkv[:, C:2 * C]))
        acc["b_k"].append(heads_b(bqkv[C:2 * C]))
        acc["w_v"].append(heads_w(wqkv[:, 2 * C:3 * C]))
        acc["b_v"].append(heads_b(bqkv[2 * C:3 * C]))
        acc["w_p"].append(blk["w_proj"].reshape(N_HEAD, HEAD_DIM, C))
        acc["b_p"].append(blk["b_proj"])
        acc["ln1_g"].append(blk["ln1_g"]); acc["ln1_b"].append(blk["ln1_b"])
        acc["ln2_g"].append(blk["ln2_g"]); acc["ln2_b"].append(blk["ln2_b"])
        acc["w_fc"].append(blk["w_fc"]); acc["b_fc"].append(blk["b_fc"])
        acc["w_fcp"].append(blk["w_fc_proj"]); acc["b_fcp"].append(blk["b_fc_proj"])
    return {k: jnp.stack(v, axis=0) for k, v in acc.items()}


# ----------------------------------------------------------------------------
# GPT forward (mirrors GPT.forward): returns (logits, attention_maps, components)
# ----------------------------------------------------------------------------
@jax.jit
def gpt_forward(idx, params):
    pos = jnp.arange(T, dtype=jnp.int32)[None, :]               # (1, T)
    # TODO(synk): token/position embedding gathers stay in plain JAX (data-dependent
    # row gather; negligible at this size, no clean Pallas win).
    tok_emb = params["wte"][idx]                                 # (B, T, C)
    pos_emb = params["wpe"][pos]                                 # (1, T, C)
    x = tok_emb + pos_emb
    tok_pos_embd = x

    kp = _pack_params(params)
    blk_out, attw, att_out, out_flat, logits = run_gpt(
        x, kp, params["lnf_g"], params["lnf_b"], params["wte"])

    attention_maps = [attw[l].reshape(B, N_HEAD, T, T) for l in range(N_LAYER)]
    block_outputs = [blk_out[l].reshape(B, T, C) for l in range(N_LAYER)]
    attn_outputs = [att_out[l].reshape(B, T, C) for l in range(N_LAYER)]
    output = out_flat.reshape(B, T, C)

    components = dict(input_batch=idx, positional_encodings=pos,
                      positional_embeddings=pos_emb, token_embeddings=tok_emb,
                      tok_pos_embd=tok_pos_embd, attn_outputs=attn_outputs,
                      block_outputs=block_outputs, output=output)
    return logits, attention_maps, components


# ----------------------------------------------------------------------------
# Pure-JAX reference (mirrors the PyTorch module) for a correctness check.
# ----------------------------------------------------------------------------
def _ref_forward(x, params):
    hp = jax.lax.Precision.HIGHEST
    mask = jnp.tril(jnp.ones((T, T), dtype=bool))
    attws, blocks, attouts = [], [], []
    for blk in params["blocks"]:
        xn = _layernorm(x, blk["ln1_g"], blk["ln1_b"])
        qkv = jnp.einsum('btc,ck->btk', xn, blk["w_qkv"], precision=hp) + blk["b_qkv"]
        q, k, v = jnp.split(qkv, 3, axis=-1)
        q = q.reshape(B, T, N_HEAD, HEAD_DIM).transpose(0, 2, 1, 3)
        k = k.reshape(B, T, N_HEAD, HEAD_DIM).transpose(0, 2, 1, 3)
        v = v.reshape(B, T, N_HEAD, HEAD_DIM).transpose(0, 2, 1, 3)
        att = jnp.einsum('bhtd,bhsd->bhts', q, k, precision=hp) / math.sqrt(HEAD_DIM)
        att = jnp.where(mask, att, -jnp.inf)
        att = jax.nn.softmax(att, axis=-1)
        attws.append(att)
        y = jnp.einsum('bhts,bhsd->bhtd', att, v, precision=hp)
        y = y.transpose(0, 2, 1, 3).reshape(B, T, C)
        attn_out = jnp.einsum('btc,ck->btk', y, blk["w_proj"], precision=hp) + blk["b_proj"]
        attouts.append(attn_out)
        x = x + attn_out
        x2 = _layernorm(x, blk["ln2_g"], blk["ln2_b"])
        h1 = _gelu_exact(jnp.einsum('btc,ck->btk', x2, blk["w_fc"], precision=hp) + blk["b_fc"])
        x = x + jnp.einsum('btk,kc->btc', h1, blk["w_fc_proj"], precision=hp) + blk["b_fc_proj"]
        blocks.append(x)
    out = _layernorm(x, params["lnf_g"], params["lnf_b"])
    logits = jnp.einsum('bc,vc->bv', out[:, -1, :], params["wte"], precision=hp)
    return logits, attws, blocks, attouts, out


if __name__ == "__main__":
    key = jax.random.PRNGKey(0)
    pkey, ikey = jax.random.split(key)
    params = init_params(pkey)
    idx = jax.random.randint(ikey, (B, T), 0, VOCAB, dtype=jnp.int32)

    logits, attention_maps, components = gpt_forward(idx, params)
    jax.block_until_ready(logits)
    jax.block_until_ready(attention_maps)
    jax.block_until_ready(components["output"])

    # shape checks
    assert logits.shape == (B, VOCAB)
    assert len(attention_maps) == N_LAYER and attention_maps[0].shape == (B, N_HEAD, T, T)
    assert components["output"].shape == (B, T, C)
    assert components["block_outputs"][0].shape == (B, T, C)
    assert components["attn_outputs"][0].shape == (B, T, C)

    # numerical check against the pure-JAX reference of the PyTorch forward
    ref_logits, ref_attw, ref_blocks, ref_attouts, ref_out = _ref_forward(
        components["tok_pos_embd"], params)
    tol = dict(atol=1e-2, rtol=1e-2)
    assert jnp.allclose(logits, ref_logits, **tol)
    assert jnp.allclose(components["output"], ref_out, **tol)
    for l in range(N_LAYER):
        assert jnp.allclose(attention_maps[l], ref_attw[l], **tol)
        assert jnp.allclose(components["block_outputs"][l], ref_blocks[l], **tol)
        assert jnp.allclose(components["attn_outputs"][l], ref_attouts[l], **tol)

    print("KERNEL_OK")
</pallas_src>

<mosaic_0001>
module attributes {stable_mosaic.version = 11 : i64} {
  func.func @gpt_kernel(%arg0: i32, %arg1: memref<2x8x32xf32, #tpu.memory_space<vmem>>, %arg2: memref<2x1x32xf32, #tpu.memory_space<vmem>>, %arg3: memref<2x1x32xf32, #tpu.memory_space<vmem>>, %arg4: memref<2x4x32x8xf32, #tpu.memory_space<vmem>>, %arg5: memref<2x4x1x8xf32, #tpu.memory_space<vmem>>, %arg6: memref<2x4x32x8xf32, #tpu.memory_space<vmem>>, %arg7: memref<2x4x1x8xf32, #tpu.memory_space<vmem>>, %arg8: memref<2x4x32x8xf32, #tpu.memory_space<vmem>>, %arg9: memref<2x4x1x8xf32, #tpu.memory_space<vmem>>, %arg10: memref<2x4x8x32xf32, #tpu.memory_space<vmem>>, %arg11: memref<2x1x32xf32, #tpu.memory_space<vmem>>, %arg12: memref<2x1x32xf32, #tpu.memory_space<vmem>>, %arg13: memref<2x1x32xf32, #tpu.memory_space<vmem>>, %arg14: memref<2x32x128xf32, #tpu.memory_space<vmem>>, %arg15: memref<2x1x128xf32, #tpu.memory_space<vmem>>, %arg16: memref<2x128x32xf32, #tpu.memory_space<vmem>>, %arg17: memref<2x1x32xf32, #tpu.memory_space<vmem>>, %arg18: memref<1x32xf32, #tpu.memory_space<vmem>>, %arg19: memref<1x32xf32, #tpu.memory_space<vmem>>, %arg20: memref<64x32xf32, #tpu.memory_space<vmem>>, %arg21: memref<2x16x32xf32, #tpu.memory_space<vmem>>, %arg22: memref<2x8x8x8xf32, #tpu.memory_space<vmem>>, %arg23: memref<2x16x32xf32, #tpu.memory_space<vmem>>, %arg24: memref<16x32xf32, #tpu.memory_space<vmem>>, %arg25: memref<2x64xf32, #tpu.memory_space<vmem>>) attributes {dimension_semantics = [#tpu.dimension_semantics<arbitrary>], iteration_bounds = array<i64: 1>, scalar_prefetch = 0 : i64, scratch_operands = 0 : i64, tpu.core_type = #tpu.core_type<tc>, window_params = [{pipeline_mode = #tpu.pipeline_mode<synchronous>, transform_indices = @transform_0, window_bounds = array<i64: 2, 8, 32>}, {pipeline_mode = #tpu.pipeline_mode<synchronous>, transform_indices = @transform_1, window_bounds = array<i64: 2, 1, 32>}, {pipeline_mode = #tpu.pipeline_mode<synchronous>, transform_indices = @transform_2, window_bounds = array<i64: 2, 1, 32>}, {pipeline_mode = #tpu.pipeline_mode<synchronous>, transform_indices = @transform_3, window_bounds = array<i64: 2, 4, 32, 8>}, {pipeline_mode = #tpu.pipeline_mode<synchronous>, transform_indices = @transform_4, window_bounds = array<i64: 2, 4, 1, 8>}, {pipeline_mode = #tpu.pipeline_mode<synchronous>, transform_indices = @transform_5, window_bounds = array<i64: 2, 4, 32, 8>}, {pipeline_mode = #tpu.pipeline_mode<synchronous>, transform_indices = @transform_6, window_bounds = array<i64: 2, 4, 1, 8>}, {pipeline_mode = #tpu.pipeline_mode<synchronous>, transform_indices = @transform_7, window_bounds = array<i64: 2, 4, 32, 8>}, {pipeline_mode = #tpu.pipeline_mode<synchronous>, transform_indices = @transform_8, window_bounds = array<i64: 2, 4, 1, 8>}, {pipeline_mode = #tpu.pipeline_mode<synchronous>, transform_indices = @transform_9, window_bounds = array<i64: 2, 4, 8, 32>}, {pipeline_mode = #tpu.pipeline_mode<synchronous>, transform_indices = @transform_10, window_bounds = array<i64: 2, 1, 32>}, {pipeline_mode = #tpu.pipeline_mode<synchronous>, transform_indices = @transform_11, window_bounds = array<i64: 2, 1, 32>}, {pipeline_mode = #tpu.pipeline_mode<synchronous>, transform_indices = @transform_12, window_bounds = array<i64: 2, 1, 32>}, {pipeline_mode = #tpu.pipeline_mode<synchronous>, transform_indices = @transform_13, window_bounds = array<i64: 2, 32, 128>}, {pipeline_mode = #tpu.pipeline_mode<synchronous>, transform_indices = @transform_14, window_bounds = array<i64: 2, 1, 128>}, {pipeline_mode = #tpu.pipeline_mode<synchronous>, transform_indices = @transform_15, window_bounds = array<i64: 2, 128, 32>}, {pipeline_mode = #tpu.pipeline_mode<synchronous>, transform_indices = @transform_16, window_bounds = array<i64: 2, 1, 32>}, {pipeline_mode = #tpu.pipeline_mode<synchronous>, transform_indices = @transform_17, window_bounds = array<i64: 1, 32>}, {pipeline_mode = #tpu.pipeline_mode<synchronous>, transform_indices = @transform_18, window_bounds = array<i64: 1, 32>}, {pipeline_mode = #tpu.pipeline_mode<synchronous>, transform_indices = @transform_19, window_bounds = array<i64: 64, 32>}, {pipeline_mode = #tpu.pipeline_mode<synchronous>, transform_indices = @transform_20, window_bounds = array<i64: 2, 16, 32>}, {pipeline_mode = #tpu.pipeline_mode<synchronous>, transform_indices = @transform_21, window_bounds = array<i64: 2, 8, 8, 8>}, {pipeline_mode = #tpu.pipeline_mode<synchronous>, transform_indices = @transform_22, window_bounds = array<i64: 2, 16, 32>}, {pipeline_mode = #tpu.pipeline_mode<synchronous>, transform_indices = @transform_23, window_bounds = array<i64: 16, 32>}, {pipeline_mode = #tpu.pipeline_mode<synchronous>, transform_indices = @transform_24, window_bounds = array<i64: 2, 64>}]} {
    %c0 = arith.constant 0 : index
    %c0_0 = arith.constant 0 : index
    %c0_1 = arith.constant 0 : index
    %0 = vector.load %arg1[%c0, %c0_0, %c0_1] : memref<2x8x32xf32, #tpu.memory_space<vmem>>, vector<2x8x32xf32>
    %1 = vector.shape_cast %0 : vector<2x8x32xf32> to vector<16x32xf32>
    %2 = tpu.iota {dimensions = array<i32: 0>} : vector<8x8xi32>
    %3 = tpu.iota {dimensions = array<i32: 1>} : vector<8x8xi32>
    %4 = arith.cmpi sle, %3, %2 : vector<8x8xi32>
    %cst = arith.constant 0.000000e+00 : f32
    %cst_2 = arith.constant -1.000000e+30 : f32
    %5 = vector.broadcast %cst : f32 to vector<8x8xf32>
    %6 = vector.broadcast %cst_2 : f32 to vector<8x8xf32>
    %7 = arith.select %4, %5, %6 : vector<8x8xi1>, vector<8x8xf32>
    %c0_3 = arith.constant 0 : index
    %c0_4 = arith.constant 0 : index
    %c0_5 = arith.constant 0 : index
    %8 = vector.load %arg2[%c0_3, %c0_4, %c0_5] : memref<2x1x32xf32, #tpu.memory_space<vmem>>, vector<1x1x32xf32>
    %9 = vector.shape_cast %8 : vector<1x1x32xf32> to vector<1x32xf32>
    %c0_6 = arith.constant 0 : index
    %c0_7 = arith.constant 0 : index
    %c0_8 = arith.constant 0 : index
    %10 = vector.load %arg3[%c0_6, %c0_7, %c0_8] : memref<2x1x32xf32, #tpu.memory_space<vmem>>, vector<1x1x32xf32>
    %11 = vector.shape_cast %10 : vector<1x1x32xf32> to vector<1x32xf32>
    %cst_9 = arith.constant dense<0.000000e+00> : vector<16xf32>
    %12 = vector.multi_reduction <add>, %1, %cst_9 [1] : vector<16x32xf32> to vector<16xf32>
    %13 = vector.shape_cast %12 : vector<16xf32> to vector<16x1xf32>
    %cst_10 = arith.constant 3.200000e+01 : f32
    %14 = vector.broadcast %cst_10 : f32 to vector<16x1xf32>
    %15 = arith.divf %13, %14 : vector<16x1xf32>
    %16 = vector.broadcast %15 : vector<16x1xf32> to vector<16x32xf32>
    %17 = arith.subf %1, %16 : vector<16x32xf32>
    %18 = arith.mulf %17, %17 : vector<16x32xf32>
    %cst_11 = arith.constant dense<0.000000e+00> : vector<16xf32>
    %19 = vector.multi_reduction <add>, %18, %cst_11 [1] : vector<16x32xf32> to vector<16xf32>
    %20 = vector.shape_cast %19 : vector<16xf32> to vector<16x1xf32>
    %cst_12 = arith.constant 3.200000e+01 : f32
    %21 = vector.broadcast %cst_12 : f32 to vector<16x1xf32>
    %22 = arith.divf %20, %21 : vector<16x1xf32>
    %23 = vector.broadcast %15 : vector<16x1xf32> to vector<16x32xf32>
    %24 = arith.subf %1, %23 : vector<16x32xf32>
    %cst_13 = arith.constant 9.99999974E-6 : f32
    %25 = vector.broadcast %cst_13 : f32 to vector<16x1xf32>
    %26 = arith.addf %22, %25 : vector<16x1xf32>
    %27 = math.rsqrt %26 : vector<16x1xf32>
    %28 = vector.broadcast %27 : vector<16x1xf32> to vector<16x32xf32>
    %29 = arith.mulf %24, %28 : vector<16x32xf32>
    %30 = vector.broadcast %9 : vector<1x32xf32> to vector<16x32xf32>
    %31 = arith.mulf %29, %30 : vector<16x32xf32>
    %32 = vector.broadcast %11 : vector<1x32xf32> to vector<16x32xf32>
    %33 = arith.addf %31, %32 : vector<16x32xf32>
    %34 = vector.shape_cast %33 : vector<16x32xf32> to vector<2x1x8x32xf32>
    %35 = vector.shape_cast %34 : vector<2x1x8x32xf32> to vector<2x1x8x32xf32>
    %36 = vector.broadcast %35 : vector<2x1x8x32xf32> to vector<2x4x8x32xf32>
    %37 = vector.shape_cast %36 : vector<2x4x8x32xf32> to vector<8x8x32xf32>
    %c0_14 = arith.constant 0 : index
    %c0_15 = arith.constant 0 : index
    %c0_16 = arith.constant 0 : index
    %c0_17 = arith.constant 0 : index
    %38 = vector.load %arg4[%c0_14, %c0_15, %c0_16, %c0_17] : memref<2x4x32x8xf32, #tpu.memory_space<vmem>>, vector<1x4x32x8xf32>
    %39 = vector.shape_cast %38 : vector<1x4x32x8xf32> to vector<4x32x8xf32>
    %40 = vector.shape_cast %39 : vector<4x32x8xf32> to vector<1x4x32x8xf32>
    %41 = vector.shape_cast %40 : vector<1x4x32x8xf32> to vector<1x4x32x8xf32>
    %42 = vector.broadcast %41 : vector<1x4x32x8xf32> to vector<2x4x32x8xf32>
    %43 = vector.shape_cast %42 : vector<2x4x32x8xf32> to vector<8x32x8xf32>
    "tpu.trace_start"() <{level = 10 : i32, message = "stc,scd->std"}> : () -> ()
    %cst_18 = arith.constant dense<0.000000e+00> : vector<8x8x8xf32>
    %44 = tpu.matmul %37, %43, %cst_18 {dimension_numbers = #tpu.dot_dimension_numbers<[2], [1], [1], [2], [0, 0, 0, 1, 1, 2], [0], [0]>} : vector<8x8x32xf32>, vector<8x32x8xf32>, vector<8x8x8xf32> -> vector<8x8x8xf32>
    "tpu.trace_stop"() : () -> ()
    %c0_19 = arith.constant 0 : index
    %c0_20 = arith.constant 0 : index
    %c0_21 = arith.constant 0 : index
    %c0_22 = arith.constant 0 : index
    %45 = vector.load %arg5[%c0_19, %c0_20, %c0_21, %c0_22] : memref<2x4x1x8xf32, #tpu.memory_space<vmem>>, vector<1x4x1x8xf32>
    %46 = vector.shape_cast %45 : vector<1x4x1x8xf32> to vector<4x1x8xf32>
    %47 = vector.shape_cast %46 : vector<4x1x8xf32> to vector<1x4x1x8xf32>
    %48 = vector.shape_cast %47 : vector<1x4x1x8xf32> to vector<1x4x1x8xf32>
    %49 = vector.broadcast %48 : vector<1x4x1x8xf32> to vector<2x4x1x8xf32>
    %50 = vector.shape_cast %49 : vector<2x4x1x8xf32> to vector<8x1x8xf32>
    %51 = vector.broadcast %50 : vector<8x1x8xf32> to vector<8x8x8xf32>
    %52 = arith.addf %44, %51 : vector<8x8x8xf32>
    %c0_23 = arith.constant 0 : index
    %c0_24 = arith.constant 0 : index
    %c0_25 = arith.constant 0 : index
    %c0_26 = arith.constant 0 : index
    %53 = vector.load %arg6[%c0_23, %c0_24, %c0_25, %c0_26] : memref<2x4x32x8xf32, #tpu.memory_space<vmem>>, vector<1x4x32x8xf32>
    %54 = vector.shape_cast %53 : vector<1x4x32x8xf32> to vector<4x32x8xf32>
    %55 = vector.shape_cast %54 : vector<4x32x8xf32> to vector<1x4x32x8xf32>
    %56 = vector.shape_cast %55 : vector<1x4x32x8xf32> to vector<1x4x32x8xf32>
    %57 = vector.broadcast %56 : vector<1x4x32x8xf32> to vector<2x4x32x8xf32>
    %58 = vector.shape_cast %57 : vector<2x4x32x8xf32> to vector<8x32x8xf32>
    "tpu.trace_start"() <{level = 10 : i32, message = "stc,scd->std"}> : () -> ()
    %cst_27 = arith.constant dense<0.000000e+00> : vector<8x8x8xf32>
    %59 = tpu.matmul %37, %58, %cst_27 {dimension_numbers = #tpu.dot_dimension_numbers<[2], [1], [1], [2], [0, 0, 0, 1, 1, 2], [0], [0]>} : vector<8x8x32xf32>, vector<8x32x8xf32>, vector<8x8x8xf32> -> vector<8x8x8xf32>
    "tpu.trace_stop"() : () -> ()
    %c0_28 = arith.constant 0 : index
    %c0_29 = arith.constant 0 : index
    %c0_30 = arith.constant 0 : index
    %c0_31 = arith.constant 0 : index
    %60 = vector.load %arg7[%c0_28, %c0_29, %c0_30, %c0_31] : memref<2x4x1x8xf32, #tpu.memory_space<vmem>>, vector<1x4x1x8xf32>
    %61 = vector.shape_cast %60 : vector<1x4x1x8xf32> to vector<4x1x8xf32>
    %62 = vector.shape_cast %61 : vector<4x1x8xf32> to vector<1x4x1x8xf32>
    %63 = vector.shape_cast %62 : vector<1x4x1x8xf32> to vector<1x4x1x8xf32>
    %64 = vector.broadcast %63 : vector<1x4x1x8xf32> to vector<2x4x1x8xf32>
    %65 = vector.shape_cast %64 : vector<2x4x1x8xf32> to vector<8x1x8xf32>
    %66 = vector.broadcast %65 : vector<8x1x8xf32> to vector<8x8x8xf32>
    %67 = arith.addf %59, %66 : vector<8x8x8xf32>
    %c0_32 = arith.constant 0 : index
    %c0_33 = arith.constant 0 : index
    %c0_34 = arith.constant 0 : index
    %c0_35 = arith.constant 0 : index
    %68 = vector.load %arg8[%c0_32, %c0_33, %c0_34, %c0_35] : memref<2x4x32x8xf32, #tpu.memory_space<vmem>>, vector<1x4x32x8xf32>
    %69 = vector.shape_cast %68 : vector<1x4x32x8xf32> to vector<4x32x8xf32>
    %70 = vector.shape_cast %69 : vector<4x32x8xf32> to vector<1x4x32x8xf32>
    %71 = vector.shape_cast %70 : vector<1x4x32x8xf32> to vector<1x4x32x8xf32>
    %72 = vector.broadcast %71 : vector<1x4x32x8xf32> to vector<2x4x32x8xf32>
    %73 = vector.shape_cast %72 : vector<2x4x32x8xf32> to vector<8x32x8xf32>
    "tpu.trace_start"() <{level = 10 : i32, message = "stc,scd->std"}> : () -> ()
    %cst_36 = arith.constant dense<0.000000e+00> : vector<8x8x8xf32>
    %74 = tpu.matmul %37, %73, %cst_36 {dimension_numbers = #tpu.dot_dimension_numbers<[2], [1], [1], [2], [0, 0, 0, 1, 1, 2], [0], [0]>} : vector<8x8x32xf32>, vector<8x32x8xf32>, vector<8x8x8xf32> -> vector<8x8x8xf32>
    "tpu.trace_stop"() : () -> ()
    %c0_37 = arith.constant 0 : index
    %c0_38 = arith.constant 0 : index
    %c0_39 = arith.constant 0 : index
    %c0_40 = arith.constant 0 : index
    %75 = vector.load %arg9[%c0_37, %c0_38, %c0_39, %c0_40] : memref<2x4x1x8xf32, #tpu.memory_space<vmem>>, vector<1x4x1x8xf32>
    %76 = vector.shape_cast %75 : vector<1x4x1x8xf32> to vector<4x1x8xf32>
    %77 = vector.shape_cast %76 : vector<4x1x8xf32> to vector<1x4x1x8xf32>
    %78 = vector.shape_cast %77 : vector<1x4x1x8xf32> to vector<1x4x1x8xf32>
    %79 = vector.broadcast %78 : vector<1x4x1x8xf32> to vector<2x4x1x8xf32>
    %80 = vector.shape_cast %79 : vector<2x4x1x8xf32> to vector<8x1x8xf32>
    %81 = vector.broadcast %80 : vector<8x1x8xf32> to vector<8x8x8xf32>
    %82 = arith.addf %74, %81 : vector<8x8x8xf32>
    "tpu.trace_start"() <{level = 10 : i32, message = "sqd,skd->sqk"}> : () -> ()
    %cst_41 = arith.constant dense<0.000000e+00> : vector<8x8x8xf32>
    %83 = tpu.matmul %52, %67, %cst_41 {dimension_numbers = #tpu.dot_dimension_numbers<[2], [2], [1], [1], [0, 0, 0, 1, 1, 1], [0], [0]>} : vector<8x8x8xf32>, vector<8x8x8xf32>, vector<8x8x8xf32> -> vector<8x8x8xf32>
    "tpu.trace_stop"() : () -> ()
    %84 = vector.shape_cast %7 : vector<8x8xf32> to vector<1x8x8xf32>
    %85 = vector.broadcast %84 : vector<1x8x8xf32> to vector<8x8x8xf32>
    %86 = arith.addf %83, %85 : vector<8x8x8xf32>
    %cst_42 = arith.constant dense<0xFF800000> : vector<8x8xf32>
    %87 = vector.multi_reduction <maximumf>, %86, %cst_42 [2] : vector<8x8x8xf32> to vector<8x8xf32>
    %88 = vector.shape_cast %87 : vector<8x8xf32> to vector<8x8x1xf32>
    %89 = vector.broadcast %88 : vector<8x8x1xf32> to vector<8x8x8xf32>
    %90 = arith.subf %86, %89 : vector<8x8x8xf32>
    %91 = math.exp %90 : vector<8x8x8xf32>
    %cst_43 = arith.constant dense<0.000000e+00> : vector<8x8xf32>
    %92 = vector.multi_reduction <add>, %91, %cst_43 [2] : vector<8x8x8xf32> to vector<8x8xf32>
    %93 = vector.shape_cast %92 : vector<8x8xf32> to vector<8x8x1xf32>
    %94 = vector.broadcast %93 : vector<8x8x1xf32> to vector<8x8x8xf32>
    %95 = arith.divf %91, %94 : vector<8x8x8xf32>
    %c0_44 = arith.constant 0 : index
    %c0_45 = arith.constant 0 : index
    %c0_46 = arith.constant 0 : index
    %c0_47 = arith.constant 0 : index
    %96 = vector.load %arg22[%c0_44, %c0_45, %c0_46, %c0_47] : memref<2x8x8x8xf32, #tpu.memory_space<vmem>>, vector<1x8x8x8xf32>
    %97 = vector.shape_cast %96 : vector<1x8x8x8xf32> to vector<8x8x8xf32>
    %98 = vector.shape_cast %95 : vector<8x8x8xf32> to vector<1x8x8x8xf32>
    tpu.vector_store %arg22[%c0_44, %c0_45, %c0_46, %c0_47], %98 {strides = array<i32>} : memref<2x8x8x8xf32, #tpu.memory_space<vmem>>, vector<1x8x8x8xf32>,
    "tpu.trace_start"() <{level = 10 : i32, message = "sqk,skd->sqd"}> : () -> ()
    %cst_48 = arith.constant dense<0.000000e+00> : vector<8x8x8xf32>
    %99 = tpu.matmul %95, %82, %cst_48 {dimension_numbers = #tpu.dot_dimension_numbers<[2], [1], [1], [2], [0, 0, 0, 1, 1, 2], [0], [0]>} : vector<8x8x8xf32>, vector<8x8x8xf32>, vector<8x8x8xf32> -> vector<8x8x8xf32>
    "tpu.trace_stop"() : () -> ()
    %c0_49 = arith.constant 0 : index
    %c0_50 = arith.constant 0 : index
    %c0_51 = arith.constant 0 : index
    %c0_52 = arith.constant 0 : index
    %100 = vector.load %arg10[%c0_49, %c0_50, %c0_51, %c0_52] : memref<2x4x8x32xf32, #tpu.memory_space<vmem>>, vector<1x4x8x32xf32>
    %101 = vector.shape_cast %100 : vector<1x4x8x32xf32> to vector<4x8x32xf32>
    %102 = vector.shape_cast %101 : vector<4x8x32xf32> to vector<1x4x8x32xf32>
    %103 = vector.shape_cast %102 : vector<1x4x8x32xf32> to vector<1x4x8x32xf32>
    %104 = vector.broadcast %103 : vector<1x4x8x32xf32> to vector<2x4x8x32xf32>
    %105 = vector.shape_cast %104 : vector<2x4x8x32xf32> to vector<8x8x32xf32>
    "tpu.trace_start"() <{level = 10 : i32, message = "sqd,sdc->sqc"}> : () -> ()
    %cst_53 = arith.constant dense<0.000000e+00> : vector<8x8x32xf32>
    %106 = tpu.matmul %99, %105, %cst_53 {dimension_numbers = #tpu.dot_dimension_numbers<[2], [1], [1], [2], [0, 0, 0, 1, 1, 2], [0], [0]>} : vector<8x8x8xf32>, vector<8x8x32xf32>, vector<8x8x32xf32> -> vector<8x8x32xf32>
    "tpu.trace_stop"() : () -> ()
    %107 = vector.shape_cast %106 : vector<8x8x32xf32> to vector<2x4x8x32xf32>
    %108 = vector.extract_strided_slice %107 {offsets = [0, 0, 0, 0], sizes = [2, 1, 8, 32], strides = [1, 1, 1, 1]} : vector<2x4x8x32xf32> to vector<2x1x8x32xf32>
    %109 = vector.shape_cast %108 : vector<2x1x8x32xf32> to vector<2x8x32xf32>
    %110 = vector.extract_strided_slice %107 {offsets = [0, 1, 0, 0], sizes = [2, 1, 8, 32], strides = [1, 1, 1, 1]} : vector<2x4x8x32xf32> to vector<2x1x8x32xf32>
    %111 = vector.shape_cast %110 : vector<2x1x8x32xf32> to vector<2x8x32xf32>
    %112 = arith.addf %109, %111 : vector<2x8x32xf32>
    %113 = vector.extract_strided_slice %107 {offsets = [0, 2, 0, 0], sizes = [2, 1, 8, 32], strides = [1, 1, 1, 1]} : vector<2x4x8x32xf32> to vector<2x1x8x32xf32>
    %114 = vector.shape_cast %113 : vector<2x1x8x32xf32> to vector<2x8x32xf32>
    %115 = arith.addf %112, %114 : vector<2x8x32xf32>
    %116 = vector.extract_strided_slice %107 {offsets = [0, 3, 0, 0], sizes = [2, 1, 8, 32], strides = [1, 1, 1, 1]} : vector<2x4x8x32xf32> to vector<2x1x8x32xf32>
    %117 = vector.shape_cast %116 : vector<2x1x8x32xf32> to vector<2x8x32xf32>
    %118 = arith.addf %115, %117 : vector<2x8x32xf32>
    %119 = vector.shape_cast %118 : vector<2x8x32xf32> to vector<16x32xf32>
    %c0_54 = arith.constant 0 : index
    %c0_55 = arith.constant 0 : index
    %c0_56 = arith.constant 0 : index
    %120 = vector.load %arg11[%c0_54, %c0_55, %c0_56] : memref<2x1x32xf32, #tpu.memory_space<vmem>>, vector<1x1x32xf32>
    %121 = vector.shape_cast %120 : vector<1x1x32xf32> to vector<1x32xf32>
    %122 = vector.broadcast %121 : vector<1x32xf32> to vector<16x32xf32>
    %123 = arith.addf %119, %122 : vector<16x32xf32>
    %c0_57 = arith.constant 0 : index
    %c0_58 = arith.constant 0 : index
    %c0_59 = arith.constant 0 : index
    %124 = vector.load %arg23[%c0_57, %c0_58, %c0_59] : memref<2x16x32xf32, #tpu.memory_space<vmem>>, vector<1x16x32xf32>
    %125 = vector.shape_cast %124 : vector<1x16x32xf32> to vector<16x32xf32>
    %126 = vector.shape_cast %123 : vector<16x32xf32> to vector<1x16x32xf32>
    tpu.vector_store %arg23[%c0_57, %c0_58, %c0_59], %126 {strides = array<i32>} : memref<2x16x32xf32, #tpu.memory_space<vmem>>, vector<1x16x32xf32>,
    %127 = arith.addf %1, %123 : vector<16x32xf32>
    %c0_60 = arith.constant 0 : index
    %c0_61 = arith.constant 0 : index
    %c0_62 = arith.constant 0 : index
    %128 = vector.load %arg12[%c0_60, %c0_61, %c0_62] : memref<2x1x32xf32, #tpu.memory_space<vmem>>, vector<1x1x32xf32>
    %129 = vector.shape_cast %128 : vector<1x1x32xf32> to vector<1x32xf32>
    %c0_63 = arith.constant 0 : index
    %c0_64 = arith.constant 0 : index
    %c0_65 = arith.constant 0 : index
    %130 = vector.load %arg13[%c0_63, %c0_64, %c0_65] : memref<2x1x32xf32, #tpu.memory_space<vmem>>, vector<1x1x32xf32>
    %131 = vector.shape_cast %130 : vector<1x1x32xf32> to vector<1x32xf32>
    %cst_66 = arith.constant dense<0.000000e+00> : vector<16xf32>
    %132 = vector.multi_reduction <add>, %127, %cst_66 [1] : vector<16x32xf32> to vector<16xf32>
    %133 = vector.shape_cast %132 : vector<16xf32> to vector<16x1xf32>
    %cst_67 = arith.constant 3.200000e+01 : f32
    %134 = vector.broadcast %cst_67 : f32 to vector<16x1xf32>
    %135 = arith.divf %133, %134 : vector<16x1xf32>
    %136 = vector.broadcast %135 : vector<16x1xf32> to vector<16x32xf32>
    %137 = arith.subf %127, %136 : vector<16x32xf32>
    %138 = arith.mulf %137, %137 : vector<16x32xf32>
    %cst_68 = arith.constant dense<0.000000e+00> : vector<16xf32>
    %139 = vector.multi_reduction <add>, %138, %cst_68 [1] : vector<16x32xf32> to vector<16xf32>
    %140 = vector.shape_cast %139 : vector<16xf32> to vector<16x1xf32>
    %cst_69 = arith.constant 3.200000e+01 : f32
    %141 = vector.broadcast %cst_69 : f32 to vector<16x1xf32>
    %142 = arith.divf %140, %141 : vector<16x1xf32>
    %143 = vector.broadcast %135 : vector<16x1xf32> to vector<16x32xf32>
    %144 = arith.subf %127, %143 : vector<16x32xf32>
    %cst_70 = arith.constant 9.99999974E-6 : f32
    %145 = vector.broadcast %cst_70 : f32 to vector<16x1xf32>
    %146 = arith.addf %142, %145 : vector<16x1xf32>
    %147 = math.rsqrt %146 : vector<16x1xf32>
    %148 = vector.broadcast %147 : vector<16x1xf32> to vector<16x32xf32>
    %149 = arith.mulf %144, %148 : vector<16x32xf32>
    %150 = vector.broadcast %129 : vector<1x32xf32> to vector<16x32xf32>
    %151 = arith.mulf %149, %150 : vector<16x32xf32>
    %152 = vector.broadcast %131 : vector<1x32xf32> to vector<16x32xf32>
    %153 = arith.addf %151, %152 : vector<16x32xf32>
    %c0_71 = arith.constant 0 : index
    %c0_72 = arith.constant 0 : index
    %c0_73 = arith.constant 0 : index
    %154 = vector.load %arg14[%c0_71, %c0_72, %c0_73] : memref<2x32x128xf32, #tpu.memory_space<vmem>>, vector<1x32x128xf32>
    %155 = vector.shape_cast %154 : vector<1x32x128xf32> to vector<32x128xf32>
    %cst_74 = arith.constant dense<0.000000e+00> : vector<16x128xf32>
    %156 = tpu.matmul %153, %155, %cst_74 {dimension_numbers = #tpu.dot_dimension_numbers<[1], [0], [0], [1], [0, 0, 1, 1], [], []>} : vector<16x32xf32>, vector<32x128xf32>, vector<16x128xf32> -> vector<16x128xf32>
    %c0_75 = arith.constant 0 : index
    %c0_76 = arith.constant 0 : index
    %c0_77 = arith.constant 0 : index
    %157 = vector.load %arg15[%c0_75, %c0_76, %c0_77] : memref<2x1x128xf32, #tpu.memory_space<vmem>>, vector<1x1x128xf32>
    %158 = vector.shape_cast %157 : vector<1x1x128xf32> to vector<1x128xf32>
    %159 = vector.broadcast %158 : vector<1x128xf32> to vector<16x128xf32>
    %160 = arith.addf %156, %159 : vector<16x128xf32>
    %cst_78 = arith.constant 5.000000e-01 : f32
    %161 = vector.broadcast %cst_78 : f32 to vector<16x128xf32>
    %162 = arith.mulf %161, %160 : vector<16x128xf32>
    %cst_79 = arith.constant 0.707106769 : f32
    %163 = vector.broadcast %cst_79 : f32 to vector<16x128xf32>
    %164 = arith.mulf %160, %163 : vector<16x128xf32>
    %165 = math.erf %164 : vector<16x128xf32>
    %cst_80 = arith.constant 1.000000e+00 : f32
    %166 = vector.broadcast %cst_80 : f32 to vector<16x128xf32>
    %167 = arith.addf %166, %165 : vector<16x128xf32>
    %168 = arith.mulf %162, %167 : vector<16x128xf32>
    %c0_81 = arith.constant 0 : index
    %c0_82 = arith.constant 0 : index
    %c0_83 = arith.constant 0 : index
    %169 = vector.load %arg16[%c0_81, %c0_82, %c0_83] : memref<2x128x32xf32, #tpu.memory_space<vmem>>, vector<1x128x32xf32>
    %170 = vector.shape_cast %169 : vector<1x128x32xf32> to vector<128x32xf32>
    %cst_84 = arith.constant dense<0.000000e+00> : vector<16x32xf32>
    %171 = tpu.matmul %168, %170, %cst_84 {dimension_numbers = #tpu.dot_dimension_numbers<[1], [0], [0], [1], [0, 0, 1, 1], [], []>} : vector<16x128xf32>, vector<128x32xf32>, vector<16x32xf32> -> vector<16x32xf32>
    %c0_85 = arith.constant 0 : index
    %c0_86 = arith.constant 0 : index
    %c0_87 = arith.constant 0 : index
    %172 = vector.load %arg17[%c0_85, %c0_86, %c0_87] : memref<2x1x32xf32, #tpu.memory_space<vmem>>, vector<1x1x32xf32>
    %173 = vector.shape_cast %172 : vector<1x1x32xf32> to vector<1x32xf32>
    %174 = vector.broadcast %173 : vector<1x32xf32> to vector<16x32xf32>
    %175 = arith.addf %171, %174 : vector<16x32xf32>
    %176 = arith.addf %127, %175 : vector<16x32xf32>
    %c0_88 = arith.constant 0 : index
    %c0_89 = arith.constant 0 : index
    %c0_90 = arith.constant 0 : index
    %177 = vector.load %arg21[%c0_88, %c0_89, %c0_90] : memref<2x16x32xf32, #tpu.memory_space<vmem>>, vector<1x16x32xf32>
    %178 = vector.shape_cast %177 : vector<1x16x32xf32> to vector<16x32xf32>
    %179 = vector.shape_cast %176 : vector<16x32xf32> to vector<1x16x32xf32>
    tpu.vector_store %arg21[%c0_88, %c0_89, %c0_90], %179 {strides = array<i32>} : memref<2x16x32xf32, #tpu.memory_space<vmem>>, vector<1x16x32xf32>,
    %c1 = arith.constant 1 : index
    %c0_91 = arith.constant 0 : index
    %c0_92 = arith.constant 0 : index
    %180 = vector.load %arg2[%c1, %c0_91, %c0_92] : memref<2x1x32xf32, #tpu.memory_space<vmem>>, vector<1x1x32xf32>
    %181 = vector.shape_cast %180 : vector<1x1x32xf32> to vector<1x32xf32>
    %c1_93 = arith.constant 1 : index
    %c0_94 = arith.constant 0 : index
    %c0_95 = arith.constant 0 : index
    %182 = vector.load %arg3[%c1_93, %c0_94, %c0_95] : memref<2x1x32xf32, #tpu.memory_space<vmem>>, vector<1x1x32xf32>
    %183 = vector.shape_cast %182 : vector<1x1x32xf32> to vector<1x32xf32>
    %cst_96 = arith.constant dense<0.000000e+00> : vector<16xf32>
    %184 = vector.multi_reduction <add>, %176, %cst_96 [1] : vector<16x32xf32> to vector<16xf32>
    %185 = vector.shape_cast %184 : vector<16xf32> to vector<16x1xf32>
    %cst_97 = arith.constant 3.200000e+01 : f32
    %186 = vector.broadcast %cst_97 : f32 to vector<16x1xf32>
    %187 = arith.divf %185, %186 : vector<16x1xf32>
    %188 = vector.broadcast %187 : vector<16x1xf32> to vector<16x32xf32>
    %189 = arith.subf %176, %188 : vector<16x32xf32>
    %190 = arith.mulf %189, %189 : vector<16x32xf32>
    %cst_98 = arith.constant dense<0.000000e+00> : vector<16xf32>
    %191 = vector.multi_reduction <add>, %190, %cst_98 [1] : vector<16x32xf32> to vector<16xf32>
    %192 = vector.shape_cast %191 : vector<16xf32> to vector<16x1xf32>
    %cst_99 = arith.constant 3.200000e+01 : f32
    %193 = vector.broadcast %cst_99 : f32 to vector<16x1xf32>
    %194 = arith.divf %192, %193 : vector<16x1xf32>
    %195 = vector.broadcast %187 : vector<16x1xf32> to vector<16x32xf32>
    %196 = arith.subf %176, %195 : vector<16x32xf32>
    %cst_100 = arith.constant 9.99999974E-6 : f32
    %197 = vector.broadcast %cst_100 : f32 to vector<16x1xf32>
    %198 = arith.addf %194, %197 : vector<16x1xf32>
    %199 = math.rsqrt %198 : vector<16x1xf32>
    %200 = vector.broadcast %199 : vector<16x1xf32> to vector<16x32xf32>
    %201 = arith.mulf %196, %200 : vector<16x32xf32>
    %202 = vector.broadcast %181 : vector<1x32xf32> to vector<16x32xf32>
    %203 = arith.mulf %201, %202 : vector<16x32xf32>
    %204 = vector.broadcast %183 : vector<1x32xf32> to vector<16x32xf32>
    %205 = arith.addf %203, %204 : vector<16x32xf32>
    %206 = vector.shape_cast %205 : vector<16x32xf32> to vector<2x1x8x32xf32>
    %207 = vector.shape_cast %206 : vector<2x1x8x32xf32> to vector<2x1x8x32xf32>
    %208 = vector.broadcast %207 : vector<2x1x8x32xf32> to vector<2x4x8x32xf32>
    %209 = vector.shape_cast %208 : vector<2x4x8x32xf32> to vector<8x8x32xf32>
    %c1_101 = arith.constant 1 : index
    %c0_102 = arith.constant 0 : index
    %c0_103 = arith.constant 0 : index
    %c0_104 = arith.constant 0 : index
    %210 = vector.load %arg4[%c1_101, %c0_102, %c0_103, %c0_104] : memref<2x4x32x8xf32, #tpu.memory_space<vmem>>, vector<1x4x32x8xf32>
    %211 = vector.shape_cast %210 : vector<1x4x32x8xf32> to vector<4x32x8xf32>
    %212 = vector.shape_cast %211 : vector<4x32x8xf32> to vector<1x4x32x8xf32>
    %213 = vector.shape_cast %212 : vector<1x4x32x8xf32> to vector<1x4x32x8xf32>
    %214 = vector.broadcast %213 : vector<1x4x32x8xf32> to vector<2x4x32x8xf32>
    %215 = vector.shape_cast %214 : vector<2x4x32x8xf32> to vector<8x32x8xf32>
    "tpu.trace_start"() <{level = 10 : i32, message = "stc,scd->std"}> : () -> ()
    %cst_105 = arith.constant dense<0.000000e+00> : vector<8x8x8xf32>
    %216 = tpu.matmul %209, %215, %cst_105 {dimension_numbers = #tpu.dot_dimension_numbers<[2], [1], [1], [2], [0, 0, 0, 1, 1, 2], [0], [0]>} : vector<8x8x32xf32>, vector<8x32x8xf32>, vector<8x8x8xf32> -> vector<8x8x8xf32>
    "tpu.trace_stop"() : () -> ()
    %c1_106 = arith.constant 1 : index
    %c0_107 = arith.constant 0 : index
    %c0_108 = arith.constant 0 : index
    %c0_109 = arith.constant 0 : index
    %217 = vector.load %arg5[%c1_106, %c0_107, %c0_108, %c0_109] : memref<2x4x1x8xf32, #tpu.memory_space<vmem>>, vector<1x4x1x8xf32>
    %218 = vector.shape_cast %217 : vector<1x4x1x8xf32> to vector<4x1x8xf32>
    %219 = vector.shape_cast %218 : vector<4x1x8xf32> to vector<1x4x1x8xf32>
    %220 = vector.shape_cast %219 : vector<1x4x1x8xf32> to vector<1x4x1x8xf32>
    %221 = vector.broadcast %220 : vector<1x4x1x8xf32> to vector<2x4x1x8xf32>
    %222 = vector.shape_cast %221 : vector<2x4x1x8xf32> to vector<8x1x8xf32>
    %223 = vector.broadcast %222 : vector<8x1x8xf32> to vector<8x8x8xf32>
    %224 = arith.addf %216, %223 : vector<8x8x8xf32>
    %c1_110 = arith.constant 1 : index
    %c0_111 = arith.constant 0 : index
    %c0_112 = arith.constant 0 : index
    %c0_113 = arith.constant 0 : index
    %225 = vector.load %arg6[%c1_110, %c0_111, %c0_112, %c0_113] : memref<2x4x32x8xf32, #tpu.memory_space<vmem>>, vector<1x4x32x8xf32>
    %226 = vector.shape_cast %225 : vector<1x4x32x8xf32> to vector<4x32x8xf32>
    %227 = vector.shape_cast %226 : vector<4x32x8xf32> to vector<1x4x32x8xf32>
    %228 = vector.shape_cast %227 : vector<1x4x32x8xf32> to vector<1x4x32x8xf32>
    %229 = vector.broadcast %228 : vector<1x4x32x8xf32> to vector<2x4x32x8xf32>
    %230 = vector.shape_cast %229 : vector<2x4x32x8xf32> to vector<8x32x8xf32>
    "tpu.trace_start"() <{level = 10 : i32, message = "stc,scd->std"}> : () -> ()
    %cst_114 = arith.constant dense<0.000000e+00> : vector<8x8x8xf32>
    %231 = tpu.matmul %209, %230, %cst_114 {dimension_numbers = #tpu.dot_dimension_numbers<[2], [1], [1], [2], [0, 0, 0, 1, 1, 2], [0], [0]>} : vector<8x8x32xf32>, vector<8x32x8xf32>, vector<8x8x8xf32> -> vector<8x8x8xf32>
    "tpu.trace_stop"() : () -> ()
    %c1_115 = arith.constant 1 : index
    %c0_116 = arith.constant 0 : index
    %c0_117 = arith.constant 0 : index
    %c0_118 = arith.constant 0 : index
    %232 = vector.load %arg7[%c1_115, %c0_116, %c0_117, %c0_118] : memref<2x4x1x8xf32, #tpu.memory_space<vmem>>, vector<1x4x1x8xf32>
    %233 = vector.shape_cast %232 : vector<1x4x1x8xf32> to vector<4x1x8xf32>
    %234 = vector.shape_cast %233 : vector<4x1x8xf32> to vector<1x4x1x8xf32>
    %235 = vector.shape_cast %234 : vector<1x4x1x8xf32> to vector<1x4x1x8xf32>
    %236 = vector.broadcast %235 : vector<1x4x1x8xf32> to vector<2x4x1x8xf32>
    %237 = vector.shape_cast %236 : vector<2x4x1x8xf32> to vector<8x1x8xf32>
    %238 = vector.broadcast %237 : vector<8x1x8xf32> to vector<8x8x8xf32>
    %239 = arith.addf %231, %238 : vector<8x8x8xf32>
    %c1_119 = arith.constant 1 : index
    %c0_120 = arith.constant 0 : index
    %c0_121 = arith.constant 0 : index
    %c0_122 = arith.constant 0 : index
    %240 = vector.load %arg8[%c1_119, %c0_120, %c0_121, %c0_122] : memref<2x4x32x8xf32, #tpu.memory_space<vmem>>, vector<1x4x32x8xf32>
    %241 = vector.shape_cast %240 : vector<1x4x32x8xf32> to vector<4x32x8xf32>
    %242 = vector.shape_cast %241 : vector<4x32x8xf32> to vector<1x4x32x8xf32>
    %243 = vector.shape_cast %242 : vector<1x4x32x8xf32> to vector<1x4x32x8xf32>
    %244 = vector.broadcast %243 : vector<1x4x32x8xf32> to vector<2x4x32x8xf32>
    %245 = vector.shape_cast %244 : vector<2x4x32x8xf32> to vector<8x32x8xf32>
    "tpu.trace_start"() <{level = 10 : i32, message = "stc,scd->std"}> : () -> ()
    %cst_123 = arith.constant dense<0.000000e+00> : vector<8x8x8xf32>
    %246 = tpu.matmul %209, %245, %cst_123 {dimension_numbers = #tpu.dot_dimension_numbers<[2], [1], [1], [2], [0, 0, 0, 1, 1, 2], [0], [0]>} : vector<8x8x32xf32>, vector<8x32x8xf32>, vector<8x8x8xf32> -> vector<8x8x8xf32>
    "tpu.trace_stop"() : () -> ()
    %c1_124 = arith.constant 1 : index
    %c0_125 = arith.constant 0 : index
    %c0_126 = arith.constant 0 : index
    %c0_127 = arith.constant 0 : index
    %247 = vector.load %arg9[%c1_124, %c0_125, %c0_126, %c0_127] : memref<2x4x1x8xf32, #tpu.memory_space<vmem>>, vector<1x4x1x8xf32>
    %248 = vector.shape_cast %247 : vector<1x4x1x8xf32> to vector<4x1x8xf32>
    %249 = vector.shape_cast %248 : vector<4x1x8xf32> to vector<1x4x1x8xf32>
    %250 = vector.shape_cast %249 : vector<1x4x1x8xf32> to vector<1x4x1x8xf32>
    %251 = vector.broadcast %250 : vector<1x4x1x8xf32> to vector<2x4x1x8xf32>
    %252 = vector.shape_cast %251 : vector<2x4x1x8xf32> to vector<8x1x8xf32>
    %253 = vector.broadcast %252 : vector<8x1x8xf32> to vector<8x8x8xf32>
    %254 = arith.addf %246, %253 : vector<8x8x8xf32>
    "tpu.trace_start"() <{level = 10 : i32, message = "sqd,skd->sqk"}> : () -> ()
    %cst_128 = arith.constant dense<0.000000e+00> : vector<8x8x8xf32>
    %255 = tpu.matmul %224, %239, %cst_128 {dimension_numbers = #tpu.dot_dimension_numbers<[2], [2], [1], [1], [0, 0, 0, 1, 1, 1], [0], [0]>} : vector<8x8x8xf32>, vector<8x8x8xf32>, vector<8x8x8xf32> -> vector<8x8x8xf32>
    "tpu.trace_stop"() : () -> ()
    %256 = vector.shape_cast %7 : vector<8x8xf32> to vector<1x8x8xf32>
    %257 = vector.broadcast %256 : vector<1x8x8xf32> to vector<8x8x8xf32>
    %258 = arith.addf %255, %257 : vector<8x8x8xf32>
    %cst_129 = arith.constant dense<0xFF800000> : vector<8x8xf32>
    %259 = vector.multi_reduction <maximumf>, %258, %cst_129 [2] : vector<8x8x8xf32> to vector<8x8xf32>
    %260 = vector.shape_cast %259 : vector<8x8xf32> to vector<8x8x1xf32>
    %261 = vector.broadcast %260 : vector<8x8x1xf32> to vector<8x8x8xf32>
    %262 = arith.subf %258, %261 : vector<8x8x8xf32>
    %263 = math.exp %262 : vector<8x8x8xf32>
    %cst_130 = arith.constant dense<0.000000e+00> : vector<8x8xf32>
    %264 = vector.multi_reduction <add>, %263, %cst_130 [2] : vector<8x8x8xf32> to vector<8x8xf32>
    %265 = vector.shape_cast %264 : vector<8x8xf32> to vector<8x8x1xf32>
    %266 = vector.broadcast %265 : vector<8x8x1xf32> to vector<8x8x8xf32>
    %267 = arith.divf %263, %266 : vector<8x8x8xf32>
    %c1_131 = arith.constant 1 : index
    %c0_132 = arith.constant 0 : index
    %c0_133 = arith.constant 0 : index
    %c0_134 = arith.constant 0 : index
    %268 = vector.load %arg22[%c1_131, %c0_132, %c0_133, %c0_134] : memref<2x8x8x8xf32, #tpu.memory_space<vmem>>, vector<1x8x8x8xf32>
    %269 = vector.shape_cast %268 : vector<1x8x8x8xf32> to vector<8x8x8xf32>
    %270 = vector.shape_cast %267 : vector<8x8x8xf32> to vector<1x8x8x8xf32>
    tpu.vector_store %arg22[%c1_131, %c0_132, %c0_133, %c0_134], %270 {strides = array<i32>} : memref<2x8x8x8xf32, #tpu.memory_space<vmem>>, vector<1x8x8x8xf32>,
    "tpu.trace_start"() <{level = 10 : i32, message = "sqk,skd->sqd"}> : () -> ()
    %cst_135 = arith.constant dense<0.000000e+00> : vector<8x8x8xf32>
    %271 = tpu.matmul %267, %254, %cst_135 {dimension_numbers = #tpu.dot_dimension_numbers<[2], [1], [1], [2], [0, 0, 0, 1, 1, 2], [0], [0]>} : vector<8x8x8xf32>, vector<8x8x8xf32>, vector<8x8x8xf32> -> vector<8x8x8xf32>
    "tpu.trace_stop"() : () -> ()
    %c1_136 = arith.constant 1 : index
    %c0_137 = arith.constant 0 : index
    %c0_138 = arith.constant 0 : index
    %c0_139 = arith.constant 0 : index
    %272 = vector.load %arg10[%c1_136, %c0_137, %c0_138, %c0_139] : memref<2x4x8x32xf32, #tpu.memory_space<vmem>>, vector<1x4x8x32xf32>
    %273 = vector.shape_cast %272 : vector<1x4x8x32xf32> to vector<4x8x32xf32>
    %274 = vector.shape_cast %273 : vector<4x8x32xf32> to vector<1x4x8x32xf32>
    %275 = vector.shape_cast %274 : vector<1x4x8x32xf32> to vector<1x4x8x32xf32>
    %276 = vector.broadcast %275 : vector<1x4x8x32xf32> to vector<2x4x8x32xf32>
    %277 = vector.shape_cast %276 : vector<2x4x8x32xf32> to vector<8x8x32xf32>
    "tpu.trace_start"() <{level = 10 : i32, message = "sqd,sdc->sqc"}> : () -> ()
    %cst_140 = arith.constant dense<0.000000e+00> : vector<8x8x32xf32>
    %278 = tpu.matmul %271, %277, %cst_140 {dimension_numbers = #tpu.dot_dimension_numbers<[2], [1], [1], [2], [0, 0, 0, 1, 1, 2], [0], [0]>} : vector<8x8x8xf32>, vector<8x8x32xf32>, vector<8x8x32xf32> -> vector<8x8x32xf32>
    "tpu.trace_stop"() : () -> ()
    %279 = vector.shape_cast %278 : vector<8x8x32xf32> to vector<2x4x8x32xf32>
    %280 = vector.extract_strided_slice %279 {offsets = [0, 0, 0, 0], sizes = [2, 1, 8, 32], strides = [1, 1, 1, 1]} : vector<2x4x8x32xf32> to vector<2x1x8x32xf32>
    %281 = vector.shape_cast %280 : vector<2x1x8x32xf32> to vector<2x8x32xf32>
    %282 = vector.extract_strided_slice %279 {offsets = [0, 1, 0, 0], sizes = [2, 1, 8, 32], strides = [1, 1, 1, 1]} : vector<2x4x8x32xf32> to vector<2x1x8x32xf32>
    %283 = vector.shape_cast %282 : vector<2x1x8x32xf32> to vector<2x8x32xf32>
    %284 = arith.addf %281, %283 : vector<2x8x32xf32>
    %285 = vector.extract_strided_slice %279 {offsets = [0, 2, 0, 0], sizes = [2, 1, 8, 32], strides = [1, 1, 1, 1]} : vector<2x4x8x32xf32> to vector<2x1x8x32xf32>
    %286 = vector.shape_cast %285 : vector<2x1x8x32xf32> to vector<2x8x32xf32>
    %287 = arith.addf %284, %286 : vector<2x8x32xf32>
    %288 = vector.extract_strided_slice %279 {offsets = [0, 3, 0, 0], sizes = [2, 1, 8, 32], strides = [1, 1, 1, 1]} : vector<2x4x8x32xf32> to vector<2x1x8x32xf32>
    %289 = vector.shape_cast %288 : vector<2x1x8x32xf32> to vector<2x8x32xf32>
    %290 = arith.addf %287, %289 : vector<2x8x32xf32>
    %291 = vector.shape_cast %290 : vector<2x8x32xf32> to vector<16x32xf32>
    %c1_141 = arith.constant 1 : index
    %c0_142 = arith.constant 0 : index
    %c0_143 = arith.constant 0 : index
    %292 = vector.load %arg11[%c1_141, %c0_142, %c0_143] : memref<2x1x32xf32, #tpu.memory_space<vmem>>, vector<1x1x32xf32>
    %293 = vector.shape_cast %292 : vector<1x1x32xf32> to vector<1x32xf32>
    %294 = vector.broadcast %293 : vector<1x32xf32> to vector<16x32xf32>
    %295 = arith.addf %291, %294 : vector<16x32xf32>
    %c1_144 = arith.constant 1 : index
    %c0_145 = arith.constant 0 : index
    %c0_146 = arith.constant 0 : index
    %296 = vector.load %arg23[%c1_144, %c0_145, %c0_146] : memref<2x16x32xf32, #tpu.memory_space<vmem>>, vector<1x16x32xf32>
    %297 = vector.shape_cast %296 : vector<1x16x32xf32> to vector<16x32xf32>
    %298 = vector.shape_cast %295 : vector<16x32xf32> to vector<1x16x32xf32>
    tpu.vector_store %arg23[%c1_144, %c0_145, %c0_146], %298 {strides = array<i32>} : memref<2x16x32xf32, #tpu.memory_space<vmem>>, vector<1x16x32xf32>,
    %299 = arith.addf %176, %295 : vector<16x32xf32>
    %c1_147 = arith.constant 1 : index
    %c0_148 = arith.constant 0 : index
    %c0_149 = arith.constant 0 : index
    %300 = vector.load %arg12[%c1_147, %c0_148, %c0_149] : memref<2x1x32xf32, #tpu.memory_space<vmem>>, vector<1x1x32xf32>
    %301 = vector.shape_cast %300 : vector<1x1x32xf32> to vector<1x32xf32>
    %c1_150 = arith.constant 1 : index
    %c0_151 = arith.constant 0 : index
    %c0_152 = arith.constant 0 : index
    %302 = vector.load %arg13[%c1_150, %c0_151, %c0_152] : memref<2x1x32xf32, #tpu.memory_space<vmem>>, vector<1x1x32xf32>
    %303 = vector.shape_cast %302 : vector<1x1x32xf32> to vector<1x32xf32>
    %cst_153 = arith.constant dense<0.000000e+00> : vector<16xf32>
    %304 = vector.multi_reduction <add>, %299, %cst_153 [1] : vector<16x32xf32> to vector<16xf32>
    %305 = vector.shape_cast %304 : vector<16xf32> to vector<16x1xf32>
    %cst_154 = arith.constant 3.200000e+01 : f32
    %306 = vector.broadcast %cst_154 : f32 to vector<16x1xf32>
    %307 = arith.divf %305, %306 : vector<16x1xf32>
    %308 = vector.broadcast %307 : vector<16x1xf32> to vector<16x32xf32>
    %309 = arith.subf %299, %308 : vector<16x32xf32>
    %310 = arith.mulf %309, %309 : vector<16x32xf32>
    %cst_155 = arith.constant dense<0.000000e+00> : vector<16xf32>
    %311 = vector.multi_reduction <add>, %310, %cst_155 [1] : vector<16x32xf32> to vector<16xf32>
    %312 = vector.shape_cast %311 : vector<16xf32> to vector<16x1xf32>
    %cst_156 = arith.constant 3.200000e+01 : f32
    %313 = vector.broadcast %cst_156 : f32 to vector<16x1xf32>
    %314 = arith.divf %312, %313 : vector<16x1xf32>
    %315 = vector.broadcast %307 : vector<16x1xf32> to vector<16x32xf32>
    %316 = arith.subf %299, %315 : vector<16x32xf32>
    %cst_157 = arith.constant 9.99999974E-6 : f32
    %317 = vector.broadcast %cst_157 : f32 to vector<16x1xf32>
    %318 = arith.addf %314, %317 : vector<16x1xf32>
    %319 = math.rsqrt %318 : vector<16x1xf32>
    %320 = vector.broadcast %319 : vector<16x1xf32> to vector<16x32xf32>
    %321 = arith.mulf %316, %320 : vector<16x32xf32>
    %322 = vector.broadcast %301 : vector<1x32xf32> to vector<16x32xf32>
    %323 = arith.mulf %321, %322 : vector<16x32xf32>
    %324 = vector.broadcast %303 : vector<1x32xf32> to vector<16x32xf32>
    %325 = arith.addf %323, %324 : vector<16x32xf32>
    %c1_158 = arith.constant 1 : index
    %c0_159 = arith.constant 0 : index
    %c0_160 = arith.constant 0 : index
    %326 = vector.load %arg14[%c1_158, %c0_159, %c0_160] : memref<2x32x128xf32, #tpu.memory_space<vmem>>, vector<1x32x128xf32>
    %327 = vector.shape_cast %326 : vector<1x32x128xf32> to vector<32x128xf32>
    %cst_161 = arith.constant dense<0.000000e+00> : vector<16x128xf32>
    %328 = tpu.matmul %325, %327, %cst_161 {dimension_numbers = #tpu.dot_dimension_numbers<[1], [0], [0], [1], [0, 0, 1, 1], [], []>} : vector<16x32xf32>, vector<32x128xf32>, vector<16x128xf32> -> vector<16x128xf32>
    %c1_162 = arith.constant 1 : index
    %c0_163 = arith.constant 0 : index
    %c0_164 = arith.constant 0 : index
    %329 = vector.load %arg15[%c1_162, %c0_163, %c0_164] : memref<2x1x128xf32, #tpu.memory_space<vmem>>, vector<1x1x128xf32>
    %330 = vector.shape_cast %329 : vector<1x1x128xf32> to vector<1x128xf32>
    %331 = vector.broadcast %330 : vector<1x128xf32> to vector<16x128xf32>
    %332 = arith.addf %328, %331 : vector<16x128xf32>
    %cst_165 = arith.constant 5.000000e-01 : f32
    %333 = vector.broadcast %cst_165 : f32 to vector<16x128xf32>
    %334 = arith.mulf %333, %332 : vector<16x128xf32>
    %cst_166 = arith.constant 0.707106769 : f32
    %335 = vector.broadcast %cst_166 : f32 to vector<16x128xf32>
    %336 = arith.mulf %332, %335 : vector<16x128xf32>
    %337 = math.erf %336 : vector<16x128xf32>
    %cst_167 = arith.constant 1.000000e+00 : f32
    %338 = vector.broadcast %cst_167 : f32 to vector<16x128xf32>
    %339 = arith.addf %338, %337 : vector<16x128xf32>
    %340 = arith.mulf %334, %339 : vector<16x128xf32>
    %c1_168 = arith.constant 1 : index
    %c0_169 = arith.constant 0 : index
    %c0_170 = arith.constant 0 : index
    %341 = vector.load %arg16[%c1_168, %c0_169, %c0_170] : memref<2x128x32xf32, #tpu.memory_space<vmem>>, vector<1x128x32xf32>
    %342 = vector.shape_cast %341 : vector<1x128x32xf32> to vector<128x32xf32>
    %cst_171 = arith.constant dense<0.000000e+00> : vector<16x32xf32>
    %343 = tpu.matmul %340, %342, %cst_171 {dimension_numbers = #tpu.dot_dimension_numbers<[1], [0], [0], [1], [0, 0, 1, 1], [], []>} : vector<16x128xf32>, vector<128x32xf32>, vector<16x32xf32> -> vector<16x32xf32>
    %c1_172 = arith.constant 1 : index
    %c0_173 = arith.constant 0 : index
    %c0_174 = arith.constant 0 : index
    %344 = vector.load %arg17[%c1_172, %c0_173, %c0_174] : memref<2x1x32xf32, #tpu.memory_space<vmem>>, vector<1x1x32xf32>
    %345 = vector.shape_cast %344 : vector<1x1x32xf32> to vector<1x32xf32>
    %346 = vector.broadcast %345 : vector<1x32xf32> to vector<16x32xf32>
    %347 = arith.addf %343, %346 : vector<16x32xf32>
    %348 = arith.addf %299, %347 : vector<16x32xf32>
    %c1_175 = arith.constant 1 : index
    %c0_176 = arith.constant 0 : index
    %c0_177 = arith.constant 0 : index
    %349 = vector.load %arg21[%c1_175, %c0_176, %c0_177] : memref<2x16x32xf32, #tpu.memory_space<vmem>>, vector<1x16x32xf32>
    %350 = vector.shape_cast %349 : vector<1x16x32xf32> to vector<16x32xf32>
    %351 = vector.shape_cast %348 : vector<16x32xf32> to vector<1x16x32xf32>
    tpu.vector_store %arg21[%c1_175, %c0_176, %c0_177], %351 {strides = array<i32>} : memref<2x16x32xf32, #tpu.memory_space<vmem>>, vector<1x16x32xf32>,
    %c0_178 = arith.constant 0 : index
    %c0_179 = arith.constant 0 : index
    %352 = vector.load %arg18[%c0_178, %c0_179] : memref<1x32xf32, #tpu.memory_space<vmem>>, vector<1x32xf32>
    %c0_180 = arith.constant 0 : index
    %c0_181 = arith.constant 0 : index
    %353 = vector.load %arg19[%c0_180, %c0_181] : memref<1x32xf32, #tpu.memory_space<vmem>>, vector<1x32xf32>
    %cst_182 = arith.constant dense<0.000000e+00> : vector<16xf32>
    %354 = vector.multi_reduction <add>, %348, %cst_182 [1] : vector<16x32xf32> to vector<16xf32>
    %355 = vector.shape_cast %354 : vector<16xf32> to vector<16x1xf32>
    %cst_183 = arith.constant 3.200000e+01 : f32
    %356 = vector.broadcast %cst_183 : f32 to vector<16x1xf32>
    %357 = arith.divf %355, %356 : vector<16x1xf32>
    %358 = vector.broadcast %357 : vector<16x1xf32> to vector<16x32xf32>
    %359 = arith.subf %348, %358 : vector<16x32xf32>
    %360 = arith.mulf %359, %359 : vector<16x32xf32>
    %cst_184 = arith.constant dense<0.000000e+00> : vector<16xf32>
    %361 = vector.multi_reduction <add>, %360, %cst_184 [1] : vector<16x32xf32> to vector<16xf32>
    %362 = vector.shape_cast %361 : vector<16xf32> to vector<16x1xf32>
    %cst_185 = arith.constant 3.200000e+01 : f32
    %363 = vector.broadcast %cst_185 : f32 to vector<16x1xf32>
    %364 = arith.divf %362, %363 : vector<16x1xf32>
    %365 = vector.broadcast %357 : vector<16x1xf32> to vector<16x32xf32>
    %366 = arith.subf %348, %365 : vector<16x32xf32>
    %cst_186 = arith.constant 9.99999974E-6 : f32
    %367 = vector.broadcast %cst_186 : f32 to vector<16x1xf32>
    %368 = arith.addf %364, %367 : vector<16x1xf32>
    %369 = math.rsqrt %368 : vector<16x1xf32>
    %370 = vector.broadcast %369 : vector<16x1xf32> to vector<16x32xf32>
    %371 = arith.mulf %366, %370 : vector<16x32xf32>
    %372 = vector.broadcast %352 : vector<1x32xf32> to vector<16x32xf32>
    %373 = arith.mulf %371, %372 : vector<16x32xf32>
    %374 = vector.broadcast %353 : vector<1x32xf32> to vector<16x32xf32>
    %375 = arith.addf %373, %374 : vector<16x32xf32>
    %c0_187 = arith.constant 0 : index
    %c0_188 = arith.constant 0 : index
    %376 = vector.load %arg24[%c0_187, %c0_188] : memref<16x32xf32, #tpu.memory_space<vmem>>, vector<16x32xf32>
    tpu.vector_store %arg24[%c0_187, %c0_188], %375 {strides = array<i32>} : memref<16x32xf32, #tpu.memory_space<vmem>>, vector<16x32xf32>,
    %377 = vector.shape_cast %375 : vector<16x32xf32> to vector<2x8x32xf32>
    %378 = vector.extract_strided_slice %377 {offsets = [0, 7, 0], sizes = [2, 1, 32], strides = [1, 1, 1]} : vector<2x8x32xf32> to vector<2x1x32xf32>
    %379 = vector.shape_cast %378 : vector<2x1x32xf32> to vector<2x32xf32>
    %c0_189 = arith.constant 0 : index
    %c0_190 = arith.constant 0 : index
    %380 = vector.load %arg20[%c0_189, %c0_190] : memref<64x32xf32, #tpu.memory_space<vmem>>, vector<64x32xf32>
    %cst_191 = arith.constant dense<0.000000e+00> : vector<2x64xf32>
    %381 = tpu.matmul %379, %380, %cst_191 {dimension_numbers = #tpu.dot_dimension_numbers<[1], [1], [0], [0], [0, 0, 1, 0], [], []>} : vector<2x32xf32>, vector<64x32xf32>, vector<2x64xf32> -> vector<2x64xf32>
    %c0_192 = arith.constant 0 : index
    %c0_193 = arith.constant 0 : index
    %382 = vector.load %arg25[%c0_192, %c0_193] : memref<2x64xf32, #tpu.memory_space<vmem>>, vector<2x64xf32>
    tpu.vector_store %arg25[%c0_192, %c0_193], %381 {strides = array<i32>} : memref<2x64xf32, #tpu.memory_space<vmem>>, vector<2x64xf32>,
    return
  }
  func.func @transform_0(%arg0: i32) -> (i32, i32, i32) {
    %c0_i32 = arith.constant 0 : i32
    %c0_i32_0 = arith.constant 0 : i32
    %c0_i32_1 = arith.constant 0 : i32
    %c0_i32_2 = arith.constant 0 : i32
    return %c0_i32, %c0_i32_0, %c0_i32_1 : i32, i32, i32
  }
  func.func @transform_1(%arg0: i32) -> (i32, i32, i32) {
    %c0_i32 = arith.constant 0 : i32
    %c0_i32_0 = arith.constant 0 : i32
    %c0_i32_1 = arith.constant 0 : i32
    %c0_i32_2 = arith.constant 0 : i32
    return %c0_i32, %c0_i32_0, %c0_i32_1 : i32, i32, i32
  }
  func.func @transform_2(%arg0: i32) -> (i32, i32, i32) {
    %c0_i32 = arith.constant 0 : i32
    %c0_i32_0 = arith.constant 0 : i32
    %c0_i32_1 = arith.constant 0 : i32
    %c0_i32_2 = arith.constant 0 : i32
    return %c0_i32, %c0_i32_0, %c0_i32_1 : i32, i32, i32
  }
  func.func @transform_3(%arg0: i32) -> (i32, i32, i32, i32) {
    %c0_i32 = arith.constant 0 : i32
    %c0_i32_0 = arith.constant 0 : i32
    %c0_i32_1 = arith.constant 0 : i32
    %c0_i32_2 = arith.constant 0 : i32
    %c0_i32_3 = arith.constant 0 : i32
    return %c0_i32, %c0_i32_0, %c0_i32_1, %c0_i32_2 : i32, i32, i32, i32
  }
  func.func @transform_4(%arg0: i32) -> (i32, i32, i32, i32) {
    %c0_i32 = arith.constant 0 : i32
    %c0_i32_0 = arith.constant 0 : i32
    %c0_i32_1 = arith.constant 0 : i32
    %c0_i32_2 = arith.constant 0 : i32
    %c0_i32_3 = arith.constant 0 : i32
    return %c0_i32, %c0_i32_0, %c0_i32_1, %c0_i32_2 : i32, i32, i32, i32
  }
  func.func @transform_5(%arg0: i32) -> (i32, i32, i32, i32) {
    %c0_i32 = arith.constant 0 : i32
    %c0_i32_0 = arith.constant 0 : i32
    %c0_i32_1 = arith.constant 0 : i32
    %c0_i32_2 = arith.constant 0 : i32
    %c0_i32_3 = arith.constant 0 : i32
    return %c0_i32, %c0_i32_0, %c0_i32_1, %c0_i32_2 : i32, i32, i32, i32
  }
  func.func @transform_6(%arg0: i32) -> (i32, i32, i32, i32) {
    %c0_i32 = arith.constant 0 : i32
    %c0_i32_0 = arith.constant 0 : i32
    %c0_i32_1 = arith.constant 0 : i32
    %c0_i32_2 = arith.constant 0 : i32
    %c0_i32_3 = arith.constant 0 : i32
    return %c0_i32, %c0_i32_0, %c0_i32_1, %c0_i32_2 : i32, i32, i32, i32
  }
  func.func @transform_7(%arg0: i32) -> (i32, i32, i32, i32) {
    %c0_i32 = arith.constant 0 : i32
    %c0_i32_0 = arith.constant 0 : i32
    %c0_i32_1 = arith.constant 0 : i32
    %c0_i32_2 = arith.constant 0 : i32
    %c0_i32_3 = arith.constant 0 : i32
    return %c0_i32, %c0_i32_0, %c0_i32_1, %c0_i32_2 : i32, i32, i32, i32
  }
  func.func @transform_8(%arg0: i32) -> (i32, i32, i32, i32) {
    %c0_i32 = arith.constant 0 : i32
    %c0_i32_0 = arith.constant 0 : i32
    %c0_i32_1 = arith.constant 0 : i32
    %c0_i32_2 = arith.constant 0 : i32
    %c0_i32_3 = arith.constant 0 : i32
    return %c0_i32, %c0_i32_0, %c0_i32_1, %c0_i32_2 : i32, i32, i32, i32
  }
  func.func @transform_9(%arg0: i32) -> (i32, i32, i32, i32) {
    %c0_i32 = arith.constant 0 : i32
    %c0_i32_0 = arith.constant 0 : i32
    %c0_i32_1 = arith.constant 0 : i32
    %c0_i32_2 = arith.constant 0 : i32
    %c0_i32_3 = arith.constant 0 : i32
    return %c0_i32, %c0_i32_0, %c0_i32_1, %c0_i32_2 : i32, i32, i32, i32
  }
  func.func @transform_10(%arg0: i32) -> (i32, i32, i32) {
    %c0_i32 = arith.constant 0 : i32
    %c0_i32_0 = arith.constant 0 : i32
    %c0_i32_1 = arith.constant 0 : i32
    %c0_i32_2 = arith.constant 0 : i32
    return %c0_i32, %c0_i32_0, %c0_i32_1 : i32, i32, i32
  }
  func.func @transform_11(%arg0: i32) -> (i32, i32, i32) {
    %c0_i32 = arith.constant 0 : i32
    %c0_i32_0 = arith.constant 0 : i32
    %c0_i32_1 = arith.constant 0 : i32
    %c0_i32_2 = arith.constant 0 : i32
    return %c0_i32, %c0_i32_0, %c0_i32_1 : i32, i32, i32
  }
  func.func @transform_12(%arg0: i32) -> (i32, i32, i32) {
    %c0_i32 = arith.constant 0 : i32
    %c0_i32_0 = arith.constant 0 : i32
    %c0_i32_1 = arith.constant 0 : i32
    %c0_i32_2 = arith.constant 0 : i32
    return %c0_i32, %c0_i32_0, %c0_i32_1 : i32, i32, i32
  }
  func.func @transform_13(%arg0: i32) -> (i32, i32, i32) {
    %c0_i32 = arith.constant 0 : i32
    %c0_i32_0 = arith.constant 0 : i32
    %c0_i32_1 = arith.constant 0 : i32
    %c0_i32_2 = arith.constant 0 : i32
    return %c0_i32, %c0_i32_0, %c0_i32_1 : i32, i32, i32
  }
  func.func @transform_14(%arg0: i32) -> (i32, i32, i32) {
    %c0_i32 = arith.constant 0 : i32
    %c0_i32_0 = arith.constant 0 : i32
    %c0_i32_1 = arith.constant 0 : i32
    %c0_i32_2 = arith.constant 0 : i32
    return %c0_i32, %c0_i32_0, %c0_i32_1 : i32, i32, i32
  }
  func.func @transform_15(%arg0: i32) -> (i32, i32, i32) {
    %c0_i32 = arith.constant 0 : i32
    %c0_i32_0 = arith.constant 0 : i32
    %c0_i32_1 = arith.constant 0 : i32
    %c0_i32_2 = arith.constant 0 : i32
    return %c0_i32, %c0_i32_0, %c0_i32_1 : i32, i32, i32
  }
  func.func @transform_16(%arg0: i32) -> (i32, i32, i32) {
    %c0_i32 = arith.constant 0 : i32
    %c0_i32_0 = arith.constant 0 : i32
    %c0_i32_1 = arith.constant 0 : i32
    %c0_i32_2 = arith.constant 0 : i32
    return %c0_i32, %c0_i32_0, %c0_i32_1 : i32, i32, i32
  }
  func.func @transform_17(%arg0: i32) -> (i32, i32) {
    %c0_i32 = arith.constant 0 : i32
    %c0_i32_0 = arith.constant 0 : i32
    %c0_i32_1 = arith.constant 0 : i32
    return %c0_i32, %c0_i32_0 : i32, i32
  }
  func.func @transform_18(%arg0: i32) -> (i32, i32) {
    %c0_i32 = arith.constant 0 : i32
    %c0_i32_0 = arith.constant 0 : i32
    %c0_i32_1 = arith.constant 0 : i32
    return %c0_i32, %c0_i32_0 : i32, i32
  }
  func.func @transform_19(%arg0: i32) -> (i32, i32) {
    %c0_i32 = arith.constant 0 : i32
    %c0_i32_0 = arith.constant 0 : i32
    %c0_i32_1 = arith.constant 0 : i32
    return %c0_i32, %c0_i32_0 : i32, i32
  }
  func.func @transform_20(%arg0: i32) -> (i32, i32, i32) {
    %c0_i32 = arith.constant 0 : i32
    %c0_i32_0 = arith.constant 0 : i32
    %c0_i32_1 = arith.constant 0 : i32
    %c0_i32_2 = arith.constant 0 : i32
    return %c0_i32, %c0_i32_0, %c0_i32_1 : i32, i32, i32
  }
  func.func @transform_21(%arg0: i32) -> (i32, i32, i32, i32) {
    %c0_i32 = arith.constant 0 : i32
    %c0_i32_0 = arith.constant 0 : i32
    %c0_i32_1 = arith.constant 0 : i32
    %c0_i32_2 = arith.constant 0 : i32
    %c0_i32_3 = arith.constant 0 : i32
    return %c0_i32, %c0_i32_0, %c0_i32_1, %c0_i32_2 : i32, i32, i32, i32
  }
  func.func @transform_22(%arg0: i32) -> (i32, i32, i32) {
    %c0_i32 = arith.constant 0 : i32
    %c0_i32_0 = arith.constant 0 : i32
    %c0_i32_1 = arith.constant 0 : i32
    %c0_i32_2 = arith.constant 0 : i32
    return %c0_i32, %c0_i32_0, %c0_i32_1 : i32, i32, i32
  }
  func.func @transform_23(%arg0: i32) -> (i32, i32) {
    %c0_i32 = arith.constant 0 : i32
    %c0_i32_0 = arith.constant 0 : i32
    %c0_i32_1 = arith.constant 0 : i32
    return %c0_i32, %c0_i32_0 : i32, i32
  }
  func.func @transform_24(%arg0: i32) -> (i32, i32) {
    %c0_i32 = arith.constant 0 : i32
    %c0_i32_0 = arith.constant 0 : i32
    %c0_i32_1 = arith.constant 0 : i32
    return %c0_i32, %c0_i32_0 : i32, i32
  }
}

</mosaic_0001>

<bundles_post_ra>
// kernel: gpt_forward.1
= control target key start
LH: loop header
LB: loop body
LE: loop exit
PB: predicated region body
PF: predicated region fallthrough
CT: control target
= control target key end

     0   :  { %s11943_s0 = inlined_call_operand.vmem [shape: f32[2,8,32], index: 0, kind: input, shape index: {}]   ;;  %s11944_s1 = inlined_call_operand.vmem [shape: f32[2,1,32], index: 1, kind: input, shape index: {}]   ;;  %s11945_s2 = inlined_call_operand.vmem [shape: f32[2,1,32], index: 2, kind: input, shape index: {}]   ;;  %s11946_s3 = inlined_call_operand.vmem [shape: f32[2,4,32,8], index: 3, kind: input, shape index: {}]   ;;  %s11947_s4 = inlined_call_operand.vmem [shape: f32[2,4,1,8], index: 4, kind: input, shape index: {}]   ;;  %s11948_s5 = inlined_call_operand.vmem [shape: f32[2,4,32,8], index: 5, kind: input, shape index: {}]   ;;  %s11949_s6 = inlined_call_operand.vmem [shape: f32[2,4,1,8], index: 6, kind: input, shape index: {}]   ;;  %s11950_s7 = inlined_call_operand.vmem [shape: f32[2,4,32,8], index: 7, kind: input, shape index: {}]   ;;  %s11951_s8 = inlined_call_operand.vmem [shape: f32[2,4,1,8], index: 8, kind: input, shape index: {}]   ;;  %s11952_s9 = inlined_call_operand.vmem [shape: f32[2,4,8,32], index: 9, kind: input, shape index: {}]   ;;  %s11953_s10 = inlined_call_operand.vmem [shape: f32[2,1,32], index: 10, kind: input, shape index: {}]   ;;  %s11954_s11 = inlined_call_operand.vmem [shape: f32[2,1,32], index: 11, kind: input, shape index: {}]   ;;  %s11955_s12 = inlined_call_operand.vmem [shape: f32[2,1,32], index: 12, kind: input, shape index: {}]   ;;  %s11956_s13 = inlined_call_operand.vmem [shape: f32[2,32,128], index: 13, kind: input, shape index: {}]   ;;  %s11957_s14 = inlined_call_operand.vmem [shape: f32[2,1,128], index: 14, kind: input, shape index: {}]   ;;  %s11958_s15 = inlined_call_operand.vmem [shape: f32[2,128,32], index: 15, kind: input, shape index: {}]   ;;  %s11959_s16 = inlined_call_operand.vmem [shape: f32[2,1,32], index: 16, kind: input, shape index: {}]   ;;  %s11960_s17 = inlined_call_operand.vmem [shape: f32[1,32], index: 17, kind: input, shape index: {}]   ;;  %s11961_s18 = inlined_call_operand.vmem [shape: f32[1,32], index: 18, kind: input, shape index: {}]   ;;  %s11962_s19 = inlined_call_operand.vmem [shape: f32[64,32], index: 19, kind: input, shape index: {}]   ;;  %s11963_s20 = inlined_call_operand.vmem [shape: f32[2,16,32], index: 20, kind: output, shape index: {0}]   ;;  %s11964_s21 = inlined_call_operand.vmem [shape: f32[2,8,8,8], index: 21, kind: output, shape index: {1}]   ;;  %s11965_s22 = inlined_call_operand.vmem [shape: f32[2,16,32], index: 22, kind: output, shape index: {2}]   ;;  %s11966_s23 = inlined_call_operand.hbm [shape: f32[16,32], index: 23, kind: output, shape index: {3}]   ;;  %s11967_s24 = inlined_call_operand.hbm [shape: f32[2,64], index: 24, kind: output, shape index: {4}]  }
   0x1   :  { %11979 = sst [smem:[#allocation8_spill]] %s11943_s0 }
   0x2   :  { %11980 = sst [smem:[#allocation9_spill]] %s11944_s1 }
   0x3   :  { %11981 = sst [smem:[#allocation10_spill]] %s11945_s2 }
   0x4   :  { %11982 = sst [smem:[#allocation11_spill]] %s11946_s3 }
   0x5   :  { %11983 = sst [smem:[#allocation12_spill]] %s11947_s4 }
   0x6   :  { %11984 = sst [smem:[#allocation13_spill]] %s11948_s5 }
   0x7   :  { %11985 = sst [smem:[#allocation14_spill]] %s11949_s6 }
   0x8   :  { %11986 = sst [smem:[#allocation15_spill]] %s11950_s7 }
   0x9   :  { %11987 = sst [smem:[#allocation16_spill]] %s11951_s8 }
   0xa   :  { %11988 = sst [smem:[#allocation17_spill]] %s11961_s18 }
   0xb   :  { %11989 = sst [smem:[#allocation18_spill]] %s11966_s23 }
   0xc   :  { %11990 = sst [smem:[#allocation19_spill]] %s11967_s24 }
   0xd   :  { %30 = vsyncpa [#allocation3], 0  ;;  %s11991_s27 = sld [smem:[#allocation8_spill]]  ;;  %vm82_vm0 = vcmask 261120  }
  0x13   :  { %v72_v0 = vld [vmem:[%s11991_s27] sm:$0xff]  ;;  %v73_v1 = vld [vmem:[%s11991_s27 + $0x8] sm:$0xff] }
  0x14   :  { %31 = vsyncpa [#allocation5], 0  ;;  %v83_v2 = vsel %vm82_vm0, %v72_v0, 0.0  ;;  %v86_v3 = vsel %vm82_vm0, %v73_v1, 0.0  ;;  %s11992_s0 = sld [smem:[#allocation11_spill]]  ;;  %v10386_v19 = vmov 0.0|0.0  }
  0x15   :  { %84 = vadd.xlane.f32.xlu0 %v83_v2  ;;  %9852 = vmatprep.subr.bf16.mxu0 %v10386_v19  ;;  %vm10387_vm1 = vmmov 0   ;;  %v10388_v27 = vmov 0.0   ;;  %s11993_s25 = sld [smem:[#allocation9_spill]]  ;;  %s11994_s30 = sld [smem:[#allocation10_spill]]  ;;  %vm1944_vm2 = vcmask 64512   ;;  %vm11875_vm4 = vmpackc.low %vm82_vm0, %vm82_vm0  ;;  %vm8170_vm5 = vcmask 1041409  }
  0x16   :  { %9858 = vmatprep.subr.bf16.mxu1 %v10386_v19  ;;  %8981 = vmatprep.mubr.msk.f32.mxu0 %vm10387_vm1, %v10388_v27  ;;  %s11995_s7 = sld [smem:[#allocation13_spill]]  ;;  %s11996_s4 = sld [smem:[#allocation15_spill]] }
  0x17   :  { %8992 = vmatprep.mubr.msk.f32.mxu1 %vm10387_vm1, %v10388_v27  ;;  %s11997_s2 = sld [smem:[#allocation14_spill]]  ;;  %s11998_s8 = sld [smem:[#allocation12_spill]] }
  0x18   :  { %s11999_s29 = sld [smem:[#allocation16_spill]] }
  0x19   :  { %87 = vadd.xlane.f32.xlu0 %v86_v3 }
  0x1a   :  { %v126_v14 = vld [vmem:[%s11992_s0] sm:$0xff]  ;;  %v127_v15 = vld [vmem:[%s11992_s0 + $0x8] sm:$0xff]  ;;  %v128_v21 = vld [vmem:[%s11992_s0 + $0x10] sm:$0xff] }
  0x1b   :  { %v130_v16 = vld [vmem:[%s11992_s0 + $0x20] sm:$0xff]  ;;  %v10542_v17 = vpack.c.bf16 %v127_v15, %v126_v14  ;;  %v131_v18 = vld [vmem:[%s11992_s0 + $0x28] sm:$0xff]  ;;  %v129_v22 = vld [vmem:[%s11992_s0 + $0x18] sm:$0xff] }
  0x1c   :  { %v9859_v20 = vpack.c.bf16 %v131_v18, %v130_v16  ;;  %v132_v23 = vld [vmem:[%s11992_s0 + $0x30] sm:$0xff]  ;;  %v9856_v24 = vpack.c.bf16 %v129_v22, %v128_v21  ;;  %v133_v25 = vld [vmem:[%s11992_s0 + $0x38] sm:$0xff]  ;;  %v8312_v35 = vld [vmem:[%s11993_s25] ss:$0 sm:$0xff] }
  0x1d   :  { %9854 = vmatpush3.bf16.msra.mxu0 %v10542_v17  ;;  %v9862_v26 = vpack.c.bf16 %v133_v25, %v132_v23  ;;  %v134_v36 = vld [vmem:[%s11992_s0 + $0x40] sm:$0xff]  ;;  %v135_v38 = vld [vmem:[%s11992_s0 + $0x48] sm:$0xff]  ;;  %v136_v45 = vld [vmem:[%s11992_s0 + $0x50] sm:$0xff] }
  0x1e   :  { %9860 = vmatpush3.bf16.msra.mxu1 %v9859_v20  ;;  %9855 = vmatprep.subr.bf16.mxu0 %v10386_v19  ;;  %v138_v39 = vld [vmem:[%s11992_s0 + $0x60] sm:$0xff]  ;;  %v139_v40 = vld [vmem:[%s11992_s0 + $0x68] sm:$0xff]  ;;  %v9865_v43 = vpack.c.bf16 %v135_v38, %v134_v36  ;;  %v137_v47 = vld [vmem:[%s11992_s0 + $0x58] sm:$0xff] }
  0x1f   :  { %9861 = vmatprep.subr.bf16.mxu1 %v10386_v19  ;;  %v8313_v41 = vld [vmem:[%s11994_s30] ss:$0 sm:$0xff]  ;;  %v9871_v44 = vpack.c.bf16 %v139_v40, %v138_v39  ;;  %v140_v48 = vld [vmem:[%s11992_s0 + $0x70] sm:$0xff]  ;;  %v141_v49 = vld [vmem:[%s11992_s0 + $0x78] sm:$0xff]  ;;  %v9868_v50 = vpack.c.bf16 %v137_v47, %v136_v45 }
  0x20   :  { %v9874_v51 = vpack.c.bf16 %v141_v49, %v140_v48  ;;  %v736_v56 = vld [vmem:[%s11995_s7] sm:$0xff]  ;;  %v737_v57 = vld [vmem:[%s11995_s7 + $0x8] sm:$0xff]  ;;  %v738_v62 = vld [vmem:[%s11995_s7 + $0x10] sm:$0xff] }
  0x21   :  { %9857 = vmatpush3.bf16.msra.mxu0 %v9856_v24  ;;  %v740_v58 = vld [vmem:[%s11995_s7 + $0x20] sm:$0xff]  ;;  %v741_v59 = vld [vmem:[%s11995_s7 + $0x28] sm:$0xff]  ;;  %v9901_v60 = vpack.c.bf16 %v737_v57, %v736_v56  ;;  %v739_v63 = vld [vmem:[%s11995_s7 + $0x18] sm:$0xff] }
  0x22   :  { %9863 = vmatpush3.bf16.msra.mxu1 %v9862_v26  ;;  %9864 = vmatprep.subr.bf16.mxu0 %v10386_v19  ;;  %v9907_v61 = vpack.c.bf16 %v741_v59, %v740_v58  ;;  %v9904_v2 = vpack.c.bf16 %v739_v63, %v738_v62  ;;  %v1340_v16 = vld [vmem:[%s11996_s4] sm:$0xff]  ;;  %v1342_v23 = vld [vmem:[%s11996_s4 + $0x10] sm:$0xff]  ;;  %v1355_v39 = vld [vmem:[%s11996_s4 + $0x78] sm:$0xff] }
  0x23   :  { %9870 = vmatprep.subr.bf16.mxu1 %v10386_v19  ;;  %v1344_v18 = vld [vmem:[%s11996_s4 + $0x20] sm:$0xff]  ;;  %v1346_v25 = vld [vmem:[%s11996_s4 + $0x30] sm:$0xff] }
  0x24   :  { %v1350_v36 = vld [vmem:[%s11996_s4 + $0x50] sm:$0xff]  ;;  %v8326_v58 = vld [vmem:[%s11997_s2] ss:$0 sm:$0xff] }
  0x25   :  { %v1354_v38 = vld [vmem:[%s11996_s4 + $0x70] sm:$0xff] }
  0xa2   :  { %v85_v4 = vpop.xlane.xlu0 %84 }
  0xa3   :  { %v90_v5 = vmul.f32 0.03125, %v85_v4  ;;  %v744_v4 = vld [vmem:[%s11995_s7 + $0x40] sm:$0xff] }
  0xa5   :  { %v92_v6 = vsub.f32 %v72_v0, %v90_v5  ;;  %v742_v0 = vld [vmem:[%s11995_s7 + $0x30] sm:$0xff]  ;;  %v745_v5 = vld [vmem:[%s11995_s7 + $0x48] sm:$0xff] }
  0xa6   :  { %v88_v7 = vpop.xlane.xlu0 %87 }
  0xa7   :  { %v91_v8 = vmul.f32 0.03125, %v88_v7  ;;  %v94_v9 = vmul.f32 %v92_v6, %v92_v6  ;;  %v749_v7 = vld [vmem:[%s11995_s7 + $0x68] sm:$0xff] }
  0xa9   :  { %v10527_v10 = vsub.f32 %v73_v1, %v91_v8  ;;  %v96_v11 = vsel %vm82_vm0, %v94_v9, 0.0  ;;  %v743_v1 = vld [vmem:[%s11995_s7 + $0x38] sm:$0xff]  ;;  %v9913_v8 = vpack.c.bf16 %v745_v5, %v744_v4  ;;  %v8328_v5 = vld [vmem:[%s11997_s2 + $0x2] ss:$0 sm:$0xff] }
  0xaa   :  { %97 = vadd.xlane.f32.xlu1 %v96_v11  ;;  %v9910_v3 = vpack.c.bf16 %v743_v1, %v742_v0  ;;  %v747_v11 = vld [vmem:[%s11995_s7 + $0x58] sm:$0xff]  ;;  %v8327_v1 = vld [vmem:[%s11997_s2 + $0x1] ss:$0 sm:$0xff] }
  0xab   :  { %v95_v12 = vmul.f32 %v10527_v10, %v10527_v10 }
  0xad   :  { %v99_v13 = vsel %vm82_vm0, %v95_v12, 0.0  ;;  %v750_v12 = vld [vmem:[%s11995_s7 + $0x70] sm:$0xff] }
  0xae   :  { %100 = vadd.xlane.f32.xlu1 %v99_v13  ;;  %v751_v13 = vld [vmem:[%s11995_s7 + $0x78] sm:$0xff] }
  0xaf   :  { %v9922_v15 = vpack.c.bf16 %v751_v13, %v750_v12 }
 0x137   :  { %v98_v28 = vpop.xlane.xlu1 %97 }
 0x138   :  { %v102_v29 = vmul.f32 0.03125, %v98_v28 }
 0x13a   :  { %v104_v30 = vadd.f32 1e-05, %v102_v29 }
 0x13b   :  { %v101_v31 = vpop.xlane.xlu1 %100 }
 0x13c   :  { %10244 = vrsqrt.f32 %v104_v30  ;;  %v103_v32 = vmul.f32 0.03125, %v101_v31  ;;  %v1348_v30 = vld [vmem:[%s11996_s4 + $0x40] sm:$0xff]  ;;  %v1349_v31 = vld [vmem:[%s11996_s4 + $0x48] sm:$0xff] }
 0x13e   :  { %v105_v33 = vadd.f32 1e-05, %v103_v32  ;;  %v1352_v32 = vld [vmem:[%s11996_s4 + $0x60] sm:$0xff] }
 0x140   :  { %10246 = vrsqrt.f32 %v105_v33  ;;  %v1353_v33 = vld [vmem:[%s11996_s4 + $0x68] sm:$0xff] }
 0x146   :  { %v10245_v34 = vpop.eup %10244 }
 0x147   :  { %v108_v37 = vmul.f32 %v10245_v34, %v92_v6  ;;  %v748_v6 = vld [vmem:[%s11995_s7 + $0x60] sm:$0xff]  ;;  %v9961_v34 = vpack.c.bf16 %v1349_v31, %v1348_v30 }
 0x148   :  { %v9919_v9 = vpack.c.bf16 %v749_v7, %v748_v6  ;;  %v8329_v6 = vld [vmem:[%s11997_s2 + $0x3] ss:$0 sm:$0xff] }
 0x149   :  { %v116_v42 = vmul.f32 %v8312_v35, %v108_v37  ;;  %v1351_v37 = vld [vmem:[%s11996_s4 + $0x58] sm:$0xff] }
 0x14a   :  { %v10247_v52 = vpop.eup %10246  ;;  %v9964_v40 = vpack.c.bf16 %v1351_v37, %v1350_v36  ;;  %v8338_v36 = vld [vmem:[%s11999_s29] ss:$0 sm:$0xff]  ;;  %v8339_v37 = vld [vmem:[%s11999_s29 + $0x1] ss:$0 sm:$0xff] }
 0x14b   :  { %v10591_v46 = vadd.f32 %v8313_v41, %v116_v42  ;;  %v109_v53 = vmul.f32 %v10247_v52, %v10527_v10  ;;  %v746_v10 = vld [vmem:[%s11995_s7 + $0x50] sm:$0xff] }
 0x14c   :  { %v9916_v14 = vpack.c.bf16 %v747_v11, %v746_v10  ;;  %v8316_v10 = vld [vmem:[%s11998_s8 + $0x2] ss:$0 sm:$0xff]  ;;  %v8317_v11 = vld [vmem:[%s11998_s8 + $0x3] ss:$0 sm:$0xff] }
 0x14d   :  { %8982 = vmatmul.mubr.msk.f32.vlgmr.msra.gmra.mrb[0].mxu0 %vm82_vm0, %v10591_v46  ;;  %8993 = vmatmul.mubr.msk.f32.vlgmr.msra.gmra.mrb[0].mxu1 %vm82_vm0, %v10591_v46  ;;  %v117_v54 = vmul.f32 %v8312_v35, %v109_v53  ;;  %v9967_v35 = vpack.c.bf16 %v1353_v33, %v1352_v32 }
 0x14e   :  { %9866 = vmatpush3.bf16.msra.mxu0 %v9865_v43  ;;  %9872 = vmatpush3.bf16.msra.mxu1 %v9871_v44 }
 0x14f   :  { %9867 = vmatprep.subr.bf16.mxu0 %v10386_v19  ;;  %9873 = vmatprep.subr.bf16.mxu1 %v10386_v19  ;;  %v10626_v55 = vadd.f32 %v8313_v41, %v117_v54  ;;  %v9970_v41 = vpack.c.bf16 %v1355_v39, %v1354_v38 }
 0x150   :  { %9003 = vmatprep.mubr.msk.f32.mxu0 %vm10387_vm1, %v10388_v27  ;;  %9014 = vmatprep.mubr.msk.f32.mxu1 %vm10387_vm1, %v10388_v27 }
 0x152   :  { %9869 = vmatpush3.bf16.msra.mxu0 %v9868_v50  ;;  %9875 = vmatpush3.bf16.msra.mxu1 %v9874_v51 }
 0x153   :  { %9876 = vmatprep.subr.bf16.mxu0 %v10386_v19  ;;  %9882 = vmatprep.subr.bf16.mxu1 %v10386_v19 }
 0x155   :  { %9004 = vmatmul.mubr.msk.f32.vlgmr.msra.gmra.mrb[2].mxu0 %vm82_vm0, %v10591_v46  ;;  %9015 = vmatmul.mubr.msk.f32.vlgmr.msra.gmra.mrb[2].mxu1 %vm82_vm0, %v10591_v46 }
 0x156   :  { %9878 = vmatpush3.bf16.msra.mxu0 %v10542_v17  ;;  %9884 = vmatpush3.bf16.msra.mxu1 %v9859_v20  ;;  %v1341_v17 = vld [vmem:[%s11996_s4 + $0x8] sm:$0xff] }
 0x157   :  { %9879 = vmatprep.subr.bf16.mxu0 %v10386_v19  ;;  %9885 = vmatprep.subr.bf16.mxu1 %v10386_v19  ;;  %v1345_v20 = vld [vmem:[%s11996_s4 + $0x28] sm:$0xff]  ;;  %v9949_v21 = vpack.c.bf16 %v1341_v17, %v1340_v16 }
 0x158   :  { %9025 = vmatprep.mubr.msk.f32.mxu0 %vm10387_vm1, %v10388_v27  ;;  %9036 = vmatprep.mubr.msk.f32.mxu1 %vm10387_vm1, %v10388_v27  ;;  %v9955_v22 = vpack.c.bf16 %v1345_v20, %v1344_v18 }
 0x15a   :  { %9881 = vmatpush3.bf16.msra.mxu0 %v9856_v24  ;;  %9887 = vmatpush3.bf16.msra.mxu1 %v9862_v26  ;;  %v1343_v24 = vld [vmem:[%s11996_s4 + $0x18] sm:$0xff] }
 0x15b   :  { %9888 = vmatprep.subr.bf16.mxu0 %v10386_v19  ;;  %9894 = vmatprep.subr.bf16.mxu1 %v10386_v19  ;;  %v1347_v26 = vld [vmem:[%s11996_s4 + $0x38] sm:$0xff]  ;;  %v9952_v28 = vpack.c.bf16 %v1343_v24, %v1342_v23 }
 0x15c   :  { %v9958_v29 = vpack.c.bf16 %v1347_v26, %v1346_v25 }
 0x15d   :  { %9026 = vmatmul.mubr.msk.f32.vlgmr.msra.gmra.mrb[4].mxu0 %vm82_vm0, %v10626_v55  ;;  %9037 = vmatmul.mubr.msk.f32.vlgmr.msra.gmra.mrb[4].mxu1 %vm82_vm0, %v10626_v55 }
 0x15e   :  { %9890 = vmatpush3.bf16.msra.mxu0 %v9865_v43  ;;  %9896 = vmatpush3.bf16.msra.mxu1 %v9871_v44 }
 0x15f   :  { %9891 = vmatprep.subr.bf16.mxu0 %v10386_v19  ;;  %9897 = vmatprep.subr.bf16.mxu1 %v10386_v19 }
 0x160   :  { %9047 = vmatprep.mubr.msk.f32.mxu0 %vm10387_vm1, %v10388_v27  ;;  %9058 = vmatprep.mubr.msk.f32.mxu1 %vm10387_vm1, %v10388_v27 }
 0x162   :  { %9893 = vmatpush3.bf16.msra.mxu0 %v9868_v50  ;;  %9899 = vmatpush3.bf16.msra.mxu1 %v9874_v51 }
 0x163   :  { %9900 = vmatprep.subr.bf16.mxu0 %v10386_v19  ;;  %9906 = vmatprep.subr.bf16.mxu1 %v10386_v19 }
 0x165   :  { %9048 = vmatmul.mubr.msk.f32.vlgmr.msra.gmra.mrb[6].mxu0 %vm82_vm0, %v10626_v55  ;;  %9059 = vmatmul.mubr.msk.f32.vlgmr.msra.gmra.mrb[6].mxu1 %vm82_vm0, %v10626_v55 }
 0x166   :  { %9902 = vmatpush3.bf16.msra.mxu0 %v9901_v60  ;;  %9908 = vmatpush3.bf16.msra.mxu1 %v9907_v61 }
 0x167   :  { %9903 = vmatprep.subr.bf16.mxu0 %v10386_v19  ;;  %9909 = vmatprep.subr.bf16.mxu1 %v10386_v19 }
 0x168   :  { %9069 = vmatprep.mubr.msk.f32.mxu0 %vm10387_vm1, %v10388_v27  ;;  %9080 = vmatprep.mubr.msk.f32.mxu1 %vm10387_vm1, %v10388_v27 }
 0x16a   :  { %9905 = vmatpush3.bf16.msra.mxu0 %v9904_v2  ;;  %9911 = vmatpush3.bf16.msra.mxu1 %v9910_v3 }
 0x16b   :  { %9912 = vmatprep.subr.bf16.mxu0 %v10386_v19  ;;  %9918 = vmatprep.subr.bf16.mxu1 %v10386_v19 }
 0x16d   :  { %9070 = vmatmul.mubr.msk.f32.vlgmr.msra.gmra.mrb[8].mxu0 %vm82_vm0, %v10591_v46  ;;  %9081 = vmatmul.mubr.msk.f32.vlgmr.msra.gmra.mrb[8].mxu1 %vm82_vm0, %v10591_v46 }
 0x16e   :  { %9914 = vmatpush3.bf16.msra.mxu0 %v9913_v8  ;;  %9920 = vmatpush3.bf16.msra.mxu1 %v9919_v9 }
 0x16f   :  { %9915 = vmatprep.subr.bf16.mxu0 %v10386_v19  ;;  %9921 = vmatprep.subr.bf16.mxu1 %v10386_v19 }
 0x170   :  { %9091 = vmatprep.mubr.msk.f32.mxu0 %vm10387_vm1, %v10388_v27  ;;  %9102 = vmatprep.mubr.msk.f32.mxu1 %vm10387_vm1, %v10388_v27 }
 0x172   :  { %9917 = vmatpush3.bf16.msra.mxu0 %v9916_v14  ;;  %9923 = vmatpush3.bf16.msra.mxu1 %v9922_v15 }
 0x173   :  { %9924 = vmatprep.subr.bf16.mxu0 %v10386_v19  ;;  %9930 = vmatprep.subr.bf16.mxu1 %v10386_v19 }
 0x175   :  { %9092 = vmatmul.mubr.msk.f32.vlgmr.msra.gmra.mrb[10].mxu0 %vm82_vm0, %v10591_v46  ;;  %9103 = vmatmul.mubr.msk.f32.vlgmr.msra.gmra.mrb[10].mxu1 %vm82_vm0, %v10591_v46 }
 0x176   :  { %9926 = vmatpush3.bf16.msra.mxu0 %v9901_v60  ;;  %9932 = vmatpush3.bf16.msra.mxu1 %v9907_v61  ;;  %v8314_v61 = vld [vmem:[%s11998_s8] ss:$0 sm:$0xff] }
 0x177   :  { %9927 = vmatprep.subr.bf16.mxu0 %v10386_v19  ;;  %9933 = vmatprep.subr.bf16.mxu1 %v10386_v19 }
 0x178   :  { %9113 = vmatprep.mubr.msk.f32.mxu0 %vm10387_vm1, %v10388_v27  ;;  %9124 = vmatprep.mubr.msk.f32.mxu1 %vm10387_vm1, %v10388_v27 }
 0x17a   :  { %9929 = vmatpush3.bf16.msra.mxu0 %v9904_v2  ;;  %9935 = vmatpush3.bf16.msra.mxu1 %v9910_v3  ;;  %v8315_v3 = vld [vmem:[%s11998_s8 + $0x1] ss:$0 sm:$0xff] }
 0x17b   :  { %9936 = vmatprep.subr.bf16.mxu0 %v10386_v19  ;;  %9942 = vmatprep.subr.bf16.mxu1 %v10386_v19 }
 0x17d   :  { %9114 = vmatmul.mubr.msk.f32.vlgmr.msra.gmra.mrb[12].mxu0 %vm82_vm0, %v10626_v55  ;;  %9125 = vmatmul.mubr.msk.f32.vlgmr.msra.gmra.mrb[12].mxu1 %vm82_vm0, %v10626_v55 }
 0x17e   :  { %9938 = vmatpush3.bf16.msra.mxu0 %v9913_v8  ;;  %9944 = vmatpush3.bf16.msra.mxu1 %v9919_v9 }
 0x17f   :  { %9939 = vmatprep.subr.bf16.mxu0 %v10386_v19  ;;  %9945 = vmatprep.subr.bf16.mxu1 %v10386_v19 }
 0x180   :  { %9135 = vmatprep.mubr.msk.f32.mxu0 %vm10387_vm1, %v10388_v27  ;;  %9146 = vmatprep.mubr.msk.f32.mxu1 %vm10387_vm1, %v10388_v27 }
 0x182   :  { %9941 = vmatpush3.bf16.msra.mxu0 %v9916_v14  ;;  %9947 = vmatpush3.bf16.msra.mxu1 %v9922_v15 }
 0x183   :  { %9948 = vmatprep.subr.bf16.mxu0 %v10386_v19  ;;  %9954 = vmatprep.subr.bf16.mxu1 %v10386_v19 }
 0x185   :  { %9136 = vmatmul.mubr.msk.f32.vlgmr.msra.gmra.mrb[14].mxu0 %vm82_vm0, %v10626_v55  ;;  %9147 = vmatmul.mubr.msk.f32.vlgmr.msra.gmra.mrb[14].mxu1 %vm82_vm0, %v10626_v55 }
 0x186   :  { %9950 = vmatpush3.bf16.msra.mxu0 %v9949_v21  ;;  %9956 = vmatpush3.bf16.msra.mxu1 %v9955_v22 }
 0x187   :  { %9951 = vmatprep.subr.bf16.mxu0 %v10386_v19  ;;  %9957 = vmatprep.subr.bf16.mxu1 %v10386_v19 }
 0x188   :  { %9157 = vmatprep.mubr.msk.f32.mxu0 %vm10387_vm1, %v10388_v27  ;;  %9168 = vmatprep.mubr.msk.f32.mxu1 %vm10387_vm1, %v10388_v27 }
 0x18a   :  { %9953 = vmatpush3.bf16.msra.mxu0 %v9952_v28  ;;  %9959 = vmatpush3.bf16.msra.mxu1 %v9958_v29 }
 0x18b   :  { %9960 = vmatprep.subr.bf16.mxu0 %v10386_v19  ;;  %9966 = vmatprep.subr.bf16.mxu1 %v10386_v19 }
 0x18d   :  { %9158 = vmatmul.mubr.msk.f32.vlgmr.msra.gmra.mrb[16].mxu0 %vm82_vm0, %v10591_v46  ;;  %9169 = vmatmul.mubr.msk.f32.vlgmr.msra.gmra.mrb[16].mxu1 %vm82_vm0, %v10591_v46 }
 0x18e   :  { %9962 = vmatpush3.bf16.msra.mxu0 %v9961_v34  ;;  %9968 = vmatpush3.bf16.msra.mxu1 %v9967_v35 }
 0x18f   :  { %9963 = vmatprep.subr.bf16.mxu0 %v10386_v19  ;;  %9969 = vmatprep.subr.bf16.mxu1 %v10386_v19 }
 0x190   :  { %9179 = vmatprep.mubr.msk.f32.mxu0 %vm10387_vm1, %v10388_v27  ;;  %9190 = vmatprep.mubr.msk.f32.mxu1 %vm10387_vm1, %v10388_v27 }
 0x192   :  { %9965 = vmatpush3.bf16.msra.mxu0 %v9964_v40  ;;  %9971 = vmatpush3.bf16.msra.mxu1 %v9970_v41 }
 0x193   :  { %9972 = vmatprep.subr.bf16.mxu0 %v10386_v19  ;;  %9978 = vmatprep.subr.bf16.mxu1 %v10386_v19 }
 0x195   :  { %9180 = vmatmul.mubr.msk.f32.vlgmr.msra.gmra.mrb[18].mxu0 %vm82_vm0, %v10591_v46  ;;  %9191 = vmatmul.mubr.msk.f32.vlgmr.msra.gmra.mrb[18].mxu1 %vm82_vm0, %v10591_v46 }
 0x196   :  { %9974 = vmatpush3.bf16.msra.mxu0 %v9949_v21  ;;  %9980 = vmatpush3.bf16.msra.mxu1 %v9955_v22 }
 0x197   :  { %9975 = vmatprep.subr.bf16.mxu0 %v10386_v19  ;;  %9981 = vmatprep.subr.bf16.mxu1 %v10386_v19 }
 0x198   :  { %9201 = vmatprep.mubr.msk.f32.mxu0 %vm10387_vm1, %v10388_v27  ;;  %9212 = vmatprep.mubr.msk.f32.mxu1 %vm10387_vm1, %v10388_v27 }
 0x19a   :  { %9977 = vmatpush3.bf16.msra.mxu0 %v9952_v28  ;;  %9983 = vmatpush3.bf16.msra.mxu1 %v9958_v29 }
 0x19b   :  { %9984 = vmatprep.subr.bf16.mxu0 %v10386_v19  ;;  %9990 = vmatprep.subr.bf16.mxu1 %v10386_v19 }
 0x19d   :  { %9202 = vmatmul.mubr.msk.f32.vlgmr.msra.gmra.mrb[20].mxu0 %vm82_vm0, %v10626_v55  ;;  %9213 = vmatmul.mubr.msk.f32.vlgmr.msra.gmra.mrb[20].mxu1 %vm82_vm0, %v10626_v55 }
 0x19e   :  { %9986 = vmatpush3.bf16.msra.mxu0 %v9961_v34  ;;  %9992 = vmatpush3.bf16.msra.mxu1 %v9967_v35 }
 0x19f   :  { %9987 = vmatprep.subr.bf16.mxu0 %v10386_v19  ;;  %9993 = vmatprep.subr.bf16.mxu1 %v10386_v19 }
 0x1a0   :  { %9223 = vmatprep.mubr.msk.f32.mxu0 %vm10387_vm1, %v10388_v27  ;;  %9234 = vmatprep.mubr.msk.f32.mxu1 %vm10387_vm1, %v10388_v27 }
 0x1a2   :  { %9989 = vmatpush3.bf16.msra.mxu0 %v9964_v40  ;;  %9995 = vmatpush3.bf16.msra.mxu1 %v9970_v41 }
 0x1a3   :  { %9237 = vmatprep.subr.mxu1 %v10388_v27  ;;  %9247 = vmatprep.subr.mxu0 %v10388_v27 }
 0x1a5   :  { %9224 = vmatmul.mubr.msk.f32.vlgmr.msra.gmra.mrb[22].mxu0 %vm82_vm0, %v10626_v55  ;;  %9235 = vmatmul.mubr.msk.f32.vlgmr.msra.gmra.mrb[22].mxu1 %vm82_vm0, %v10626_v55 }
 0x1a6   :  { %9239 = vmatprep.mubr.msk.f32.mxu1 %vm10387_vm1, %v10388_v27  ;;  %9249 = vmatprep.mubr.msk.f32.mxu0 %vm10387_vm1, %v10388_v27 }
 0x220   :  { %v239_v42 = vpop.f32.mrb[0].mxu0  ;;  %v309_v43 = vpop.f32.mrb[0].mxu1 }
 0x221   :  { %v8983_v44 = vpop.f32.mrb[1].mxu0  ;;  %v8994_v45 = vpop.f32.mrb[1].mxu1  ;;  %v240_v2 = vadd.f32 %v8314_v61, %v239_v42  ;;  %v310_v7 = vadd.f32 %v8315_v3, %v309_v43 }
 0x228   :  { %v379_v46 = vpop.f32.mrb[2].mxu0  ;;  %v449_v47 = vpop.f32.mrb[2].mxu1 }
 0x229   :  { %v9005_v48 = vpop.f32.mrb[3].mxu0  ;;  %v9016_v49 = vpop.f32.mrb[3].mxu1  ;;  %v380_v16 = vadd.f32 %v8316_v10, %v379_v46  ;;  %v450_v17 = vadd.f32 %v8317_v11, %v449_v47 }
 0x230   :  { %v522_v50 = vpop.f32.mrb[4].mxu0  ;;  %v592_v51 = vpop.f32.mrb[4].mxu1 }
 0x231   :  { %v9027_v52 = vpop.f32.mrb[5].mxu0  ;;  %v9038_v53 = vpop.f32.mrb[5].mxu1  ;;  %v523_v25 = vadd.f32 %v8314_v61, %v522_v50  ;;  %v593_v26 = vadd.f32 %v8315_v3, %v592_v51  ;;  %v10389_v61 = vmov -1e+30  }
 0x238   :  { %v10842_v54 = vpop.f32.mrb[6].mxu0  ;;  %v10844_v55 = vpop.f32.mrb[6].mxu1 }
 0x239   :  { %v9049_v56 = vpop.f32.mrb[7].mxu0  ;;  %v9060_v57 = vpop.f32.mrb[7].mxu1  ;;  %v663_v34 = vadd.f32 %v8316_v10, %v10842_v54  ;;  %v733_v35 = vadd.f32 %v8317_v11, %v10844_v55 }
 0x240   :  { %v846_v59 = vpop.f32.mrb[8].mxu0  ;;  %v916_v60 = vpop.f32.mrb[8].mxu1 }
 0x241   :  { %v847_v62 = vadd.f32 %v8326_v58, %v846_v59  ;;  %v9071_v63 = vpop.f32.mrb[9].mxu0  ;;  %v9082_v0 = vpop.f32.mrb[9].mxu1  ;;  %v917_v4 = vadd.f32 %v8327_v1, %v916_v60 }
 0x243   :  { %9238 = vmatpush3.xpose.msk.msra.mxu1 %vm1944_vm2, %v847_v62 }
 0x244   :  { %9242 = vmatprep.subr.mxu1 %v10388_v27 }
 0x246   :  { %9240 = vmatmul.mubr.msk.f32.vlgmr.msra.gmra.mrb[24].mxu1 %vm1944_vm2, %v240_v2 }
 0x247   :  { %9243 = vmatpush3.xpose.msk.msra.mxu1 %vm1944_vm2, %v917_v4  ;;  %9244 = vmatprep.mubr.msk.f32.mxu1 %vm10387_vm1, %v10388_v27 }
 0x248   :  { %v986_v8 = vpop.f32.mrb[10].mxu0  ;;  %v1056_v9 = vpop.f32.mrb[10].mxu1  ;;  %9252 = vmatprep.subr.mxu1 %v10388_v27 }
 0x249   :  { %v987_v12 = vadd.f32 %v8328_v5, %v986_v8  ;;  %v1057_v13 = vadd.f32 %v8329_v6, %v1056_v9  ;;  %v9093_v14 = vpop.f32.mrb[11].mxu0  ;;  %v9104_v15 = vpop.f32.mrb[11].mxu1 }
 0x24a   :  { %9245 = vmatmul.mubr.msk.f32.vlgmr.msra.gmra.mrb[26].mxu1 %vm1944_vm2, %v310_v7 }
 0x24b   :  { %9248 = vmatpush3.xpose.msk.msra.mxu0 %vm1944_vm2, %v987_v12  ;;  %9253 = vmatpush3.xpose.msk.msra.mxu1 %vm1944_vm2, %v1057_v13 }
 0x24c   :  { %9254 = vmatprep.mubr.msk.f32.mxu1 %vm10387_vm1, %v10388_v27  ;;  %9257 = vmatprep.subr.mxu0 %v10388_v27 }
 0x24d   :  { %9262 = vmatprep.subr.mxu1 %v10388_v27 }
 0x24e   :  { %9250 = vmatmul.mubr.msk.f32.vlgmr.msra.gmra.mrb[24].mxu0 %vm1944_vm2, %v380_v16  ;;  %9255 = vmatmul.mubr.msk.f32.vlgmr.msra.gmra.mrb[28].mxu1 %vm1944_vm2, %v450_v17 }
 0x24f   :  { %9259 = vmatprep.mubr.msk.f32.mxu0 %vm10387_vm1, %v10388_v27  ;;  %9264 = vmatprep.mubr.msk.f32.mxu1 %vm10387_vm1, %v10388_v27 }
 0x250   :  { %v1126_v18 = vpop.f32.mrb[12].mxu0  ;;  %v1196_v20 = vpop.f32.mrb[12].mxu1 }
 0x251   :  { %v1127_v21 = vadd.f32 %v8326_v58, %v1126_v18  ;;  %v1197_v22 = vadd.f32 %v8327_v1, %v1196_v20  ;;  %v9115_v23 = vpop.f32.mrb[13].mxu0  ;;  %v9126_v24 = vpop.f32.mrb[13].mxu1  ;;  %v74_v58 = vlaneseq }
 0x253   :  { %9258 = vmatpush3.xpose.msk.msra.mxu0 %vm1944_vm2, %v1127_v21  ;;  %9263 = vmatpush3.xpose.msk.msra.mxu1 %vm1944_vm2, %v1197_v22  ;;  %v75_v59 = vshrl.u32 %v74_v58, 7  ;;  %v77_v60 = vand.u32 127, %v74_v58 }
 0x254   :  { %9267 = vmatprep.subr.mxu0 %v10388_v27  ;;  %9272 = vmatprep.subr.mxu1 %v10388_v27 }
 0x255   :  { %vm78_vm3 = vcmp.le.s32.totalorder %v77_v60, %v75_v59 }
 0x256   :  { %9260 = vmatmul.mubr.msk.f32.vlgmr.msra.gmra.mrb[26].mxu0 %vm1944_vm2, %v523_v25  ;;  %9265 = vmatmul.mubr.msk.f32.vlgmr.msra.gmra.mrb[30].mxu1 %vm1944_vm2, %v593_v26  ;;  %v10932_v62 = vsel %vm78_vm3, 0.0, %v10389_v61 }
 0x257   :  { %9269 = vmatprep.mubr.msk.f32.mxu0 %vm10387_vm1, %v10388_v27  ;;  %9274 = vmatprep.mubr.msk.f32.mxu1 %vm10387_vm1, %v10388_v27 }
 0x258   :  { %v1266_v28 = vpop.f32.mrb[14].mxu0  ;;  %v1336_v29 = vpop.f32.mrb[14].mxu1 }
 0x259   :  { %v1267_v30 = vadd.f32 %v8328_v5, %v1266_v28  ;;  %v1337_v31 = vadd.f32 %v8329_v6, %v1336_v29  ;;  %v9137_v32 = vpop.f32.mrb[15].mxu0  ;;  %v9148_v33 = vpop.f32.mrb[15].mxu1 }
 0x25b   :  { %9268 = vmatpush3.xpose.msk.msra.mxu0 %vm1944_vm2, %v1267_v30  ;;  %9273 = vmatpush3.xpose.msk.msra.mxu1 %vm1944_vm2, %v1337_v31 }
 0x25c   :  { %9277 = vmatprep.subr.mxu0 %v10388_v27  ;;  %9282 = vmatprep.subr.mxu1 %v10388_v27 }
 0x25e   :  { %9270 = vmatmul.mubr.msk.f32.vlgmr.msra.gmra.mrb[28].mxu0 %vm1944_vm2, %v663_v34  ;;  %9275 = vmatmul.mubr.msk.f32.vlgmr.msra.gmra.mrb[32].mxu1 %vm1944_vm2, %v733_v35 }
 0x25f   :  { %9279 = vmatprep.mubr.msk.f32.mxu0 %vm10387_vm1, %v10388_v27  ;;  %9284 = vmatprep.mubr.msk.f32.mxu1 %vm10387_vm1, %v10388_v27 }
 0x260   :  { %v1450_v38 = vpop.f32.mrb[16].mxu0  ;;  %v1520_v39 = vpop.f32.mrb[16].mxu1 }
 0x261   :  { %v1451_v40 = vadd.f32 %v8338_v36, %v1450_v38  ;;  %v1521_v41 = vadd.f32 %v8339_v37, %v1520_v39  ;;  %v9159_v42 = vpop.f32.mrb[17].mxu0  ;;  %v9170_v43 = vpop.f32.mrb[17].mxu1 }
 0x263   :  { %9278 = vmatpush3.msra.mxu0 %v1451_v40  ;;  %9283 = vmatpush3.msra.mxu1 %v1521_v41 }
 0x264   :  { %9287 = vmatprep.subr.mxu0 %v10388_v27  ;;  %9292 = vmatprep.subr.mxu1 %v10388_v27 }
 0x268   :  { %v10920_v44 = vpop.f32.mrb[18].mxu0  ;;  %v10922_v45 = vpop.f32.mrb[18].mxu1 }
 0x269   :  { %v9181_v46 = vpop.f32.mrb[19].mxu0  ;;  %v9192_v47 = vpop.f32.mrb[19].mxu1 }
 0x270   :  { %v1730_v48 = vpop.f32.mrb[20].mxu0  ;;  %v1800_v49 = vpop.f32.mrb[20].mxu1 }
 0x271   :  { %v10924_v50 = vadd.f32 %v8338_v36, %v1730_v48  ;;  %v10926_v51 = vadd.f32 %v8339_v37, %v1800_v49  ;;  %v9203_v52 = vpop.f32.mrb[21].mxu0  ;;  %v9214_v53 = vpop.f32.mrb[21].mxu1 }
 0x278   :  { %v10928_v54 = vpop.f32.mrb[22].mxu0  ;;  %v10930_v55 = vpop.f32.mrb[22].mxu1 }
 0x279   :  { %v9225_v56 = vpop.f32.mrb[23].mxu0  ;;  %v9236_v57 = vpop.f32.mrb[23].mxu1 }
 0x319   :  { %v2017_v63 = vpop.f32.mrb[24].mxu1 }
 0x31a   :  { %v2018_v0 = vadd.f32 %v2017_v63, %v10932_v62  ;;  %v9241_v1 = vpop.f32.mrb[25].mxu1 }
 0x31c   :  { %v2553_v2 = vsel %vm1944_vm2, %v2018_v0, -inf }
 0x31d   :  { %2554 = vmax.xlane.f32.xlu0 %v2553_v2  ;;  %v2093_v3 = vpop.f32.mrb[26].mxu1 }
 0x31e   :  { %v2094_v4 = vadd.f32 %v2093_v3, %v10932_v62  ;;  %v9246_v5 = vpop.f32.mrb[27].mxu1 }
 0x320   :  { %v2556_v6 = vsel %vm1944_vm2, %v2094_v4, -inf }
 0x321   :  { %2557 = vmax.xlane.f32.xlu1 %v2556_v6  ;;  %v2169_v7 = vpop.f32.mrb[24].mxu0  ;;  %v2245_v8 = vpop.f32.mrb[28].mxu1 }
 0x322   :  { %v2170_v9 = vadd.f32 %v2169_v7, %v10932_v62  ;;  %v2246_v10 = vadd.f32 %v2245_v8, %v10932_v62  ;;  %v9251_v11 = vpop.f32.mrb[25].mxu0  ;;  %v9256_v12 = vpop.f32.mrb[29].mxu1 }
 0x324   :  { %v2562_v13 = vsel %vm1944_vm2, %v2246_v10, -inf  ;;  %v2559_v14 = vsel %vm1944_vm2, %v2170_v9, -inf }
 0x325   :  { %2563 = vmax.xlane.f32.xlu1 %v2562_v13  ;;  %2560 = vmax.xlane.f32.xlu0 %v2559_v14 }
 0x329   :  { %v2321_v15 = vpop.f32.mrb[26].mxu0  ;;  %v2397_v16 = vpop.f32.mrb[30].mxu1 }
 0x32a   :  { %v2322_v17 = vadd.f32 %v2321_v15, %v10932_v62  ;;  %v2398_v18 = vadd.f32 %v2397_v16, %v10932_v62  ;;  %v9261_v20 = vpop.f32.mrb[27].mxu0  ;;  %v9266_v21 = vpop.f32.mrb[31].mxu1 }
 0x32b   :  { %v8340_v21 = vld [vmem:[%s11999_s29 + $0x2] ss:$0 sm:$0xff] }
 0x32c   :  { %v2568_v22 = vsel %vm1944_vm2, %v2398_v18, -inf  ;;  %v2565_v23 = vsel %vm1944_vm2, %v2322_v17, -inf }
 0x32d   :  { %2569 = vmax.xlane.f32.xlu1 %v2568_v22  ;;  %2566 = vmax.xlane.f32.xlu0 %v2565_v23 }
 0x331   :  { %v2473_v24 = vpop.f32.mrb[28].mxu0  ;;  %v2549_v25 = vpop.f32.mrb[32].mxu1 }
 0x332   :  { %v2474_v26 = vadd.f32 %v2473_v24, %v10932_v62  ;;  %v2550_v28 = vadd.f32 %v2549_v25, %v10932_v62  ;;  %v9271_v29 = vpop.f32.mrb[29].mxu0  ;;  %v9276_v30 = vpop.f32.mrb[33].mxu1  ;;  %v1591_v24 = vadd.f32 %v8340_v21, %v10920_v44  ;;  %v8341_v25 = vld [vmem:[%s11999_s29 + $0x3] ss:$0 sm:$0xff] }
 0x333   :  { %v1661_v44 = vadd.f32 %v8341_v25, %v10922_v45 }
 0x334   :  { %v2574_v31 = vsel %vm1944_vm2, %v2550_v28, -inf  ;;  %v2571_v32 = vsel %vm1944_vm2, %v2474_v26, -inf }
 0x335   :  { %2575 = vmax.xlane.f32.xlu1 %v2574_v31  ;;  %2572 = vmax.xlane.f32.xlu0 %v2571_v32 }
 0x3aa   :  { %v2555_v33 = vpop.xlane.xlu0 %2554 }
 0x3ab   :  { %v2577_v34 = vsub.f32 %v2018_v0, %v2555_v33 }
 0x3ad   :  { %v2585_v35 = vmul.f32 1.442695, %v2577_v34 }
 0x3ae   :  { %v2558_v36 = vpop.xlane.xlu1 %2557 }
 0x3af   :  { %10248 = vpow2.f32 %v2585_v35  ;;  %v2578_v37 = vsub.f32 %v2094_v4, %v2558_v36 }
 0x3b1   :  { %v2587_v38 = vmul.f32 1.442695, %v2578_v37 }
 0x3b2   :  { %v2564_v39 = vpop.xlane.xlu1 %2563  ;;  %v2561_v40 = vpop.xlane.xlu0 %2560 }
 0x3b3   :  { %10250 = vpow2.f32 %v2587_v38  ;;  %v2580_v41 = vsub.f32 %v2246_v10, %v2564_v39  ;;  %v2579_v42 = vsub.f32 %v2170_v9, %v2561_v40  ;;  %v1871_v39 = vadd.f32 %v8340_v21, %v10928_v54 }
 0x3b5   :  { %v2591_v43 = vmul.f32 1.442695, %v2580_v41  ;;  %v2589_v46 = vmul.f32 1.442695, %v2579_v42  ;;  %v3233_v42 = vld [vmem:[%s11952_s9] sm:$0xff] }
 0x3b7   :  { %10252 = vpow2.f32 %v2591_v43  ;;  %v3234_v43 = vld [vmem:[%s11952_s9 + $0x8] sm:$0xff] }
 0x3b8   :  { %10254 = vpow2.f32 %v2589_v46  ;;  %v3235_v46 = vld [vmem:[%s11952_s9 + $0x10] sm:$0xff] }
 0x3b9   :  { %v10249_v47 = vpop.eup %10248 }
 0x3ba   :  { %v2570_v48 = vpop.xlane.xlu1 %2569  ;;  %v2567_v49 = vpop.xlane.xlu0 %2566  ;;  %v2601_v52 = vsel %vm1944_vm2, %v10249_v47, 0.0 }
 0x3bb   :  { %v2582_v53 = vsub.f32 %v2398_v18, %v2570_v48  ;;  %v2581_v56 = vsub.f32 %v2322_v17, %v2567_v49  ;;  %2602 = vadd.xlane.f32.xlu0 %v2601_v52  ;;  %v3236_v49 = vld [vmem:[%s11952_s9 + $0x18] sm:$0xff] }
 0x3bd   :  { %v10251_v57 = vpop.eup %10250  ;;  %v2595_v58 = vmul.f32 1.442695, %v2582_v53  ;;  %v2593_v59 = vmul.f32 1.442695, %v2581_v56 }
 0x3be   :  { %v2604_v60 = vsel %vm1944_vm2, %v10251_v57, 0.0 }
 0x3bf   :  { %10256 = vpow2.f32 %v2595_v58  ;;  %2605 = vadd.xlane.f32.xlu1 %v2604_v60 }
 0x3c0   :  { %10258 = vpow2.f32 %v2593_v59 }
 0x3c1   :  { %v10253_v61 = vpop.eup %10252 }
 0x3c2   :  { %v10255_v63 = vpop.eup %10254  ;;  %v2576_v0 = vpop.xlane.xlu1 %2575  ;;  %v2610_v2 = vsel %vm1944_vm2, %v10253_v61, 0.0 }
 0x3c3   :  { %v2573_v1 = vpop.xlane.xlu0 %2572  ;;  %v2584_v3 = vsub.f32 %v2550_v28, %v2576_v0  ;;  %2611 = vadd.xlane.f32.xlu1 %v2610_v2  ;;  %v2607_v5 = vsel %vm1944_vm2, %v10255_v63, 0.0 }
 0x3c4   :  { %v2583_v4 = vsub.f32 %v2474_v26, %v2573_v1  ;;  %2608 = vadd.xlane.f32.xlu0 %v2607_v5 }
 0x3c5   :  { %v2599_v6 = vmul.f32 1.442695, %v2584_v3 }
 0x3c6   :  { %v2597_v7 = vmul.f32 1.442695, %v2583_v4 }
 0x3c7   :  { %10260 = vpow2.f32 %v2599_v6 }
 0x3c8   :  { %10262 = vpow2.f32 %v2597_v7 }
 0x3c9   :  { %v10257_v8 = vpop.eup %10256 }
 0x3ca   :  { %v10954_v9 = vpop.eup %10258  ;;  %v2616_v10 = vsel %vm1944_vm2, %v10257_v8, 0.0 }
 0x3cb   :  { %2617 = vadd.xlane.f32.xlu1 %v2616_v10  ;;  %v2613_v11 = vsel %vm1944_vm2, %v10954_v9, 0.0 }
 0x3cc   :  { %2614 = vadd.xlane.f32.xlu0 %v2613_v11 }
 0x3d1   :  { %v10959_v12 = vpop.eup %10260 }
 0x3d2   :  { %v10961_v13 = vpop.eup %10262  ;;  %v2622_v14 = vsel %vm1944_vm2, %v10959_v12, 0.0 }
 0x3d3   :  { %2623 = vadd.xlane.f32.xlu1 %v2622_v14  ;;  %v2619_v15 = vsel %vm1944_vm2, %v10961_v13, 0.0 }
 0x3d4   :  { %2620 = vadd.xlane.f32.xlu0 %v2619_v15  ;;  %v8382_v15 = vld [vmem:[%s11953_s10] ss:$0 sm:$0xff] }
 0x448   :  { %v2603_v16 = vpop.xlane.xlu0 %2602 }
 0x449   :  { %10264 = vrcp.f32 %v2603_v16 }
 0x44c   :  { %v2606_v17 = vpop.xlane.xlu1 %2605 }
 0x44d   :  { %10266 = vrcp.f32 %v2606_v17 }
 0x450   :  { %v2612_v18 = vpop.xlane.xlu1 %2611 }
 0x451   :  { %10268 = vrcp.f32 %v2612_v18  ;;  %v2609_v20 = vpop.xlane.xlu0 %2608  ;;  %v10336_v18 = vld [vmem:[%s11991_s27] sm:$0xff] }
 0x452   :  { %10270 = vrcp.f32 %v2609_v20 }
 0x453   :  { %v10265_v22 = vpop.eup %10264 }
 0x454   :  { %v2626_v23 = vmul.f32 %v10265_v22, %v10249_v47 }
 0x456   :  { %2641 = vst.msk [vmem:[%s11964_s21] sm:$0xff] %vm1944_vm2, %v2626_v23  ;;  %9280 = vmatmul.mubr.msk.f32.vlgmr.msra.gmra.mrb[30].mxu0 %vm1944_vm2, %v2626_v23 }
 0x457   :  { %v10267_v26 = vpop.eup %10266  ;;  %9288 = vmatpush3.msra.mxu0 %v1591_v24  ;;  %9289 = vmatprep.mubr.msk.f32.mxu0 %vm10387_vm1, %v10388_v27 }
 0x458   :  { %v2628_v28 = vmul.f32 %v10267_v26, %v10251_v57  ;;  %v2618_v29 = vpop.xlane.xlu1 %2617  ;;  %9297 = vmatprep.subr.mxu0 %v10388_v27 }
 0x459   :  { %10272 = vrcp.f32 %v2618_v29  ;;  %v2615_v30 = vpop.xlane.xlu0 %2614 }
 0x45a   :  { %2642 = vst.msk [vmem:[%s11964_s21 + $0x8] sm:$0xff] %vm1944_vm2, %v2628_v28  ;;  %10274 = vrcp.f32 %v2615_v30  ;;  %9285 = vmatmul.mubr.msk.f32.vlgmr.msra.gmra.mrb[34].mxu1 %vm1944_vm2, %v2628_v28 }
 0x45b   :  { %v10269_v31 = vpop.eup %10268  ;;  %9293 = vmatpush3.msra.mxu1 %v1661_v44  ;;  %9294 = vmatprep.mubr.msk.f32.mxu1 %vm10387_vm1, %v10388_v27 }
 0x45c   :  { %v10271_v32 = vpop.eup %10270  ;;  %v2632_v33 = vmul.f32 %v10269_v31, %v10253_v61  ;;  %9302 = vmatprep.subr.mxu1 %v10388_v27 }
 0x45d   :  { %v2630_v45 = vmul.f32 %v10271_v32, %v10255_v63 }
 0x45e   :  { %2644 = vst.msk [vmem:[%s11964_s21 + $0x18] sm:$0xff] %vm1944_vm2, %v2632_v33  ;;  %9295 = vmatmul.mubr.msk.f32.vlgmr.msra.gmra.mrb[36].mxu1 %vm1944_vm2, %v2632_v33 }
 0x45f   :  { %2643 = vst.msk [vmem:[%s11964_s21 + $0x10] sm:$0xff] %vm1944_vm2, %v2630_v45  ;;  %9290 = vmatmul.mubr.msk.f32.vlgmr.msra.gmra.mrb[32].mxu0 %vm1944_vm2, %v2630_v45  ;;  %9303 = vmatpush3.msra.mxu1 %v10926_v51  ;;  %v1941_v51 = vadd.f32 %v8341_v25, %v10930_v55  ;;  %v10337_v45 = vld [vmem:[%s11991_s27 + $0x8] sm:$0xff] }
 0x460   :  { %9298 = vmatpush3.msra.mxu0 %v10924_v50  ;;  %v2624_v34 = vpop.xlane.xlu1 %2623  ;;  %9299 = vmatprep.mubr.msk.f32.mxu0 %vm10387_vm1, %v10388_v27 }
 0x461   :  { %10276 = vrcp.f32 %v2624_v34  ;;  %v2621_v35 = vpop.xlane.xlu0 %2620  ;;  %9304 = vmatprep.mubr.msk.f32.mxu1 %vm10387_vm1, %v10388_v27  ;;  %9307 = vmatprep.subr.mxu0 %v10388_v27 }
 0x462   :  { %10278 = vrcp.f32 %v2621_v35  ;;  %9312 = vmatprep.subr.mxu1 %v10388_v27 }
 0x463   :  { %v10273_v36 = vpop.eup %10272 }
 0x464   :  { %v10275_v37 = vpop.eup %10274  ;;  %v2636_v38 = vmul.f32 %v10273_v36, %v10257_v8 }
 0x465   :  { %v2634_v50 = vmul.f32 %v10275_v37, %v10954_v9 }
 0x466   :  { %2646 = vst.msk [vmem:[%s11964_s21 + $0x28] sm:$0xff] %vm1944_vm2, %v2636_v38  ;;  %9305 = vmatmul.mubr.msk.f32.vlgmr.msra.gmra.mrb[38].mxu1 %vm1944_vm2, %v2636_v38 }
 0x467   :  { %2645 = vst.msk [vmem:[%s11964_s21 + $0x20] sm:$0xff] %vm1944_vm2, %v2634_v50  ;;  %9300 = vmatmul.mubr.msk.f32.vlgmr.msra.gmra.mrb[34].mxu0 %vm1944_vm2, %v2634_v50  ;;  %9313 = vmatpush3.msra.mxu1 %v1941_v51 }
 0x468   :  { %9308 = vmatpush3.msra.mxu0 %v1871_v39  ;;  %9309 = vmatprep.mubr.msk.f32.mxu0 %vm10387_vm1, %v10388_v27 }
 0x469   :  { %9314 = vmatprep.mubr.msk.f32.mxu1 %vm10387_vm1, %v10388_v27  ;;  %9317 = vmatprep.subr.mxu0 %v10388_v27 }
 0x46a   :  { %9322 = vmatprep.subr.mxu1 %v10388_v27 }
 0x46b   :  { %v10277_v54 = vpop.eup %10276 }
 0x46c   :  { %v10279_v55 = vpop.eup %10278  ;;  %v2640_v40 = vmul.f32 %v10277_v54, %v10959_v12 }
 0x46d   :  { %v2638_v41 = vmul.f32 %v10279_v55, %v10961_v13 }
 0x46e   :  { %2648 = vst.msk [vmem:[%s11964_s21 + $0x38] sm:$0xff] %vm1944_vm2, %v2640_v40  ;;  %9315 = vmatmul.mubr.msk.f32.vlgmr.msra.gmra.mrb[40].mxu1 %vm1944_vm2, %v2640_v40 }
 0x46f   :  { %2647 = vst.msk [vmem:[%s11964_s21 + $0x30] sm:$0xff] %vm1944_vm2, %v2638_v41  ;;  %9310 = vmatmul.mubr.msk.f32.vlgmr.msra.gmra.mrb[36].mxu0 %vm1944_vm2, %v2638_v41  ;;  %9324 = vmatprep.mubr.msk.f32.mxu1 %vm10387_vm1, %v10388_v27 }
 0x470   :  { %9319 = vmatprep.mubr.msk.f32.mxu0 %vm10387_vm1, %v10388_v27  ;;  %9318 = vmatpush3.msra.mxu0 %v3233_v42 }
 0x471   :  { %9327 = vmatprep.subr.mxu0 %v10388_v27  ;;  %9323 = vmatpush3.msra.mxu1 %v3234_v43 }
 0x472   :  { %9332 = vmatprep.subr.mxu1 %v10388_v27 }
 0x529   :  { %v2718_v47 = vpop.f32.mrb[30].mxu0 }
 0x52a   :  { %v9281_v48 = vpop.f32.mrb[31].mxu0  ;;  %9320 = vmatmul.mubr.msk.f32.vlgmr.msra.gmra.mrb[38].mxu0 %vm1944_vm2, %v2718_v47  ;;  %v3886_v47 = vld [vmem:[%s11956_s13 + $0x10] sm:$0xff] }
 0x52b   :  { %9328 = vmatpush3.msra.mxu0 %v3235_v46  ;;  %9329 = vmatprep.mubr.msk.f32.mxu0 %vm10387_vm1, %v10388_v27  ;;  %v3887_v48 = vld [vmem:[%s11956_s13 + $0x18] sm:$0xff] }
 0x52c   :  { %9337 = vmatprep.subr.mxu0 %v10388_v27 }
 0x52d   :  { %v2791_v52 = vpop.f32.mrb[34].mxu1 }
 0x52e   :  { %v9286_v53 = vpop.f32.mrb[35].mxu1  ;;  %9325 = vmatmul.mubr.msk.f32.vlgmr.msra.gmra.mrb[42].mxu1 %vm1944_vm2, %v2791_v52  ;;  %v3986_v52 = vld [vmem:[%s11958_s15] sm:$0xff] }
 0x52f   :  { %9333 = vmatpush3.msra.mxu1 %v3236_v49  ;;  %9334 = vmatprep.mubr.msk.f32.mxu1 %vm10387_vm1, %v10388_v27  ;;  %v3987_v53 = vld [vmem:[%s11958_s15 + $0x8] sm:$0xff] }
 0x530   :  { %9342 = vmatprep.subr.mxu1 %v10388_v27 }
 0x531   :  { %v2937_v56 = vpop.f32.mrb[36].mxu1 }
 0x532   :  { %v2864_v57 = vpop.f32.mrb[32].mxu0  ;;  %v9296_v58 = vpop.f32.mrb[37].mxu1  ;;  %9335 = vmatmul.mubr.msk.f32.vlgmr.msra.gmra.mrb[44].mxu1 %vm1944_vm2, %v2937_v56  ;;  %v3988_v56 = vld [vmem:[%s11958_s15 + $0x10] sm:$0xff] }
 0x533   :  { %v9291_v59 = vpop.f32.mrb[33].mxu0  ;;  %9330 = vmatmul.mubr.msk.f32.vlgmr.msra.gmra.mrb[40].mxu0 %vm1944_vm2, %v2864_v57  ;;  %9343 = vmatpush3.msra.mxu1 %v3234_v43  ;;  %v3885_v43 = vld [vmem:[%s11956_s13 + $0x8] sm:$0xff]  ;;  %v10004_v57 = vpack.c.bf16 %v3987_v53, %v3986_v52  ;;  %v3989_v58 = vld [vmem:[%s11958_s15 + $0x18] sm:$0xff] }
 0x534   :  { %9338 = vmatpush3.msra.mxu0 %v3233_v42  ;;  %9339 = vmatprep.mubr.msk.f32.mxu0 %vm10387_vm1, %v10388_v27  ;;  %v3884_v42 = vld [vmem:[%s11956_s13] sm:$0xff]  ;;  %v10008_v59 = vpack.c.bf16 %v3989_v58, %v3988_v56 }
 0x535   :  { %9344 = vmatprep.mubr.msk.f32.mxu1 %vm10387_vm1, %v10388_v27  ;;  %9347 = vmatprep.subr.mxu0 %v10388_v27 }
 0x536   :  { %9352 = vmatprep.subr.mxu1 %v10388_v27 }
 0x539   :  { %v3083_v60 = vpop.f32.mrb[38].mxu1 }
 0x53a   :  { %v3010_v61 = vpop.f32.mrb[34].mxu0  ;;  %v9306_v63 = vpop.f32.mrb[39].mxu1  ;;  %9345 = vmatmul.mubr.msk.f32.vlgmr.msra.gmra.mrb[46].mxu1 %vm1944_vm2, %v3083_v60  ;;  %v3990_v60 = vld [vmem:[%s11958_s15 + $0x20] sm:$0xff] }
 0x53b   :  { %v9301_v0 = vpop.f32.mrb[35].mxu0  ;;  %9340 = vmatmul.mubr.msk.f32.vlgmr.msra.gmra.mrb[42].mxu0 %vm1944_vm2, %v3010_v61  ;;  %9353 = vmatpush3.msra.mxu1 %v3236_v49  ;;  %v10000_v49 = vpack.c.bf16 %v3887_v48, %v3886_v47  ;;  %v3991_v61 = vld [vmem:[%s11958_s15 + $0x28] sm:$0xff] }
 0x53c   :  { %9348 = vmatpush3.msra.mxu0 %v3235_v46  ;;  %9349 = vmatprep.mubr.msk.f32.mxu0 %vm10387_vm1, %v10388_v27  ;;  %v9996_v46 = vpack.c.bf16 %v3885_v43, %v3884_v42  ;;  %v10012_v63 = vpack.c.bf16 %v3991_v61, %v3990_v60 }
 0x53d   :  { %9354 = vmatprep.mubr.msk.f32.mxu1 %vm10387_vm1, %v10388_v27  ;;  %10005 = vmatprep.subr.bf16.mxu1 %v10004_v57 }
 0x53e   :  { %9997 = vmatprep.subr.bf16.mxu0 %v9996_v46 }
 0x541   :  { %v3229_v1 = vpop.f32.mrb[40].mxu1 }
 0x542   :  { %v3156_v2 = vpop.f32.mrb[36].mxu0  ;;  %v9316_v3 = vpop.f32.mrb[41].mxu1  ;;  %9355 = vmatmul.mubr.msk.f32.vlgmr.msra.gmra.mrb[48].mxu1 %vm1944_vm2, %v3229_v1 }
 0x543   :  { %v9311_v4 = vpop.f32.mrb[37].mxu0  ;;  %9350 = vmatmul.mubr.msk.f32.vlgmr.msra.gmra.mrb[44].mxu0 %vm1944_vm2, %v3156_v2  ;;  %10007 = vmatpush3.bf16.msra.mxu1 %v10004_v57 }
 0x544   :  { %9999 = vmatpush3.bf16.msra.mxu0 %v9996_v46  ;;  %10009 = vmatprep.subr.bf16.mxu1 %v10008_v59  ;;  %v8383_v4 = vld [vmem:[%s11954_s11] ss:$0 sm:$0xff] }
 0x545   :  { %10001 = vmatprep.subr.bf16.mxu0 %v10000_v49  ;;  %v8388_v46 = vld [vmem:[%s11959_s16] ss:$0 sm:$0xff] }
 0x547   :  { %10011 = vmatpush3.bf16.msra.mxu1 %v10008_v59 }
 0x548   :  { %10003 = vmatpush3.bf16.msra.mxu0 %v10000_v49  ;;  %10013 = vmatprep.subr.bf16.mxu1 %v10012_v63 }
 0x549   :  { %10036 = vmatprep.subr.bf16.mxu0 %v10386_v19 }
 0x54b   :  { %10015 = vmatpush3.bf16.msra.mxu1 %v10012_v63 }
 0x5fd   :  { %v3306_v5 = vpop.f32.mrb[38].mxu0 }
 0x5fe   :  { %v9321_v6 = vpop.f32.mrb[39].mxu0 }
 0x601   :  { %v3379_v7 = vpop.f32.mrb[42].mxu1 }
 0x602   :  { %v3821_v8 = vadd.f32 %v3379_v7, %v3306_v5  ;;  %v9326_v9 = vpop.f32.mrb[43].mxu1 }
 0x605   :  { %v3525_v10 = vpop.f32.mrb[44].mxu1 }
 0x606   :  { %v3452_v11 = vpop.f32.mrb[40].mxu0  ;;  %v9336_v12 = vpop.f32.mrb[45].mxu1 }
 0x607   :  { %v3823_v13 = vadd.f32 %v3821_v8, %v3452_v11  ;;  %v9331_v14 = vpop.f32.mrb[41].mxu0  ;;  %v8384_v8 = vld [vmem:[%s11955_s12] ss:$0 sm:$0xff] }
 0x609   :  { %v3825_v16 = vadd.f32 %v3823_v13, %v3525_v10 }
 0x60b   :  { %v3834_v17 = vadd.f32 %v8382_v15, %v3825_v16  ;;  %v3992_v16 = vld [vmem:[%s11958_s15 + $0x30] sm:$0xff] }
 0x60d   :  { %3836 = vst.msk [vmem:[%s11965_s22] sm:$0xff] %vm82_vm0, %v3834_v17  ;;  %v11092_v20 = vadd.f32 %v10336_v18, %v3834_v17  ;;  %v3671_v21 = vpop.f32.mrb[46].mxu1  ;;  %v3993_v17 = vld [vmem:[%s11958_s15 + $0x38] sm:$0xff] }
 0x60e   :  { %v3598_v22 = vpop.f32.mrb[42].mxu0  ;;  %v9346_v23 = vpop.f32.mrb[47].mxu1  ;;  %v10016_v18 = vpack.c.bf16 %v3993_v17, %v3992_v16  ;;  %v8391_v17 = vld [vmem:[%s11993_s25 + $0x1] ss:$0 sm:$0xff] }
 0x60f   :  { %v3822_v24 = vadd.f32 %v3671_v21, %v3598_v22  ;;  %v9341_v25 = vpop.f32.mrb[43].mxu0  ;;  %v3842_v26 = vsel %vm82_vm0, %v11092_v20, 0.0  ;;  %v3994_v21 = vld [vmem:[%s11958_s15 + $0x40] sm:$0xff]  ;;  %v3995_v22 = vld [vmem:[%s11958_s15 + $0x48] sm:$0xff] }
 0x610   :  { %3843 = vadd.xlane.f32.xlu0 %v3842_v26  ;;  %10017 = vmatprep.subr.bf16.mxu1 %v10016_v18  ;;  %v10020_v23 = vpack.c.bf16 %v3995_v22, %v3994_v21  ;;  %v3997_v25 = vld [vmem:[%s11958_s15 + $0x58] sm:$0xff]  ;;  %v8401_v22 = vld [vmem:[%s11992_s0 + $0xc0] sm:$0xff] }
 0x611   :  { %10019 = vmatpush3.bf16.msra.mxu1 %v10016_v18 }
 0x612   :  { %10021 = vmatprep.subr.bf16.mxu1 %v10020_v23 }
 0x615   :  { %v3817_v28 = vpop.f32.mrb[48].mxu1  ;;  %10023 = vmatpush3.bf16.msra.mxu1 %v10020_v23  ;;  %v8402_v23 = vld [vmem:[%s11992_s0 + $0xc8] sm:$0xff] }
 0x616   :  { %v3744_v29 = vpop.f32.mrb[44].mxu0  ;;  %v9356_v44 = vpop.f32.mrb[49].mxu1 }
 0x617   :  { %v3824_v30 = vadd.f32 %v3822_v24, %v3744_v29  ;;  %v9351_v31 = vpop.f32.mrb[45].mxu0  ;;  %v3996_v24 = vld [vmem:[%s11958_s15 + $0x50] sm:$0xff]  ;;  %v3999_v29 = vld [vmem:[%s11958_s15 + $0x68] sm:$0xff] }
 0x618   :  { %v10024_v26 = vpack.c.bf16 %v3997_v25, %v3996_v24  ;;  %v4001_v31 = vld [vmem:[%s11958_s15 + $0x78] sm:$0xff]  ;;  %v8392_v24 = vld [vmem:[%s11994_s30 + $0x1] ss:$0 sm:$0xff] }
 0x619   :  { %v3826_v32 = vadd.f32 %v3824_v30, %v3817_v28  ;;  %v3998_v28 = vld [vmem:[%s11958_s15 + $0x60] sm:$0xff]  ;;  %v4000_v30 = vld [vmem:[%s11958_s15 + $0x70] sm:$0xff] }
 0x61a   :  { %10025 = vmatprep.subr.bf16.mxu1 %v10024_v26  ;;  %v10028_v44 = vpack.c.bf16 %v3999_v29, %v3998_v28  ;;  %v8398_v28 = vld [vmem:[%s11992_s0 + $0xa8] sm:$0xff] }
 0x61b   :  { %v3835_v33 = vadd.f32 %v8382_v15, %v3826_v32  ;;  %10027 = vmatpush3.bf16.msra.mxu1 %v10024_v26  ;;  %v10032_v32 = vpack.c.bf16 %v4001_v31, %v4000_v30  ;;  %v8397_v26 = vld [vmem:[%s11992_s0 + $0xa0] sm:$0xff]  ;;  %v10049_v30 = vpack.c.bf16 %v8402_v23, %v8401_v22 }
 0x61c   :  { %10029 = vmatprep.subr.bf16.mxu1 %v10028_v44  ;;  %v8461_v23 = vld [vmem:[%s11996_s4 + $0xa0] sm:$0xff] }
 0x61d   :  { %3837 = vst.msk [vmem:[%s11965_s22 + $0x8] sm:$0xff] %vm82_vm0, %v3835_v33  ;;  %v11103_v34 = vadd.f32 %v10337_v45, %v3835_v33  ;;  %v8385_v33 = vld [vmem:[%s11957_s14] ss:$0 sm:$0xff] }
 0x61f   :  { %v3845_v35 = vsel %vm82_vm0, %v11103_v34, 0.0  ;;  %10031 = vmatpush3.bf16.msra.mxu1 %v10028_v44 }
 0x620   :  { %3846 = vadd.xlane.f32.xlu1 %v3845_v35  ;;  %10033 = vmatprep.subr.bf16.mxu1 %v10032_v32 }
 0x623   :  { %10035 = vmatpush3.bf16.msra.mxu1 %v10032_v32  ;;  %v11251_v32 = vpack.c.bf16 %v8398_v28, %v8397_v26  ;;  %v8463_v26 = vld [vmem:[%s11996_s4 + $0xb0] sm:$0xff]  ;;  %v8464_v28 = vld [vmem:[%s11996_s4 + $0xb8] sm:$0xff] }
 0x624   :  { %10060 = vmatprep.subr.bf16.mxu1 %v10386_v19 }
 0x69d   :  { %v3844_v36 = vpop.xlane.xlu0 %3843 }
 0x69e   :  { %v3848_v37 = vmul.f32 0.03125, %v3844_v36 }
 0x6a0   :  { %v3850_v38 = vsub.f32 %v11092_v20, %v3848_v37 }
 0x6a2   :  { %v3852_v51 = vmul.f32 %v3850_v38, %v3850_v38 }
 0x6a4   :  { %v3854_v50 = vsel %vm82_vm0, %v3852_v51, 0.0 }
 0x6a5   :  { %3855 = vadd.xlane.f32.xlu0 %v3854_v50 }
 0x6ad   :  { %v3847_v39 = vpop.xlane.xlu1 %3846 }
 0x6ae   :  { %v3849_v54 = vmul.f32 0.03125, %v3847_v39 }
 0x6b0   :  { %v3851_v55 = vsub.f32 %v11103_v34, %v3849_v54 }
 0x6b2   :  { %v3853_v40 = vmul.f32 %v3851_v55, %v3851_v55 }
 0x6b4   :  { %v3857_v41 = vsel %vm82_vm0, %v3853_v40, 0.0 }
 0x6b5   :  { %3858 = vadd.xlane.f32.xlu1 %v3857_v41 }
 0x732   :  { %v3856_v0 = vpop.xlane.xlu0 %3855 }
 0x733   :  { %v3860_v1 = vmul.f32 0.03125, %v3856_v0 }
 0x735   :  { %v3862_v2 = vadd.f32 1e-05, %v3860_v1 }
 0x737   :  { %10280 = vrsqrt.f32 %v3862_v2 }
 0x741   :  { %v10281_v3 = vpop.eup %10280 }
 0x742   :  { %v3859_v5 = vpop.xlane.xlu1 %3858  ;;  %v3866_v6 = vmul.f32 %v10281_v3, %v3850_v38 }
 0x743   :  { %v3861_v7 = vmul.f32 0.03125, %v3859_v5  ;;  %v8394_v5 = vld [vmem:[%s11992_s0 + $0x88] sm:$0xff] }
 0x744   :  { %v3874_v9 = vmul.f32 %v8383_v4, %v3866_v6 }
 0x745   :  { %v3863_v10 = vadd.f32 1e-05, %v3861_v7  ;;  %v8395_v7 = vld [vmem:[%s11992_s0 + $0x90] sm:$0xff] }
 0x746   :  { %v3882_v11 = vadd.f32 %v8384_v8, %v3874_v9 }
 0x747   :  { %10282 = vrsqrt.f32 %v3863_v10 }
 0x748   :  { %9365 = vmatprep.mubr.msk.f32.mxu0 %vm82_vm0, %v3882_v11 }
 0x751   :  { %v10283_v12 = vpop.eup %10282 }
 0x752   :  { %v3867_v13 = vmul.f32 %v10283_v12, %v3851_v55 }
 0x754   :  { %v3875_v14 = vmul.f32 %v8383_v4, %v3867_v13  ;;  %v8393_v4 = vld [vmem:[%s11992_s0 + $0x80] sm:$0xff] }
 0x755   :  { %v10037_v6 = vpack.c.bf16 %v8394_v5, %v8393_v4  ;;  %v8460_v4 = vld [vmem:[%s11996_s4 + $0x98] sm:$0xff]  ;;  %v8431_v5 = vld [vmem:[%s11995_s7 + $0xb0] sm:$0xff] }
 0x756   :  { %v3883_v15 = vadd.f32 %v8384_v8, %v3875_v14  ;;  %v8396_v8 = vld [vmem:[%s11992_s0 + $0x98] sm:$0xff] }
 0x757   :  { %v10040_v9 = vpack.c.bf16 %v8396_v8, %v8395_v7 }
 0x758   :  { %9366 = vmatmul.mubr.msk.f32.vlgmr.msra.gmra.mrb[46].mxu0 %vm82_vm0, %v3883_v15 }
 0x759   :  { %9411 = vmatprep.mubr.msk.f32.mxu0 %vm10387_vm1, %v10388_v27  ;;  %10038 = vmatpush3.bf16.msra.mxu0 %v10037_v6 }
 0x75a   :  { %10039 = vmatprep.subr.bf16.mxu0 %v10386_v19 }
 0x75d   :  { %10041 = vmatpush3.bf16.msra.mxu0 %v10040_v9 }
 0x75e   :  { %10042 = vmatprep.subr.bf16.mxu0 %v10386_v19 }
 0x82b   :  { %v9367_v45 = vpop.f32.mrb[46].mxu0 }
 0x82c   :  { %v3973_v35 = vadd.f32 %v9367_v45, %v8385_v33  ;;  %v3967_v36 = vpop.f32.mrb[47].mxu0  ;;  %v8404_v45 = vld [vmem:[%s11992_s0 + $0xd8] sm:$0xff] }
 0x82d   :  { %v3968_v37 = vadd.f32 %v8385_v33, %v3967_v36  ;;  %v8403_v33 = vld [vmem:[%s11992_s0 + $0xd0] sm:$0xff] }
 0x82e   :  { %v3979_v38 = vmul.f32 0.70710677, %v3973_v35  ;;  %v3977_v41 = vmul.f32 0.5, %v3973_v35  ;;  %v8399_v36 = vld [vmem:[%s11992_s0 + $0xb0] sm:$0xff] }
 0x82f   :  { %v3978_v51 = vmul.f32 0.70710677, %v3968_v37  ;;  %v3976_v55 = vmul.f32 0.5, %v3968_v37  ;;  %v8400_v37 = vld [vmem:[%s11992_s0 + $0xb8] sm:$0xff] }
 0x830   :  { %10284 = verf.f32 %v3979_v38  ;;  %v10052_v38 = vpack.c.bf16 %v8404_v45, %v8403_v33  ;;  %v8471_v33 = vld [vmem:[%s11996_s4 + $0xf0] sm:$0xff]  ;;  %v8472_v45 = vld [vmem:[%s11996_s4 + $0xf8] sm:$0xff] }
 0x831   :  { %10286 = verf.f32 %v3978_v51  ;;  %v10046_v51 = vpack.c.bf16 %v8400_v37, %v8399_v36  ;;  %v10154_v36 = vpack.c.bf16 %v8472_v45, %v8471_v33 }
 0x83a   :  { %v10285_v50 = vpop.eup %10284 }
 0x83b   :  { %v10287_v39 = vpop.eup %10286  ;;  %v3983_v54 = vadd.f32 1.0, %v10285_v50  ;;  %v8425_v50 = vld [vmem:[%s11995_s7 + $0x80] sm:$0xff] }
 0x83c   :  { %v3982_v40 = vadd.f32 1.0, %v10287_v39  ;;  %v8426_v39 = vld [vmem:[%s11995_s7 + $0x88] sm:$0xff] }
 0x83d   :  { %v3985_v43 = vmul.f32 %v3983_v54, %v3977_v41  ;;  %v10085_v54 = vpack.c.bf16 %v8426_v39, %v8425_v50 }
 0x83e   :  { %v3984_v42 = vmul.f32 %v3982_v40, %v3976_v55  ;;  %v8427_v55 = vld [vmem:[%s11995_s7 + $0x90] sm:$0xff]  ;;  %v8428_v40 = vld [vmem:[%s11995_s7 + $0x98] sm:$0xff] }
 0x83f   :  { %v10088_v41 = vpack.c.bf16 %v8428_v40, %v8427_v55  ;;  %v8445_v40 = vld [vmem:[%s11997_s2 + $0x4] ss:$0 sm:$0xff] }
 0x840   :  { %9400 = vmatprep.mubr.f32.mxu1 %v3984_v42  ;;  %v8433_v42 = vld [vmem:[%s11995_s7 + $0xc0] sm:$0xff] }
 0x841   :  { %9401 = vmatmul.mubr.f32.vlgmr.msra.gmra.mrb[50].mxu1 %v3985_v43  ;;  %v8434_v43 = vld [vmem:[%s11995_s7 + $0xc8] sm:$0xff] }
 0x842   :  { %9455 = vmatprep.mubr.msk.f32.mxu1 %vm10387_vm1, %v10388_v27  ;;  %10062 = vmatpush3.bf16.msra.mxu1 %v10037_v6  ;;  %v8432_v6 = vld [vmem:[%s11995_s7 + $0xb8] sm:$0xff] }
 0x843   :  { %10063 = vmatprep.subr.bf16.mxu1 %v10386_v19  ;;  %v10094_v8 = vpack.c.bf16 %v8432_v6, %v8431_v5 }
 0x846   :  { %10065 = vmatpush3.bf16.msra.mxu1 %v10040_v9  ;;  %v8465_v9 = vld [vmem:[%s11996_s4 + $0xc0] sm:$0xff] }
 0x847   :  { %10072 = vmatprep.subr.bf16.mxu1 %v10386_v19 }
 0x914   :  { %v9402_v47 = vpop.f32.mrb[50].mxu1 }
 0x915   :  { %v4081_v48 = vadd.f32 %v9402_v47, %v8388_v46  ;;  %v4075_v49 = vpop.f32.mrb[51].mxu1  ;;  %v8406_v47 = vld [vmem:[%s11992_s0 + $0xe8] sm:$0xff] }
 0x916   :  { %v4076_v52 = vadd.f32 %v8388_v46, %v4075_v49  ;;  %v8405_v46 = vld [vmem:[%s11992_s0 + $0xe0] sm:$0xff] }
 0x917   :  { %v11192_v53 = vadd.f32 %v4081_v48, %v11103_v34  ;;  %v10097_v48 = vpack.c.bf16 %v8434_v43, %v8433_v42  ;;  %v10055_v49 = vpack.c.bf16 %v8406_v47, %v8405_v46 }
 0x918   :  { %v11195_v56 = vadd.f32 %v4076_v52, %v11092_v20  ;;  %v8435_v52 = vld [vmem:[%s11995_s7 + $0xd0] sm:$0xff] }
 0x919   :  { %4087 = vst.msk [vmem:[%s11963_s20 + $0x8] sm:$0xff] %vm82_vm0, %v11192_v53  ;;  %v4095_v57 = vsel %vm82_vm0, %v11192_v53, 0.0 }
 0x91a   :  { %4086 = vst.msk [vmem:[%s11963_s20] sm:$0xff] %vm82_vm0, %v11195_v56  ;;  %4096 = vadd.xlane.f32.xlu1 %v4095_v57  ;;  %v4092_v20 = vsel %vm82_vm0, %v11195_v56, 0.0  ;;  %v8436_v57 = vld [vmem:[%s11995_s7 + $0xd8] sm:$0xff] }
 0x91b   :  { %4093 = vadd.xlane.f32.xlu0 %v4092_v20  ;;  %v8407_v20 = vld [vmem:[%s11992_s0 + $0xf0] sm:$0xff] }
 0x9a7   :  { %v4097_v34 = vpop.xlane.xlu1 %4096 }
 0x9a8   :  { %v4099_v58 = vmul.f32 0.03125, %v4097_v34  ;;  %v4094_v59 = vpop.xlane.xlu0 %4093  ;;  %v8408_v34 = vld [vmem:[%s11992_s0 + $0xf8] sm:$0xff] }
 0x9a9   :  { %v4098_v60 = vmul.f32 0.03125, %v4094_v59  ;;  %v10058_v59 = vpack.c.bf16 %v8408_v34, %v8407_v20 }
 0x9aa   :  { %v4101_v61 = vsub.f32 %v11192_v53, %v4099_v58  ;;  %v10100_v58 = vpack.c.bf16 %v8436_v57, %v8435_v52 }
 0x9ab   :  { %v4100_v63 = vsub.f32 %v11195_v56, %v4098_v60  ;;  %v8457_v60 = vld [vmem:[%s11996_s4 + $0x80] sm:$0xff] }
 0x9ac   :  { %v4103_v0 = vmul.f32 %v4101_v61, %v4101_v61 }
 0x9ad   :  { %v4102_v1 = vmul.f32 %v4100_v63, %v4100_v63 }
 0x9ae   :  { %v4107_v2 = vsel %vm82_vm0, %v4103_v0, 0.0  ;;  %v8430_v0 = vld [vmem:[%s11995_s7 + $0xa8] sm:$0xff] }
 0x9af   :  { %4108 = vadd.xlane.f32.xlu1 %v4107_v2  ;;  %v4104_v3 = vsel %vm82_vm0, %v4102_v1, 0.0 }
 0x9b0   :  { %4105 = vadd.xlane.f32.xlu0 %v4104_v3  ;;  %v8459_v3 = vld [vmem:[%s11996_s4 + $0x90] sm:$0xff] }
 0x9b1   :  { %v10136_v7 = vpack.c.bf16 %v8460_v4, %v8459_v3 }
 0xa3c   :  { %v4109_v10 = vpop.xlane.xlu1 %4108 }
 0xa3d   :  { %v4111_v11 = vmul.f32 0.03125, %v4109_v10  ;;  %v4106_v12 = vpop.xlane.xlu0 %4105  ;;  %v8466_v10 = vld [vmem:[%s11996_s4 + $0xc8] sm:$0xff] }
 0xa3e   :  { %v4110_v13 = vmul.f32 0.03125, %v4106_v12  ;;  %v8438_v12 = vld [vmem:[%s11995_s7 + $0xe8] sm:$0xff] }
 0xa3f   :  { %v4113_v14 = vadd.f32 1e-05, %v4111_v11  ;;  %v8437_v11 = vld [vmem:[%s11995_s7 + $0xe0] sm:$0xff] }
 0xa40   :  { %v4112_v15 = vadd.f32 1e-05, %v4110_v13  ;;  %v10145_v13 = vpack.c.bf16 %v8466_v10, %v8465_v9  ;;  %v8477_v10 = vld [vmem:[%s11999_s29 + $0x4] ss:$0 sm:$0xff] }
 0xa41   :  { %10288 = vrsqrt.f32 %v4113_v14  ;;  %v10103_v14 = vpack.c.bf16 %v8438_v12, %v8437_v11  ;;  %v8446_v11 = vld [vmem:[%s11997_s2 + $0x5] ss:$0 sm:$0xff] }
 0xa42   :  { %10290 = vrsqrt.f32 %v4112_v15  ;;  %v8467_v15 = vld [vmem:[%s11996_s4 + $0xd0] sm:$0xff] }
 0xa4b   :  { %v10289_v16 = vpop.eup %10288 }
 0xa4c   :  { %v10291_v18 = vpop.eup %10290  ;;  %v4117_v21 = vmul.f32 %v10289_v16, %v4101_v61  ;;  %v8458_v61 = vld [vmem:[%s11996_s4 + $0x88] sm:$0xff]  ;;  %v8468_v16 = vld [vmem:[%s11996_s4 + $0xd8] sm:$0xff] }
 0xa4d   :  { %v4116_v25 = vmul.f32 %v10291_v18, %v4100_v63  ;;  %v8429_v63 = vld [vmem:[%s11995_s7 + $0xa0] sm:$0xff]  ;;  %v10133_v1 = vpack.c.bf16 %v8458_v61, %v8457_v60  ;;  %v8440_v18 = vld [vmem:[%s11995_s7 + $0xf8] sm:$0xff] }
 0xa4e   :  { %v4125_v29 = vmul.f32 %v8391_v17, %v4117_v21  ;;  %v10091_v2 = vpack.c.bf16 %v8430_v0, %v8429_v63  ;;  %v10148_v21 = vpack.c.bf16 %v8468_v16, %v8467_v15  ;;  %v8414_v16 = vld [vmem:[%s11998_s8 + $0x5] ss:$0 sm:$0xff] }
 0xa4f   :  { %v4124_v44 = vmul.f32 %v8391_v17, %v4116_v25  ;;  %v8439_v17 = vld [vmem:[%s11995_s7 + $0xf0] sm:$0xff] }
 0xa50   :  { %v11249_v31 = vadd.f32 %v8392_v24, %v4125_v29  ;;  %v10106_v22 = vpack.c.bf16 %v8440_v18, %v8439_v17  ;;  %v10142_v29 = vpack.c.bf16 %v8464_v28, %v8463_v26  ;;  %v8416_v26 = vld [vmem:[%s11998_s8 + $0x7] ss:$0 sm:$0xff] }
 0xa51   :  { %v11259_v35 = vadd.f32 %v8392_v24, %v4124_v44  ;;  %v8462_v24 = vld [vmem:[%s11996_s4 + $0xa8] sm:$0xff]  ;;  %v8469_v44 = vld [vmem:[%s11996_s4 + $0xe0] sm:$0xff] }
 0xa52   :  { %9456 = vmatmul.mubr.msk.f32.vlgmr.msra.gmra.mrb[52].mxu1 %vm82_vm0, %v11249_v31  ;;  %v10139_v25 = vpack.c.bf16 %v8462_v24, %v8461_v23 }
 0xa53   :  { %10074 = vmatpush3.bf16.msra.mxu1 %v10049_v30  ;;  %9412 = vmatmul.mubr.msk.f32.vlgmr.msra.gmra.mrb[48].mxu0 %vm82_vm0, %v11259_v35 }
 0xa54   :  { %10044 = vmatpush3.bf16.msra.mxu0 %v11251_v32  ;;  %10075 = vmatprep.subr.bf16.mxu1 %v10386_v19 }
 0xa55   :  { %10045 = vmatprep.subr.bf16.mxu0 %v10386_v19  ;;  %9477 = vmatprep.mubr.msk.f32.mxu1 %vm10387_vm1, %v10388_v27 }
 0xa56   :  { %9422 = vmatprep.mubr.msk.f32.mxu0 %vm10387_vm1, %v10388_v27 }
 0xa57   :  { %10077 = vmatpush3.bf16.msra.mxu1 %v10052_v38 }
 0xa58   :  { %10047 = vmatpush3.bf16.msra.mxu0 %v10046_v51  ;;  %10084 = vmatprep.subr.bf16.mxu1 %v10386_v19 }
 0xa59   :  { %10048 = vmatprep.subr.bf16.mxu0 %v10386_v19 }
 0xa5a   :  { %9478 = vmatmul.mubr.msk.f32.vlgmr.msra.gmra.mrb[54].mxu1 %vm82_vm0, %v11249_v31 }
 0xa5b   :  { %9423 = vmatmul.mubr.msk.f32.vlgmr.msra.gmra.mrb[50].mxu0 %vm82_vm0, %v11259_v35  ;;  %10086 = vmatpush3.bf16.msra.mxu1 %v10085_v54 }
 0xa5c   :  { %10050 = vmatpush3.bf16.msra.mxu0 %v10049_v30  ;;  %10087 = vmatprep.subr.bf16.mxu1 %v10386_v19  ;;  %v8470_v30 = vld [vmem:[%s11996_s4 + $0xe8] sm:$0xff] }
 0xa5d   :  { %10051 = vmatprep.subr.bf16.mxu0 %v10386_v19  ;;  %9499 = vmatprep.mubr.msk.f32.mxu1 %vm10387_vm1, %v10388_v27 }
 0xa5e   :  { %9433 = vmatprep.mubr.msk.f32.mxu0 %vm10387_vm1, %v10388_v27 }
 0xa5f   :  { %10089 = vmatpush3.bf16.msra.mxu1 %v10088_v41 }
 0xa60   :  { %10053 = vmatpush3.bf16.msra.mxu0 %v10052_v38  ;;  %10096 = vmatprep.subr.bf16.mxu1 %v10386_v19 }
 0xa61   :  { %10054 = vmatprep.subr.bf16.mxu0 %v10386_v19 }
 0xa62   :  { %9500 = vmatmul.mubr.msk.f32.vlgmr.msra.gmra.mrb[56].mxu1 %vm82_vm0, %v11259_v35 }
 0xa63   :  { %9434 = vmatmul.mubr.msk.f32.vlgmr.msra.gmra.mrb[52].mxu0 %vm82_vm0, %v11259_v35  ;;  %10098 = vmatpush3.bf16.msra.mxu1 %v10097_v48 }
 0xa64   :  { %10056 = vmatpush3.bf16.msra.mxu0 %v10055_v49  ;;  %10099 = vmatprep.subr.bf16.mxu1 %v10386_v19 }
 0xa65   :  { %10057 = vmatprep.subr.bf16.mxu0 %v10386_v19  ;;  %9521 = vmatprep.mubr.msk.f32.mxu1 %vm10387_vm1, %v10388_v27 }
 0xa66   :  { %9444 = vmatprep.mubr.msk.f32.mxu0 %vm10387_vm1, %v10388_v27 }
 0xa67   :  { %10101 = vmatpush3.bf16.msra.mxu1 %v10100_v58 }
 0xa68   :  { %10059 = vmatpush3.bf16.msra.mxu0 %v10058_v59  ;;  %10108 = vmatprep.subr.bf16.mxu1 %v10386_v19 }
 0xa69   :  { %10066 = vmatprep.subr.bf16.mxu0 %v10386_v19 }
 0xa6a   :  { %9522 = vmatmul.mubr.msk.f32.vlgmr.msra.gmra.mrb[58].mxu1 %vm82_vm0, %v11259_v35 }
 0xa6b   :  { %9445 = vmatmul.mubr.msk.f32.vlgmr.msra.gmra.mrb[54].mxu0 %vm82_vm0, %v11259_v35  ;;  %10110 = vmatpush3.bf16.msra.mxu1 %v10085_v54 }
 0xa6c   :  { %10068 = vmatpush3.bf16.msra.mxu0 %v11251_v32  ;;  %10111 = vmatprep.subr.bf16.mxu1 %v10386_v19  ;;  %v10151_v32 = vpack.c.bf16 %v8470_v30, %v8469_v44 }
 0xa6d   :  { %10069 = vmatprep.subr.bf16.mxu0 %v10386_v19  ;;  %9543 = vmatprep.mubr.msk.f32.mxu1 %vm10387_vm1, %v10388_v27 }
 0xa6e   :  { %9466 = vmatprep.mubr.msk.f32.mxu0 %vm10387_vm1, %v10388_v27 }
 0xa6f   :  { %10113 = vmatpush3.bf16.msra.mxu1 %v10088_v41 }
 0xa70   :  { %10071 = vmatpush3.bf16.msra.mxu0 %v10046_v51  ;;  %10120 = vmatprep.subr.bf16.mxu1 %v10386_v19 }
 0xa71   :  { %10078 = vmatprep.subr.bf16.mxu0 %v10386_v19 }
 0xa72   :  { %9544 = vmatmul.mubr.msk.f32.vlgmr.msra.gmra.mrb[60].mxu1 %vm82_vm0, %v11249_v31 }
 0xa73   :  { %9467 = vmatmul.mubr.msk.f32.vlgmr.msra.gmra.mrb[56].mxu0 %vm82_vm0, %v11249_v31  ;;  %10122 = vmatpush3.bf16.msra.mxu1 %v10097_v48 }
 0xa74   :  { %10080 = vmatpush3.bf16.msra.mxu0 %v10055_v49  ;;  %10123 = vmatprep.subr.bf16.mxu1 %v10386_v19  ;;  %v8447_v49 = vld [vmem:[%s11997_s2 + $0x6] ss:$0 sm:$0xff] }
 0xa75   :  { %10081 = vmatprep.subr.bf16.mxu0 %v10386_v19  ;;  %9565 = vmatprep.mubr.msk.f32.mxu1 %vm10387_vm1, %v10388_v27 }
 0xa76   :  { %9488 = vmatprep.mubr.msk.f32.mxu0 %vm10387_vm1, %v10388_v27 }
 0xa77   :  { %10125 = vmatpush3.bf16.msra.mxu1 %v10100_v58 }
 0xa78   :  { %10083 = vmatpush3.bf16.msra.mxu0 %v10058_v59  ;;  %10132 = vmatprep.subr.bf16.mxu1 %v10386_v19  ;;  %v8415_v59 = vld [vmem:[%s11998_s8 + $0x6] ss:$0 sm:$0xff] }
 0xa79   :  { %10090 = vmatprep.subr.bf16.mxu0 %v10386_v19 }
 0xa7a   :  { %9566 = vmatmul.mubr.msk.f32.vlgmr.msra.gmra.mrb[62].mxu1 %vm82_vm0, %v11249_v31 }
 0xa7b   :  { %9489 = vmatmul.mubr.msk.f32.vlgmr.msra.gmra.mrb[58].mxu0 %vm82_vm0, %v11249_v31  ;;  %10134 = vmatpush3.bf16.msra.mxu1 %v10133_v1 }
 0xa7c   :  { %10092 = vmatpush3.bf16.msra.mxu0 %v10091_v2  ;;  %10135 = vmatprep.subr.bf16.mxu1 %v10386_v19 }
 0xa7d   :  { %10093 = vmatprep.subr.bf16.mxu0 %v10386_v19  ;;  %9587 = vmatprep.mubr.msk.f32.mxu1 %vm10387_vm1, %v10388_v27 }
 0xa7e   :  { %9510 = vmatprep.mubr.msk.f32.mxu0 %vm10387_vm1, %v10388_v27 }
 0xa7f   :  { %10137 = vmatpush3.bf16.msra.mxu1 %v10136_v7 }
 0xa80   :  { %10095 = vmatpush3.bf16.msra.mxu0 %v10094_v8  ;;  %10144 = vmatprep.subr.bf16.mxu1 %v10386_v19 }
 0xa81   :  { %10102 = vmatprep.subr.bf16.mxu0 %v10386_v19 }
 0xa82   :  { %9588 = vmatmul.mubr.msk.f32.vlgmr.msra.gmra.mrb[64].mxu1 %vm82_vm0, %v11259_v35 }
 0xa83   :  { %9511 = vmatmul.mubr.msk.f32.vlgmr.msra.gmra.mrb[60].mxu0 %vm82_vm0, %v11259_v35  ;;  %10146 = vmatpush3.bf16.msra.mxu1 %v10145_v13 }
 0xa84   :  { %10104 = vmatpush3.bf16.msra.mxu0 %v10103_v14  ;;  %10147 = vmatprep.subr.bf16.mxu1 %v10386_v19 }
 0xa85   :  { %10105 = vmatprep.subr.bf16.mxu0 %v10386_v19  ;;  %9609 = vmatprep.mubr.msk.f32.mxu1 %vm10387_vm1, %v10388_v27 }
 0xa86   :  { %9532 = vmatprep.mubr.msk.f32.mxu0 %vm10387_vm1, %v10388_v27 }
 0xa87   :  { %10149 = vmatpush3.bf16.msra.mxu1 %v10148_v21 }
 0xa88   :  { %10107 = vmatpush3.bf16.msra.mxu0 %v10106_v22  ;;  %10156 = vmatprep.subr.bf16.mxu1 %v10386_v19 }
 0xa89   :  { %10114 = vmatprep.subr.bf16.mxu0 %v10386_v19 }
 0xa8a   :  { %9610 = vmatmul.mubr.msk.f32.vlgmr.msra.gmra.mrb[66].mxu1 %vm82_vm0, %v11259_v35 }
 0xa8b   :  { %9533 = vmatmul.mubr.msk.f32.vlgmr.msra.gmra.mrb[62].mxu0 %vm82_vm0, %v11259_v35  ;;  %10158 = vmatpush3.bf16.msra.mxu1 %v10133_v1 }
 0xa8c   :  { %10116 = vmatpush3.bf16.msra.mxu0 %v10091_v2  ;;  %10159 = vmatprep.subr.bf16.mxu1 %v10386_v19 }
 0xa8d   :  { %10117 = vmatprep.subr.bf16.mxu0 %v10386_v19  ;;  %9631 = vmatprep.mubr.msk.f32.mxu1 %vm10387_vm1, %v10388_v27 }
 0xa8e   :  { %9554 = vmatprep.mubr.msk.f32.mxu0 %vm10387_vm1, %v10388_v27 }
 0xa8f   :  { %10161 = vmatpush3.bf16.msra.mxu1 %v10136_v7 }
 0xa90   :  { %10119 = vmatpush3.bf16.msra.mxu0 %v10094_v8  ;;  %10168 = vmatprep.subr.bf16.mxu1 %v10386_v19 }
 0xa91   :  { %10126 = vmatprep.subr.bf16.mxu0 %v10386_v19 }
 0xa92   :  { %9632 = vmatmul.mubr.msk.f32.vlgmr.msra.gmra.mrb[68].mxu1 %vm82_vm0, %v11249_v31 }
 0xa93   :  { %9555 = vmatmul.mubr.msk.f32.vlgmr.msra.gmra.mrb[64].mxu0 %vm82_vm0, %v11249_v31  ;;  %10170 = vmatpush3.bf16.msra.mxu1 %v10145_v13 }
 0xa94   :  { %10128 = vmatpush3.bf16.msra.mxu0 %v10103_v14  ;;  %10171 = vmatprep.subr.bf16.mxu1 %v10386_v19 }
 0xa95   :  { %10129 = vmatprep.subr.bf16.mxu0 %v10386_v19  ;;  %9653 = vmatprep.mubr.msk.f32.mxu1 %vm10387_vm1, %v10388_v27 }
 0xa96   :  { %9576 = vmatprep.mubr.msk.f32.mxu0 %vm10387_vm1, %v10388_v27 }
 0xa97   :  { %10173 = vmatpush3.bf16.msra.mxu1 %v10148_v21 }
 0xa98   :  { %10131 = vmatpush3.bf16.msra.mxu0 %v10106_v22  ;;  %9667 = vmatprep.subr.mxu1 %v10388_v27  ;;  %v8448_v22 = vld [vmem:[%s11997_s2 + $0x7] ss:$0 sm:$0xff] }
 0xa99   :  { %10138 = vmatprep.subr.bf16.mxu0 %v10386_v19 }
 0xa9a   :  { %9654 = vmatmul.mubr.msk.f32.vlgmr.msra.gmra.mrb[70].mxu1 %vm82_vm0, %v11249_v31 }
 0xa9b   :  { %9577 = vmatmul.mubr.msk.f32.vlgmr.msra.gmra.mrb[66].mxu0 %vm82_vm0, %v11249_v31  ;;  %9669 = vmatprep.mubr.msk.f32.mxu1 %vm10387_vm1, %v10388_v27 }
 0xa9c   :  { %10140 = vmatpush3.bf16.msra.mxu0 %v10139_v25  ;;  %9598 = vmatprep.mubr.msk.f32.mxu0 %vm10387_vm1, %v10388_v27 }
 0xa9d   :  { %10141 = vmatprep.subr.bf16.mxu0 %v10386_v19 }
 0xaa0   :  { %10143 = vmatpush3.bf16.msra.mxu0 %v10142_v29 }
 0xaa1   :  { %10150 = vmatprep.subr.bf16.mxu0 %v10386_v19 }
 0xaa3   :  { %9599 = vmatmul.mubr.msk.f32.vlgmr.msra.gmra.mrb[68].mxu0 %vm82_vm0, %v11259_v35 }
 0xaa4   :  { %10152 = vmatpush3.bf16.msra.mxu0 %v10151_v32  ;;  %9620 = vmatprep.mubr.msk.f32.mxu0 %vm10387_vm1, %v10388_v27 }
 0xaa5   :  { %10153 = vmatprep.subr.bf16.mxu0 %v10386_v19 }
 0xaa8   :  { %10155 = vmatpush3.bf16.msra.mxu0 %v10154_v36 }
 0xaa9   :  { %10162 = vmatprep.subr.bf16.mxu0 %v10386_v19 }
 0xaab   :  { %9621 = vmatmul.mubr.msk.f32.vlgmr.msra.gmra.mrb[70].mxu0 %vm82_vm0, %v11259_v35 }
 0xaac   :  { %10164 = vmatpush3.bf16.msra.mxu0 %v10139_v25  ;;  %9642 = vmatprep.mubr.msk.f32.mxu0 %vm10387_vm1, %v10388_v27 }
 0xaad   :  { %10165 = vmatprep.subr.bf16.mxu0 %v10386_v19 }
 0xab0   :  { %10167 = vmatpush3.bf16.msra.mxu0 %v10142_v29 }
 0xab1   :  { %10174 = vmatprep.subr.bf16.mxu0 %v10386_v19 }
 0xab3   :  { %9643 = vmatmul.mubr.msk.f32.vlgmr.msra.gmra.mrb[72].mxu0 %vm82_vm0, %v11249_v31 }
 0xab4   :  { %10176 = vmatpush3.bf16.msra.mxu0 %v10151_v32  ;;  %9664 = vmatprep.mubr.msk.f32.mxu0 %vm10387_vm1, %v10388_v27 }
 0xab5   :  { %10177 = vmatprep.subr.bf16.mxu0 %v10386_v19 }
 0xab8   :  { %10179 = vmatpush3.bf16.msra.mxu0 %v10154_v36 }
 0xab9   :  { %9677 = vmatprep.subr.mxu0 %v10388_v27 }
 0xabb   :  { %9665 = vmatmul.mubr.msk.f32.vlgmr.msra.gmra.mrb[74].mxu0 %vm82_vm0, %v11249_v31  ;;  %v8413_v31 = vld [vmem:[%s11998_s8 + $0x4] ss:$0 sm:$0xff] }
 0xabc   :  { %9679 = vmatprep.mubr.msk.f32.mxu0 %vm10387_vm1, %v10388_v27 }
 0xb25   :  { %v4532_v35 = vpop.f32.mrb[52].mxu1 }
 0xb26   :  { %v4249_v37 = vpop.f32.mrb[48].mxu0  ;;  %v9457_v38 = vpop.f32.mrb[53].mxu1  ;;  %v4533_v3 = vadd.f32 %v8413_v31, %v4532_v35 }
 0xb27   :  { %v9413_v51 = vpop.f32.mrb[49].mxu0  ;;  %v4250_v48 = vadd.f32 %v8413_v31, %v4249_v37 }
 0xb2d   :  { %v4672_v50 = vpop.f32.mrb[54].mxu1 }
 0xb2e   :  { %v4319_v39 = vpop.f32.mrb[50].mxu0  ;;  %v9479_v54 = vpop.f32.mrb[55].mxu1  ;;  %v4673_v9 = vadd.f32 %v8415_v59, %v4672_v50 }
 0xb2f   :  { %v9424_v55 = vpop.f32.mrb[51].mxu0  ;;  %v4320_v21 = vadd.f32 %v8414_v16, %v4319_v39 }
 0xb35   :  { %v4858_v41 = vpop.f32.mrb[56].mxu1 }
 0xb36   :  { %v4859_v42 = vadd.f32 %v8445_v40, %v4858_v41  ;;  %v4389_v43 = vpop.f32.mrb[52].mxu0  ;;  %v9501_v46 = vpop.f32.mrb[57].mxu1 }
 0xb37   :  { %v9435_v47 = vpop.f32.mrb[53].mxu0  ;;  %v4390_v60 = vadd.f32 %v8415_v59, %v4389_v43 }
 0xb38   :  { %9668 = vmatpush3.xpose.msk.msra.mxu1 %vm1944_vm2, %v4859_v42 }
 0xb39   :  { %9672 = vmatprep.subr.mxu1 %v10388_v27 }
 0xb3b   :  { %9670 = vmatmul.mubr.msk.f32.vlgmr.msra.gmra.mrb[72].mxu1 %vm1944_vm2, %v4250_v48 }
 0xb3c   :  { %9674 = vmatprep.mubr.msk.f32.mxu1 %vm10387_vm1, %v10388_v27 }
 0xb3d   :  { %v4998_v52 = vpop.f32.mrb[58].mxu1 }
 0xb3e   :  { %v4999_v57 = vadd.f32 %v8447_v49, %v4998_v52  ;;  %v4459_v20 = vpop.f32.mrb[54].mxu0  ;;  %v9523_v34 = vpop.f32.mrb[59].mxu1 }
 0xb3f   :  { %v9446_v58 = vpop.f32.mrb[55].mxu0  ;;  %v4460_v44 = vadd.f32 %v8416_v26, %v4459_v20 }
 0xb40   :  { %9678 = vmatpush3.xpose.msk.msra.mxu0 %vm1944_vm2, %v4999_v57 }
 0xb41   :  { %9687 = vmatprep.subr.mxu0 %v10388_v27 }
 0xb43   :  { %9680 = vmatmul.mubr.msk.f32.vlgmr.msra.gmra.mrb[76].mxu0 %vm1944_vm2, %v4390_v60 }
 0xb44   :  { %9689 = vmatprep.mubr.msk.f32.mxu0 %vm10387_vm1, %v10388_v27 }
 0xb45   :  { %v5138_v61 = vpop.f32.mrb[60].mxu1 }
 0xb46   :  { %v5139_v63 = vadd.f32 %v8445_v40, %v5138_v61  ;;  %v4602_v0 = vpop.f32.mrb[56].mxu0  ;;  %v9545_v1 = vpop.f32.mrb[61].mxu1  ;;  %v8478_v40 = vld [vmem:[%s11999_s29 + $0x5] ss:$0 sm:$0xff] }
 0xb47   :  { %v9468_v2 = vpop.f32.mrb[57].mxu0  ;;  %v4603_v37 = vadd.f32 %v8414_v16, %v4602_v0 }
 0xb48   :  { %9688 = vmatpush3.xpose.msk.msra.mxu0 %vm1944_vm2, %v5139_v63 }
 0xb49   :  { %9697 = vmatprep.subr.mxu0 %v10388_v27 }
 0xb4b   :  { %9690 = vmatmul.mubr.msk.f32.vlgmr.msra.gmra.mrb[78].mxu0 %vm1944_vm2, %v4533_v3 }
 0xb4c   :  { %9699 = vmatprep.mubr.msk.f32.mxu0 %vm10387_vm1, %v10388_v27 }
 0xb4d   :  { %v5278_v4 = vpop.f32.mrb[62].mxu1 }
 0xb4e   :  { %v5279_v5 = vadd.f32 %v8447_v49, %v5278_v4  ;;  %v4742_v6 = vpop.f32.mrb[58].mxu0  ;;  %v9567_v7 = vpop.f32.mrb[63].mxu1 }
 0xb4f   :  { %v9490_v8 = vpop.f32.mrb[59].mxu0  ;;  %v4743_v55 = vadd.f32 %v8416_v26, %v4742_v6 }
 0xb50   :  { %9698 = vmatpush3.xpose.msk.msra.mxu0 %vm1944_vm2, %v5279_v5 }
 0xb51   :  { %9707 = vmatprep.subr.mxu0 %v10388_v27 }
 0xb53   :  { %9700 = vmatmul.mubr.msk.f32.vlgmr.msra.gmra.mrb[80].mxu0 %vm1944_vm2, %v4673_v9 }
 0xb54   :  { %9709 = vmatprep.mubr.msk.f32.mxu0 %vm10387_vm1, %v10388_v27 }
 0xb55   :  { %v5464_v12 = vpop.f32.mrb[64].mxu1 }
 0xb56   :  { %v5465_v13 = vadd.f32 %v8477_v10, %v5464_v12  ;;  %v4928_v14 = vpop.f32.mrb[60].mxu0  ;;  %v9589_v15 = vpop.f32.mrb[65].mxu1 }
 0xb57   :  { %v4929_v17 = vadd.f32 %v8446_v11, %v4928_v14  ;;  %v9512_v18 = vpop.f32.mrb[61].mxu0 }
 0xb58   :  { %9708 = vmatpush3.msra.mxu0 %v5465_v13 }
 0xb59   :  { %9673 = vmatpush3.xpose.msk.msra.mxu1 %vm1944_vm2, %v4929_v17  ;;  %9717 = vmatprep.subr.mxu0 %v10388_v27 }
 0xb5a   :  { %9682 = vmatprep.subr.mxu1 %v10388_v27 }
 0xb5c   :  { %9675 = vmatmul.mubr.msk.f32.vlgmr.msra.gmra.mrb[74].mxu1 %vm1944_vm2, %v4320_v21 }
 0xb5d   :  { %v11565_v23 = vpop.f32.mrb[66].mxu1  ;;  %9684 = vmatprep.mubr.msk.f32.mxu1 %vm10387_vm1, %v10388_v27 }
 0xb5e   :  { %v5068_v24 = vpop.f32.mrb[62].mxu0  ;;  %v9611_v25 = vpop.f32.mrb[67].mxu1 }
 0xb5f   :  { %v5069_v28 = vadd.f32 %v8448_v22, %v5068_v24  ;;  %v9534_v29 = vpop.f32.mrb[63].mxu0 }
 0xb61   :  { %9683 = vmatpush3.xpose.msk.msra.mxu1 %vm1944_vm2, %v5069_v28 }
 0xb62   :  { %9692 = vmatprep.subr.mxu1 %v10388_v27 }
 0xb64   :  { %9685 = vmatmul.mubr.msk.f32.vlgmr.msra.gmra.mrb[76].mxu1 %vm1944_vm2, %v4460_v44 }
 0xb65   :  { %v5744_v30 = vpop.f32.mrb[68].mxu1  ;;  %9694 = vmatprep.mubr.msk.f32.mxu1 %vm10387_vm1, %v10388_v27 }
 0xb66   :  { %v11577_v32 = vadd.f32 %v8477_v10, %v5744_v30  ;;  %v5208_v33 = vpop.f32.mrb[64].mxu0  ;;  %v9633_v45 = vpop.f32.mrb[69].mxu1 }
 0xb67   :  { %v5209_v36 = vadd.f32 %v8446_v11, %v5208_v33  ;;  %v9556_v35 = vpop.f32.mrb[65].mxu0 }
 0xb69   :  { %9693 = vmatpush3.xpose.msk.msra.mxu1 %vm1944_vm2, %v5209_v36 }
 0xb6a   :  { %9702 = vmatprep.subr.mxu1 %v10388_v27 }
 0xb6c   :  { %9695 = vmatmul.mubr.msk.f32.vlgmr.msra.gmra.mrb[78].mxu1 %vm1944_vm2, %v4603_v37 }
 0xb6d   :  { %v11582_v38 = vpop.f32.mrb[70].mxu1  ;;  %9704 = vmatprep.mubr.msk.f32.mxu1 %vm10387_vm1, %v10388_v27 }
 0xb6e   :  { %v5348_v51 = vpop.f32.mrb[66].mxu0  ;;  %v9655_v50 = vpop.f32.mrb[71].mxu1 }
 0xb6f   :  { %v5349_v39 = vadd.f32 %v8448_v22, %v5348_v51  ;;  %v9578_v54 = vpop.f32.mrb[67].mxu0 }
 0xb71   :  { %9703 = vmatpush3.xpose.msk.msra.mxu1 %vm1944_vm2, %v5349_v39 }
 0xb72   :  { %9712 = vmatprep.subr.mxu1 %v10388_v27 }
 0xb74   :  { %9705 = vmatmul.mubr.msk.f32.vlgmr.msra.gmra.mrb[80].mxu1 %vm1944_vm2, %v4743_v55 }
 0xb75   :  { %9714 = vmatprep.mubr.msk.f32.mxu1 %vm10387_vm1, %v10388_v27 }
 0xb76   :  { %v5534_v41 = vpop.f32.mrb[68].mxu0 }
 0xb77   :  { %v5535_v31 = vadd.f32 %v8478_v40, %v5534_v41  ;;  %v9600_v42 = vpop.f32.mrb[69].mxu0 }
 0xb79   :  { %9713 = vmatpush3.msra.mxu1 %v5535_v31 }
 0xb7a   :  { %9722 = vmatprep.subr.mxu1 %v10388_v27 }
 0xb7e   :  { %v11595_v43 = vpop.f32.mrb[70].mxu0 }
 0xb7f   :  { %v9622_v46 = vpop.f32.mrb[71].mxu0 }
 0xb86   :  { %v5814_v47 = vpop.f32.mrb[72].mxu0 }
 0xb87   :  { %v11597_v48 = vadd.f32 %v8478_v40, %v5814_v47  ;;  %v9644_v49 = vpop.f32.mrb[73].mxu0 }
 0xb8e   :  { %v11599_v52 = vpop.f32.mrb[74].mxu0 }
 0xb8f   :  { %v9666_v57 = vpop.f32.mrb[75].mxu0 }
 0xc0e   :  { %v6030_v20 = vpop.f32.mrb[72].mxu1 }
 0xc0f   :  { %v6031_v34 = vadd.f32 %v6030_v20, %v10932_v62  ;;  %v9671_v58 = vpop.f32.mrb[73].mxu1 }
 0xc11   :  { %v6566_v59 = vsel %vm1944_vm2, %v6031_v34, -inf }
 0xc12   :  { %6567 = vmax.xlane.f32.xlu0 %v6566_v59 }
 0xc16   :  { %v6182_v60 = vpop.f32.mrb[76].mxu0 }
 0xc17   :  { %v6183_v61 = vadd.f32 %v6182_v60, %v10932_v62  ;;  %v9681_v63 = vpop.f32.mrb[77].mxu0 }
 0xc19   :  { %v6572_v0 = vsel %vm1944_vm2, %v6183_v61, -inf }
 0xc1a   :  { %6573 = vmax.xlane.f32.xlu0 %v6572_v0 }
 0xc1e   :  { %v6334_v1 = vpop.f32.mrb[78].mxu0 }
 0xc1f   :  { %v6335_v2 = vadd.f32 %v6334_v1, %v10932_v62  ;;  %v9691_v3 = vpop.f32.mrb[79].mxu0 }
 0xc21   :  { %v6578_v4 = vsel %vm1944_vm2, %v6335_v2, -inf }
 0xc22   :  { %6579 = vmax.xlane.f32.xlu0 %v6578_v4 }
 0xc26   :  { %v6486_v5 = vpop.f32.mrb[80].mxu0 }
 0xc27   :  { %v6487_v6 = vadd.f32 %v6486_v5, %v10932_v62  ;;  %v9701_v7 = vpop.f32.mrb[81].mxu0 }
 0xc29   :  { %v6584_v8 = vsel %vm1944_vm2, %v6487_v6, -inf }
 0xc2a   :  { %6585 = vmax.xlane.f32.xlu0 %v6584_v8 }
 0xc2f   :  { %v6106_v9 = vpop.f32.mrb[74].mxu1 }
 0xc30   :  { %v6107_v10 = vadd.f32 %v6106_v9, %v10932_v62  ;;  %v9676_v11 = vpop.f32.mrb[75].mxu1 }
 0xc32   :  { %v6569_v12 = vsel %vm1944_vm2, %v6107_v10, -inf }
 0xc33   :  { %6570 = vmax.xlane.f32.xlu1 %v6569_v12 }
 0xc37   :  { %v6258_v13 = vpop.f32.mrb[76].mxu1 }
 0xc38   :  { %v6259_v14 = vadd.f32 %v6258_v13, %v10932_v62  ;;  %v9686_v15 = vpop.f32.mrb[77].mxu1  ;;  %v8479_v13 = vld [vmem:[%s11999_s29 + $0x6] ss:$0 sm:$0xff] }
 0xc3a   :  { %v6575_v16 = vsel %vm1944_vm2, %v6259_v14, -inf }
 0xc3b   :  { %6576 = vmax.xlane.f32.xlu1 %v6575_v16  ;;  %v5605_v16 = vadd.f32 %v8479_v13, %v11565_v23 }
 0xc3f   :  { %v6410_v17 = vpop.f32.mrb[78].mxu1 }
 0xc40   :  { %v6411_v18 = vadd.f32 %v6410_v17, %v10932_v62  ;;  %v9696_v21 = vpop.f32.mrb[79].mxu1 }
 0xc42   :  { %v6581_v22 = vsel %vm1944_vm2, %v6411_v18, -inf }
 0xc43   :  { %6582 = vmax.xlane.f32.xlu1 %v6581_v22 }
 0xc47   :  { %v6562_v24 = vpop.f32.mrb[80].mxu1 }
 0xc48   :  { %v6563_v25 = vadd.f32 %v6562_v24, %v10932_v62  ;;  %v9706_v26 = vpop.f32.mrb[81].mxu1 }
 0xc4a   :  { %v6587_v28 = vsel %vm1944_vm2, %v6563_v25, -inf }
 0xc4b   :  { %6588 = vmax.xlane.f32.xlu1 %v6587_v28 }
 0xc9f   :  { %v6568_v29 = vpop.xlane.xlu0 %6567 }
 0xca0   :  { %v6590_v44 = vsub.f32 %v6031_v34, %v6568_v29  ;;  %v8480_v29 = vld [vmem:[%s11999_s29 + $0x7] ss:$0 sm:$0xff] }
 0xca2   :  { %v6598_v30 = vmul.f32 1.442695, %v6590_v44 }
 0xca4   :  { %10292 = vpow2.f32 %v6598_v30 }
 0xca7   :  { %v6574_v33 = vpop.xlane.xlu0 %6573 }
 0xca8   :  { %v6592_v45 = vsub.f32 %v6183_v61, %v6574_v33  ;;  %v5675_v33 = vadd.f32 %v8480_v29, %v11595_v43 }
 0xcaa   :  { %v6602_v36 = vmul.f32 1.442695, %v6592_v45 }
 0xcac   :  { %10294 = vpow2.f32 %v6602_v36 }
 0xcae   :  { %v10293_v35 = vpop.eup %10292 }
 0xcaf   :  { %v6580_v37 = vpop.xlane.xlu0 %6579  ;;  %v6614_v51 = vsel %vm1944_vm2, %v10293_v35, 0.0 }
 0xcb0   :  { %v6594_v50 = vsub.f32 %v6335_v2, %v6580_v37  ;;  %6615 = vadd.xlane.f32.xlu0 %v6614_v51 }
 0xcb2   :  { %v6606_v39 = vmul.f32 1.442695, %v6594_v50  ;;  %v5955_v50 = vadd.f32 %v8480_v29, %v11599_v52  ;;  %v8521_v52 = vld [vmem:[%s11952_s9 + $0x20] sm:$0xff] }
 0xcb4   :  { %10296 = vpow2.f32 %v6606_v39 }
 0xcb6   :  { %v10295_v62 = vpop.eup %10294 }
 0xcb7   :  { %v6586_v54 = vpop.xlane.xlu0 %6585  ;;  %v6620_v55 = vsel %vm1944_vm2, %v10295_v62, 0.0 }
 0xcb8   :  { %v6596_v40 = vsub.f32 %v6487_v6, %v6586_v54  ;;  %6621 = vadd.xlane.f32.xlu0 %v6620_v55  ;;  %v8523_v54 = vld [vmem:[%s11952_s9 + $0x30] sm:$0xff] }
 0xcba   :  { %v6610_v41 = vmul.f32 1.442695, %v6596_v40 }
 0xcbc   :  { %10298 = vpow2.f32 %v6610_v41 }
 0xcbe   :  { %v10297_v31 = vpop.eup %10296 }
 0xcbf   :  { %v6626_v42 = vsel %vm1944_vm2, %v10297_v31, 0.0 }
 0xcc0   :  { %v6571_v46 = vpop.xlane.xlu1 %6570  ;;  %6627 = vadd.xlane.f32.xlu0 %v6626_v42 }
 0xcc1   :  { %v6591_v47 = vsub.f32 %v6107_v10, %v6571_v46 }
 0xcc3   :  { %v6600_v49 = vmul.f32 1.442695, %v6591_v47 }
 0xcc5   :  { %10300 = vpow2.f32 %v6600_v49 }
 0xcc6   :  { %v10299_v57 = vpop.eup %10298 }
 0xcc7   :  { %v6632_v20 = vsel %vm1944_vm2, %v10299_v57, 0.0 }
 0xcc8   :  { %v6577_v34 = vpop.xlane.xlu1 %6576  ;;  %6633 = vadd.xlane.f32.xlu0 %v6632_v20 }
 0xcc9   :  { %v6593_v58 = vsub.f32 %v6259_v14, %v6577_v34 }
 0xccb   :  { %v6604_v59 = vmul.f32 1.442695, %v6593_v58 }
 0xccd   :  { %10302 = vpow2.f32 %v6604_v59 }
 0xccf   :  { %v11621_v60 = vpop.eup %10300 }
 0xcd0   :  { %v6583_v61 = vpop.xlane.xlu1 %6582  ;;  %v6617_v63 = vsel %vm1944_vm2, %v11621_v60, 0.0 }
 0xcd1   :  { %v6595_v0 = vsub.f32 %v6411_v18, %v6583_v61  ;;  %6618 = vadd.xlane.f32.xlu1 %v6617_v63 }
 0xcd3   :  { %v6608_v1 = vmul.f32 1.442695, %v6595_v0 }
 0xcd5   :  { %10304 = vpow2.f32 %v6608_v1 }
 0xcd7   :  { %v11625_v2 = vpop.eup %10302 }
 0xcd8   :  { %v6589_v3 = vpop.xlane.xlu1 %6588  ;;  %v6623_v4 = vsel %vm1944_vm2, %v11625_v2, 0.0 }
 0xcd9   :  { %v6597_v5 = vsub.f32 %v6563_v25, %v6589_v3  ;;  %6624 = vadd.xlane.f32.xlu1 %v6623_v4  ;;  %v5885_v25 = vadd.f32 %v8479_v13, %v11582_v38 }
 0xcdb   :  { %v6612_v6 = vmul.f32 1.442695, %v6597_v5 }
 0xcdd   :  { %10306 = vpow2.f32 %v6612_v6 }
 0xcdf   :  { %v11629_v7 = vpop.eup %10304 }
 0xce0   :  { %v6629_v8 = vsel %vm1944_vm2, %v11629_v7, 0.0 }
 0xce1   :  { %6630 = vadd.xlane.f32.xlu1 %v6629_v8 }
 0xce7   :  { %v11633_v9 = vpop.eup %10306 }
 0xce8   :  { %v6635_v10 = vsel %vm1944_vm2, %v11633_v9, 0.0 }
 0xce9   :  { %6636 = vadd.xlane.f32.xlu1 %v6635_v10 }
 0xd3d   :  { %v6616_v11 = vpop.xlane.xlu0 %6615 }
 0xd3e   :  { %10308 = vrcp.f32 %v6616_v11 }
 0xd45   :  { %v6622_v12 = vpop.xlane.xlu0 %6621 }
 0xd46   :  { %10310 = vrcp.f32 %v6622_v12 }
 0xd48   :  { %v10309_v14 = vpop.eup %10308 }
 0xd49   :  { %v6639_v15 = vmul.f32 %v10309_v14, %v10293_v35  ;;  %v8534_v14 = vld [vmem:[%s11953_s10 + $0x1] ss:$0 sm:$0xff] }
 0xd4b   :  { %8505 = vst.msk [vmem:[%s11964_s21 + $0x40] sm:$0xff] %vm1944_vm2, %v6639_v15  ;;  %9710 = vmatmul.mubr.msk.f32.vlgmr.msra.gmra.mrb[82].mxu0 %vm1944_vm2, %v6639_v15 }
 0xd4c   :  { %9718 = vmatpush3.msra.mxu0 %v5605_v16  ;;  %9719 = vmatprep.mubr.msk.f32.mxu0 %vm10387_vm1, %v10388_v27 }
 0xd4d   :  { %v6628_v17 = vpop.xlane.xlu0 %6627  ;;  %9727 = vmatprep.subr.mxu0 %v10388_v27 }
 0xd4e   :  { %10312 = vrcp.f32 %v6628_v17 }
 0xd50   :  { %v10311_v18 = vpop.eup %10310 }
 0xd51   :  { %v6643_v21 = vmul.f32 %v10311_v18, %v10295_v62  ;;  %v8522_v62 = vld [vmem:[%s11952_s9 + $0x28] sm:$0xff] }
 0xd53   :  { %8507 = vst.msk [vmem:[%s11964_s21 + $0x50] sm:$0xff] %vm1944_vm2, %v6643_v21  ;;  %9720 = vmatmul.mubr.msk.f32.vlgmr.msra.gmra.mrb[84].mxu0 %vm1944_vm2, %v6643_v21 }
 0xd54   :  { %9728 = vmatpush3.msra.mxu0 %v11577_v32  ;;  %9729 = vmatprep.mubr.msk.f32.mxu0 %vm10387_vm1, %v10388_v27 }
 0xd55   :  { %v6634_v23 = vpop.xlane.xlu0 %6633  ;;  %9737 = vmatprep.subr.mxu0 %v10388_v27 }
 0xd56   :  { %10314 = vrcp.f32 %v6634_v23 }
 0xd58   :  { %v10313_v22 = vpop.eup %10312 }
 0xd59   :  { %v6647_v24 = vmul.f32 %v10313_v22, %v10297_v31 }
 0xd5b   :  { %8509 = vst.msk [vmem:[%s11964_s21 + $0x60] sm:$0xff] %vm1944_vm2, %v6647_v24  ;;  %9730 = vmatmul.mubr.msk.f32.vlgmr.msra.gmra.mrb[86].mxu0 %vm1944_vm2, %v6647_v24 }
 0xd5c   :  { %9738 = vmatpush3.msra.mxu0 %v5885_v25  ;;  %9739 = vmatprep.mubr.msk.f32.mxu0 %vm10387_vm1, %v10388_v27 }
 0xd5d   :  { %9747 = vmatprep.subr.mxu0 %v10388_v27 }
 0xd5e   :  { %v6619_v32 = vpop.xlane.xlu1 %6618 }
 0xd5f   :  { %10316 = vrcp.f32 %v6619_v32 }
 0xd60   :  { %v10315_v26 = vpop.eup %10314 }
 0xd61   :  { %v6651_v28 = vmul.f32 %v10315_v26, %v10299_v57  ;;  %v8524_v57 = vld [vmem:[%s11952_s9 + $0x38] sm:$0xff]  ;;  %s12002_s9 = sld [smem:[#allocation17_spill]] }
 0xd63   :  { %8511 = vst.msk [vmem:[%s11964_s21 + $0x70] sm:$0xff] %vm1944_vm2, %v6651_v28  ;;  %9740 = vmatmul.mubr.msk.f32.vlgmr.msra.gmra.mrb[88].mxu0 %vm1944_vm2, %v6651_v28 }
 0xd64   :  { %9749 = vmatprep.mubr.msk.f32.mxu0 %vm10387_vm1, %v10388_v27  ;;  %9748 = vmatpush3.msra.mxu0 %v8521_v52 }
 0xd65   :  { %9757 = vmatprep.subr.mxu0 %v10388_v27 }
 0xd66   :  { %v6625_v38 = vpop.xlane.xlu1 %6624 }
 0xd67   :  { %10318 = vrcp.f32 %v6625_v38 }
 0xd69   :  { %v10317_v44 = vpop.eup %10316 }
 0xd6a   :  { %v6641_v30 = vmul.f32 %v10317_v44, %v11621_v60 }
 0xd6c   :  { %8506 = vst.msk [vmem:[%s11964_s21 + $0x48] sm:$0xff] %vm1944_vm2, %v6641_v30  ;;  %9715 = vmatmul.mubr.msk.f32.vlgmr.msra.gmra.mrb[82].mxu1 %vm1944_vm2, %v6641_v30 }
 0xd6d   :  { %9723 = vmatpush3.msra.mxu1 %v5675_v33  ;;  %9724 = vmatprep.mubr.msk.f32.mxu1 %vm10387_vm1, %v10388_v27 }
 0xd6e   :  { %v6631_v45 = vpop.xlane.xlu1 %6630  ;;  %9732 = vmatprep.subr.mxu1 %v10388_v27 }
 0xd6f   :  { %10320 = vrcp.f32 %v6631_v45 }
 0xd71   :  { %v10319_v36 = vpop.eup %10318 }
 0xd72   :  { %v6645_v35 = vmul.f32 %v10319_v36, %v11625_v2 }
 0xd74   :  { %8508 = vst.msk [vmem:[%s11964_s21 + $0x58] sm:$0xff] %vm1944_vm2, %v6645_v35  ;;  %9725 = vmatmul.mubr.msk.f32.vlgmr.msra.gmra.mrb[84].mxu1 %vm1944_vm2, %v6645_v35 }
 0xd75   :  { %9733 = vmatpush3.msra.mxu1 %v11597_v48  ;;  %9734 = vmatprep.mubr.msk.f32.mxu1 %vm10387_vm1, %v10388_v27 }
 0xd76   :  { %v6637_v43 = vpop.xlane.xlu1 %6636  ;;  %9742 = vmatprep.subr.mxu1 %v10388_v27 }
 0xd77   :  { %10322 = vrcp.f32 %v6637_v43 }
 0xd79   :  { %v10321_v37 = vpop.eup %10320 }
 0xd7a   :  { %v6649_v51 = vmul.f32 %v10321_v37, %v11629_v7 }
 0xd7c   :  { %8510 = vst.msk [vmem:[%s11964_s21 + $0x68] sm:$0xff] %vm1944_vm2, %v6649_v51  ;;  %9735 = vmatmul.mubr.msk.f32.vlgmr.msra.gmra.mrb[86].mxu1 %vm1944_vm2, %v6649_v51 }
 0xd7d   :  { %9743 = vmatpush3.msra.mxu1 %v5955_v50  ;;  %9744 = vmatprep.mubr.msk.f32.mxu1 %vm10387_vm1, %v10388_v27  ;;  %v8541_v50 = vld [vmem:[%s11956_s13 + $0x20] sm:$0xff] }
 0xd7e   :  { %9752 = vmatprep.subr.mxu1 %v10388_v27 }
 0xd81   :  { %v10323_v48 = vpop.eup %10322 }
 0xd82   :  { %v6653_v39 = vmul.f32 %v10323_v48, %v11633_v9  ;;  %v8542_v48 = vld [vmem:[%s11956_s13 + $0x28] sm:$0xff] }
 0xd84   :  { %8512 = vst.msk [vmem:[%s11964_s21 + $0x78] sm:$0xff] %vm1944_vm2, %v6653_v39  ;;  %9745 = vmatmul.mubr.msk.f32.vlgmr.msra.gmra.mrb[88].mxu1 %vm1944_vm2, %v6653_v39  ;;  %v10180_v39 = vpack.c.bf16 %v8542_v48, %v8541_v50  ;;  %v8566_v50 = vld [vmem:[%s11959_s16 + $0x1] ss:$0 sm:$0xff] }
 0xd85   :  { %9754 = vmatprep.mubr.msk.f32.mxu1 %vm10387_vm1, %v10388_v27  ;;  %9753 = vmatpush3.msra.mxu1 %v8522_v62 }
 0xd86   :  { %9762 = vmatprep.subr.mxu1 %v10388_v27 }
 0xe1e   :  { %v6732_v55 = vpop.f32.mrb[82].mxu0 }
 0xe1f   :  { %v9711_v40 = vpop.f32.mrb[83].mxu0  ;;  %9750 = vmatmul.mubr.msk.f32.vlgmr.msra.gmra.mrb[90].mxu0 %vm1944_vm2, %v6732_v55  ;;  %v8549_v55 = vld [vmem:[%s11958_s15 + $0x80] sm:$0xff] }
 0xe20   :  { %9758 = vmatpush3.msra.mxu0 %v8523_v54  ;;  %9759 = vmatprep.mubr.msk.f32.mxu0 %vm10387_vm1, %v10388_v27  ;;  %v8550_v40 = vld [vmem:[%s11958_s15 + $0x88] sm:$0xff] }
 0xe21   :  { %9767 = vmatprep.subr.mxu0 %v10388_v27 }
 0xe26   :  { %v6878_v41 = vpop.f32.mrb[84].mxu0 }
 0xe27   :  { %v9721_v31 = vpop.f32.mrb[85].mxu0  ;;  %9760 = vmatmul.mubr.msk.f32.vlgmr.msra.gmra.mrb[92].mxu0 %vm1944_vm2, %v6878_v41  ;;  %v8551_v41 = vld [vmem:[%s11958_s15 + $0x90] sm:$0xff] }
 0xe28   :  { %9768 = vmatpush3.msra.mxu0 %v8521_v52  ;;  %9769 = vmatprep.mubr.msk.f32.mxu0 %vm10387_vm1, %v10388_v27  ;;  %v8543_v52 = vld [vmem:[%s11956_s13 + $0x30] sm:$0xff]  ;;  %v10188_v31 = vpack.c.bf16 %v8550_v40, %v8549_v55 }
 0xe29   :  { %9777 = vmatprep.subr.mxu0 %v10388_v27 }
 0xe2e   :  { %v7024_v42 = vpop.f32.mrb[86].mxu0 }
 0xe2f   :  { %v9731_v46 = vpop.f32.mrb[87].mxu0  ;;  %9770 = vmatmul.mubr.msk.f32.vlgmr.msra.gmra.mrb[94].mxu0 %vm1944_vm2, %v7024_v42  ;;  %v8552_v42 = vld [vmem:[%s11958_s15 + $0x98] sm:$0xff] }
 0xe30   :  { %9778 = vmatpush3.msra.mxu0 %v8523_v54  ;;  %9779 = vmatprep.mubr.msk.f32.mxu0 %vm10387_vm1, %v10388_v27  ;;  %v10192_v46 = vpack.c.bf16 %v8552_v42, %v8551_v41 }
 0xe31   :  { %10181 = vmatprep.subr.bf16.mxu0 %v10180_v39 }
 0xe36   :  { %v7170_v47 = vpop.f32.mrb[88].mxu0 }
 0xe37   :  { %v9741_v49 = vpop.f32.mrb[89].mxu0  ;;  %9780 = vmatmul.mubr.msk.f32.vlgmr.msra.gmra.mrb[96].mxu0 %vm1944_vm2, %v7170_v47  ;;  %v8553_v47 = vld [vmem:[%s11958_s15 + $0xa0] sm:$0xff] }
 0xe38   :  { %10183 = vmatpush3.bf16.msra.mxu0 %v10180_v39  ;;  %v8554_v49 = vld [vmem:[%s11958_s15 + $0xa8] sm:$0xff] }
 0xe3f   :  { %v6805_v20 = vpop.f32.mrb[82].mxu1 }
 0xe40   :  { %v9716_v34 = vpop.f32.mrb[83].mxu1  ;;  %9755 = vmatmul.mubr.msk.f32.vlgmr.msra.gmra.mrb[90].mxu1 %vm1944_vm2, %v6805_v20 }
 0xe41   :  { %9763 = vmatpush3.msra.mxu1 %v8524_v57  ;;  %9764 = vmatprep.mubr.msk.f32.mxu1 %vm10387_vm1, %v10388_v27 }
 0xe42   :  { %9772 = vmatprep.subr.mxu1 %v10388_v27 }
 0xe47   :  { %v6951_v58 = vpop.f32.mrb[84].mxu1 }
 0xe48   :  { %v9726_v59 = vpop.f32.mrb[85].mxu1  ;;  %9765 = vmatmul.mubr.msk.f32.vlgmr.msra.gmra.mrb[92].mxu1 %vm1944_vm2, %v6951_v58 }
 0xe49   :  { %9773 = vmatpush3.msra.mxu1 %v8522_v62  ;;  %9774 = vmatprep.mubr.msk.f32.mxu1 %vm10387_vm1, %v10388_v27  ;;  %v8544_v62 = vld [vmem:[%s11956_s13 + $0x38] sm:$0xff] }
 0xe4a   :  { %9782 = vmatprep.subr.mxu1 %v10388_v27  ;;  %v10184_v54 = vpack.c.bf16 %v8544_v62, %v8543_v52 }
 0xe4c   :  { %10185 = vmatprep.subr.bf16.mxu0 %v10184_v54 }
 0xe4d   :  { %10187 = vmatpush3.bf16.msra.mxu0 %v10184_v54 }
 0xe4e   :  { %10220 = vmatprep.subr.bf16.mxu0 %v10386_v19 }
 0xe4f   :  { %v7097_v60 = vpop.f32.mrb[86].mxu1 }
 0xe50   :  { %v9736_v61 = vpop.f32.mrb[87].mxu1  ;;  %9775 = vmatmul.mubr.msk.f32.vlgmr.msra.gmra.mrb[94].mxu1 %vm1944_vm2, %v7097_v60  ;;  %v8539_v60 = vld [vmem:[%s11954_s11 + $0x1] ss:$0 sm:$0xff] }
 0xe51   :  { %9783 = vmatpush3.msra.mxu1 %v8524_v57  ;;  %9784 = vmatprep.mubr.msk.f32.mxu1 %vm10387_vm1, %v10388_v27  ;;  %v10196_v57 = vpack.c.bf16 %v8554_v49, %v8553_v47 }
 0xe52   :  { %10189 = vmatprep.subr.bf16.mxu1 %v10188_v31 }
 0xe57   :  { %v7243_v63 = vpop.f32.mrb[88].mxu1 }
 0xe58   :  { %v9746_v0 = vpop.f32.mrb[89].mxu1  ;;  %9785 = vmatmul.mubr.msk.f32.vlgmr.msra.gmra.mrb[96].mxu1 %vm1944_vm2, %v7243_v63 }
 0xe59   :  { %10191 = vmatpush3.bf16.msra.mxu1 %v10188_v31 }
 0xe5a   :  { %10193 = vmatprep.subr.bf16.mxu1 %v10192_v46 }
 0xe5d   :  { %10195 = vmatpush3.bf16.msra.mxu1 %v10192_v46 }
 0xe5e   :  { %10197 = vmatprep.subr.bf16.mxu1 %v10196_v57 }
 0xe61   :  { %10199 = vmatpush3.bf16.msra.mxu1 %v10196_v57 }
 0xef2   :  { %v7321_v1 = vpop.f32.mrb[90].mxu0 }
 0xef3   :  { %v9751_v2 = vpop.f32.mrb[91].mxu0 }
 0xefa   :  { %v7467_v3 = vpop.f32.mrb[92].mxu0 }
 0xefb   :  { %v9761_v4 = vpop.f32.mrb[93].mxu0 }
 0xf02   :  { %v7613_v5 = vpop.f32.mrb[94].mxu0 }
 0xf03   :  { %v9771_v6 = vpop.f32.mrb[95].mxu0 }
 0xf0a   :  { %v7759_v7 = vpop.f32.mrb[96].mxu0 }
 0xf0b   :  { %v9781_v8 = vpop.f32.mrb[97].mxu0 }
 0xf13   :  { %v7394_v9 = vpop.f32.mrb[90].mxu1 }
 0xf14   :  { %v7836_v10 = vadd.f32 %v7394_v9, %v7321_v1  ;;  %v9756_v11 = vpop.f32.mrb[91].mxu1  ;;  %v8540_v1 = vld [vmem:[%s11955_s12 + $0x1] ss:$0 sm:$0xff]  ;;  %v8555_v9 = vld [vmem:[%s11958_s15 + $0xb0] sm:$0xff] }
 0xf16   :  { %v7838_v12 = vadd.f32 %v7836_v10, %v7467_v3  ;;  %v8556_v10 = vld [vmem:[%s11958_s15 + $0xb8] sm:$0xff] }
 0xf17   :  { %v10200_v11 = vpack.c.bf16 %v8556_v10, %v8555_v9 }
 0xf19   :  { %10201 = vmatprep.subr.bf16.mxu1 %v10200_v11 }
 0xf1a   :  { %10203 = vmatpush3.bf16.msra.mxu1 %v10200_v11 }
 0xf1b   :  { %v7540_v13 = vpop.f32.mrb[92].mxu1 }
 0xf1c   :  { %v7840_v15 = vadd.f32 %v7838_v12, %v7540_v13  ;;  %v9766_v16 = vpop.f32.mrb[93].mxu1  ;;  %v8557_v12 = vld [vmem:[%s11958_s15 + $0xc0] sm:$0xff]  ;;  %v8558_v13 = vld [vmem:[%s11958_s15 + $0xc8] sm:$0xff] }
 0xf1e   :  { %v7850_v17 = vadd.f32 %v8534_v14, %v7840_v15  ;;  %v8560_v15 = vld [vmem:[%s11958_s15 + $0xd8] sm:$0xff] }
 0xf20   :  { %8535 = vst.msk [vmem:[%s11965_s22 + $0x10] sm:$0xff] %vm82_vm0, %v7850_v17  ;;  %v11761_v18 = vadd.f32 %v7850_v17, %v11195_v56  ;;  %v8561_v17 = vld [vmem:[%s11958_s15 + $0xe0] sm:$0xff] }
 0xf22   :  { %v7861_v21 = vsel %vm82_vm0, %v11761_v18, 0.0 }
 0xf23   :  { %v7686_v23 = vpop.f32.mrb[94].mxu1  ;;  %7862 = vadd.xlane.f32.xlu0 %v7861_v21  ;;  %v8562_v21 = vld [vmem:[%s11958_s15 + $0xe8] sm:$0xff] }
 0xf24   :  { %v7837_v22 = vadd.f32 %v7686_v23, %v7613_v5  ;;  %v9776_v24 = vpop.f32.mrb[95].mxu1  ;;  %v10212_v23 = vpack.c.bf16 %v8562_v21, %v8561_v17  ;;  %v8570_v17 = vld [vmem:[%s12002_s9] ss:$0 sm:$0xff] }
 0xf25   :  { %v8564_v24 = vld [vmem:[%s11958_s15 + $0xf8] sm:$0xff] }
 0xf26   :  { %v7839_v25 = vadd.f32 %v7837_v22, %v7759_v7  ;;  %v8563_v22 = vld [vmem:[%s11958_s15 + $0xf0] sm:$0xff] }
 0xf2b   :  { %v7832_v32 = vpop.f32.mrb[96].mxu1 }
 0xf2c   :  { %v7841_v26 = vadd.f32 %v7839_v25, %v7832_v32  ;;  %v9786_v28 = vpop.f32.mrb[97].mxu1  ;;  %v10216_v25 = vpack.c.bf16 %v8564_v24, %v8563_v22  ;;  %v8546_v32 = vld [vmem:[%s11957_s14 + $0x1] ss:$0 sm:$0xff] }
 0xf2e   :  { %v7851_v38 = vadd.f32 %v8534_v14, %v7841_v26  ;;  %v8559_v14 = vld [vmem:[%s11958_s15 + $0xd0] sm:$0xff] }
 0xf2f   :  { %v10208_v16 = vpack.c.bf16 %v8560_v15, %v8559_v14 }
 0xf30   :  { %8536 = vst.msk [vmem:[%s11965_s22 + $0x18] sm:$0xff] %vm82_vm0, %v7851_v38  ;;  %v11770_v56 = vadd.f32 %v7851_v38, %v11192_v53 }
 0xf32   :  { %v7864_v29 = vsel %vm82_vm0, %v11770_v56, 0.0 }
 0xf33   :  { %7865 = vadd.xlane.f32.xlu1 %v7864_v29 }
 0xfb0   :  { %v7863_v44 = vpop.xlane.xlu0 %7862 }
 0xfb1   :  { %v7867_v30 = vmul.f32 0.03125, %v7863_v44 }
 0xfb3   :  { %v7869_v33 = vsub.f32 %v11761_v18, %v7867_v30 }
 0xfb5   :  { %v7871_v45 = vmul.f32 %v7869_v33, %v7869_v33 }
 0xfb7   :  { %v7873_v36 = vsel %vm82_vm0, %v7871_v45, 0.0 }
 0xfb8   :  { %7874 = vadd.xlane.f32.xlu0 %v7873_v36 }
 0xfc0   :  { %v7866_v35 = vpop.xlane.xlu1 %7865 }
 0xfc1   :  { %v7868_v43 = vmul.f32 0.03125, %v7866_v35 }
 0xfc3   :  { %v7870_v37 = vsub.f32 %v11770_v56, %v7868_v43 }
 0xfc5   :  { %v7872_v51 = vmul.f32 %v7870_v37, %v7870_v37 }
 0xfc7   :  { %v7876_v53 = vsel %vm82_vm0, %v7872_v51, 0.0 }
 0xfc8   :  { %7877 = vadd.xlane.f32.xlu1 %v7876_v53 }
0x1045   :  { %v7875_v20 = vpop.xlane.xlu0 %7874 }
0x1046   :  { %v7879_v34 = vmul.f32 0.03125, %v7875_v20 }
0x1048   :  { %v7881_v58 = vadd.f32 1e-05, %v7879_v34 }
0x104a   :  { %10324 = vrsqrt.f32 %v7881_v58 }
0x1054   :  { %v10325_v59 = vpop.eup %10324 }
0x1055   :  { %v7878_v61 = vpop.xlane.xlu1 %7877  ;;  %v7885_v63 = vmul.f32 %v10325_v59, %v7869_v33 }
0x1056   :  { %v7880_v0 = vmul.f32 0.03125, %v7878_v61 }
0x1057   :  { %v7893_v2 = vmul.f32 %v8539_v60, %v7885_v63  ;;  %v8160_v63 = vld [vmem:[%s11962_s19 + $0x10] sm:$0xff] }
0x1058   :  { %v7882_v3 = vadd.f32 1e-05, %v7880_v0  ;;  %v8161_v0 = vld [vmem:[%s11962_s19 + $0x18] sm:$0xff] }
0x1059   :  { %v7901_v4 = vadd.f32 %v8540_v1, %v7893_v2  ;;  %v8162_v2 = vld [vmem:[%s11962_s19 + $0x20] sm:$0xff] }
0x105a   :  { %10326 = vrsqrt.f32 %v7882_v3  ;;  %v8163_v3 = vld [vmem:[%s11962_s19 + $0x28] sm:$0xff] }
0x105b   :  { %9795 = vmatprep.mubr.msk.f32.mxu0 %vm82_vm0, %v7901_v4  ;;  %v10229_v4 = vpack.c.bf16 %v8163_v3, %v8162_v2 }
0x1064   :  { %v10327_v5 = vpop.eup %10326 }
0x1065   :  { %v7886_v6 = vmul.f32 %v10327_v5, %v7870_v37  ;;  %v8164_v5 = vld [vmem:[%s11962_s19 + $0x30] sm:$0xff] }
0x1067   :  { %v7894_v7 = vmul.f32 %v8539_v60, %v7886_v6  ;;  %v8165_v6 = vld [vmem:[%s11962_s19 + $0x38] sm:$0xff] }
0x1069   :  { %v7902_v8 = vadd.f32 %v8540_v1, %v7894_v7  ;;  %v10225_v1 = vpack.c.bf16 %v8161_v0, %v8160_v63  ;;  %v10233_v7 = vpack.c.bf16 %v8165_v6, %v8164_v5 }
0x106b   :  { %9796 = vmatmul.mubr.msk.f32.vlgmr.msra.gmra.mrb[98].mxu0 %vm82_vm0, %v7902_v8 }
0x106c   :  { %9849 = vmatprep.mubr.msk.f32.mxu0 %vm10387_vm1, %v10388_v27  ;;  %v10204_v27 = vpack.c.bf16 %v8558_v13, %v8557_v12 }
0x106e   :  { %10205 = vmatprep.subr.bf16.mxu1 %v10204_v27 }
0x106f   :  { %10207 = vmatpush3.bf16.msra.mxu1 %v10204_v27  ;;  %v8569_v27 = vld [vmem:[%s11960_s17] ss:$0 sm:$0xff]  ;;  %s10390_s17 = smov [#allocation2]  }
0x1070   :  { %10209 = vmatprep.subr.bf16.mxu1 %v10208_v16  ;;  %s8281_s6 = sshll.u32 %s10390_s17, 4  ;;  %s8282_s6 = int_to_ptr.vmem [resolvable:$true] %s8281_s6 }
0x1071   :  { %s10338_s7 = scalar_lea.vmem %s8282_s6, 256  ;;  %p10343_p1 = scmp.lt.s32.totalorder %s8282_s6, %s8282_s6 }
0x1072   :  { %p10339_p0 = scmp.ne.s32.totalorder %s8282_s6, %s10338_s7  ;;  %p10344_p2 = scmp.lt.s32.totalorder %s10338_s7, %s10338_s7 }
0x1073   :  { %10211 = vmatpush3.bf16.msra.mxu1 %v10208_v16 }
0x1074   :  { %10213 = vmatprep.subr.bf16.mxu1 %v10212_v23  ;;  %p10345_p3 = por %p10344_p2, %p10343_p1 }
0x1076   :  { %p10346_p4 = pnand %p10345_p3, %p10339_p0 }
0x1077   :  { %10215 = vmatpush3.bf16.msra.mxu1 %v10212_v23 }
0x1078   :  { %10217 = vmatprep.subr.bf16.mxu1 %v10216_v25 }
0x107b   :  { %10219 = vmatpush3.bf16.msra.mxu1 %v10216_v25 }
0x113e   :  { %v9797_v26 = vpop.f32.mrb[98].mxu0 }
0x113f   :  { %v7994_v28 = vadd.f32 %v9797_v26, %v8546_v32  ;;  %v7988_v38 = vpop.f32.mrb[99].mxu0 }
0x1140   :  { %v7989_v29 = vadd.f32 %v8546_v32, %v7988_v38 }
0x1141   :  { %v8000_v44 = vmul.f32 0.70710677, %v7994_v28  ;;  %v7998_v37 = vmul.f32 0.5, %v7994_v28 }
0x1142   :  { %v7999_v30 = vmul.f32 0.70710677, %v7989_v29  ;;  %v7997_v35 = vmul.f32 0.5, %v7989_v29 }
0x1143   :  { %10328 = verf.f32 %v8000_v44 }
0x1144   :  { %10330 = verf.f32 %v7999_v30 }
0x114d   :  { %v10329_v33 = vpop.eup %10328 }
0x114e   :  { %v10331_v45 = vpop.eup %10330  ;;  %v8004_v36 = vadd.f32 1.0, %v10329_v33 }
0x114f   :  { %v8003_v43 = vadd.f32 1.0, %v10331_v45 }
0x1150   :  { %v8006_v53 = vmul.f32 %v8004_v36, %v7998_v37 }
0x1151   :  { %v8005_v51 = vmul.f32 %v8003_v43, %v7997_v35 }
0x1153   :  { %9830 = vmatprep.mubr.f32.mxu1 %v8005_v51 }
0x1154   :  { %9831 = vmatmul.mubr.f32.vlgmr.msra.gmra.mrb[98].mxu1 %v8006_v53 }
0x1227   :  { %v9832_v48 = vpop.f32.mrb[98].mxu1 }
0x1228   :  { %v8104_v39 = vadd.f32 %v9832_v48, %v8566_v50  ;;  %v8098_v52 = vpop.f32.mrb[99].mxu1 }
0x1229   :  { %v8099_v62 = vadd.f32 %v8566_v50, %v8098_v52 }
0x122a   :  { %v8108_v54 = vadd.f32 %v8104_v39, %v11770_v56  ;;  %v8159_v56 = vld [vmem:[%s11962_s19 + $0x8] sm:$0xff] }
0x122b   :  { %v8107_v55 = vadd.f32 %v8099_v62, %v11761_v18  ;;  %v8158_v18 = vld [vmem:[%s11962_s19] sm:$0xff] }
0x122c   :  { %8568 = vst.msk [vmem:[%s11963_s20 + $0x18] sm:$0xff] %vm82_vm0, %v8108_v54  ;;  %v8117_v40 = vsel %vm82_vm0, %v8108_v54, 0.0  ;;  %v10221_v42 = vpack.c.bf16 %v8159_v56, %v8158_v18 }
0x122d   :  { %8567 = vst.msk [vmem:[%s11963_s20 + $0x10] sm:$0xff] %vm82_vm0, %v8107_v55  ;;  %8118 = vadd.xlane.f32.xlu1 %v8117_v40  ;;  %v8114_v41 = vsel %vm82_vm0, %v8107_v55, 0.0 }
0x122e   :  { %8115 = vadd.xlane.f32.xlu0 %v8114_v41  ;;  %10223 = vmatpush3.bf16.xpose.msk.msra.mxu0 %vm11875_vm4, %v10221_v42 }
0x122f   :  { %10224 = vmatprep.subr.bf16.mxu0 %v10386_v19 }
0x1236   :  { %10227 = vmatpush3.bf16.xpose.msk.msra.mxu0 %vm11875_vm4, %v10225_v1 }
0x1237   :  { %10228 = vmatprep.subr.bf16.mxu0 %v10386_v19 }
0x123e   :  { %10231 = vmatpush3.bf16.xpose.msk.msra.mxu0 %vm11875_vm4, %v10229_v4 }
0x123f   :  { %10232 = vmatprep.subr.bf16.mxu0 %v10386_v19 }
0x1246   :  { %10235 = vmatpush3.bf16.xpose.msk.msra.mxu0 %vm11875_vm4, %v10233_v7 }
0x12ba   :  { %v8119_v46 = vpop.xlane.xlu1 %8118 }
0x12bb   :  { %v8121_v47 = vmul.f32 0.03125, %v8119_v46  ;;  %v8116_v49 = vpop.xlane.xlu0 %8115 }
0x12bc   :  { %v8120_v57 = vmul.f32 0.03125, %v8116_v49 }
0x12bd   :  { %v8123_v20 = vsub.f32 %v8108_v54, %v8121_v47 }
0x12be   :  { %v8122_v34 = vsub.f32 %v8107_v55, %v8120_v57 }
0x12bf   :  { %v8125_v58 = vmul.f32 %v8123_v20, %v8123_v20 }
0x12c0   :  { %v8124_v59 = vmul.f32 %v8122_v34, %v8122_v34 }
0x12c1   :  { %v8129_v60 = vsel %vm82_vm0, %v8125_v58, 0.0 }
0x12c2   :  { %8130 = vadd.xlane.f32.xlu1 %v8129_v60  ;;  %v8126_v61 = vsel %vm82_vm0, %v8124_v59, 0.0 }
0x12c3   :  { %8127 = vadd.xlane.f32.xlu0 %v8126_v61 }
0x134f   :  { %v8131_v8 = vpop.xlane.xlu1 %8130 }
0x1350   :  { %v8133_v9 = vmul.f32 0.03125, %v8131_v8  ;;  %v8128_v10 = vpop.xlane.xlu0 %8127 }
0x1351   :  { %v8132_v11 = vmul.f32 0.03125, %v8128_v10 }
0x1352   :  { %v8135_v12 = vadd.f32 1e-05, %v8133_v9 }
0x1353   :  { %v8134_v13 = vadd.f32 1e-05, %v8132_v11 }
0x1354   :  { %10332 = vrsqrt.f32 %v8135_v12 }
0x1355   :  { %10334 = vrsqrt.f32 %v8134_v13 }
0x135e   :  { %v10333_v19 = vpop.eup %10332 }
0x135f   :  { %v10335_v14 = vpop.eup %10334  ;;  %v8139_v15 = vmul.f32 %v10333_v19, %v8123_v20 }
0x1360   :  { %v8138_v16 = vmul.f32 %v10335_v14, %v8122_v34 }
0x1361   :  { %v8147_v21 = vmul.f32 %v8569_v27, %v8139_v15 }
0x1362   :  { %v8146_v23 = vmul.f32 %v8569_v27, %v8138_v16 }
0x1363   :  { %v8155_v22 = vadd.f32 %v8570_v17, %v8147_v21 }
0x1364   :  { %v8154_v24 = vadd.f32 %v8570_v17, %v8146_v23 }
0x1365   :  { %v8169_v25 = vrot.slane %v8155_v22, 6  ;;  %8157 = vst.msk [vmem:[#allocation2 + $0x8] sm:$0xff] %vm82_vm0, %v8155_v22 }
0x1366   :  { %v8168_v32 = vrot.slane %v8154_v24, 7  ;;  %8156 = vst.msk [vmem:[#allocation2] sm:$0xff] %vm82_vm0, %v8154_v24 }
0x1368   :  { %v8171_v26 = vsel %vm8170_vm5, %v8169_v25, %v8168_v32 }
0x1369   :  { %9850 = vmatmul.mubr.msk.f32.vlgmr.msra.gmra.mrb[100].mxu0 %vm82_vm0, %v8171_v26 }
0x136a   :  { %10349 = shalt.err (!%p10346_p4)
}
0x136b   :  { %s12003_s14 = sld [smem:[#allocation18_spill]] }
0x1371   :  { %s10350_s10 = scalar_lea.hbm %s12003_s14, 256 }
0x1372   :  { %p10351_p5 = scmp.ne.s32.totalorder %s12003_s14, %s10350_s10  ;;  %p10354_p6 = scmp.lt.u32.totalorder %s10350_s10, %s12003_s14 }
0x1374   :  { %p10356_p7 = pnand %p10354_p6, %p10351_p5 }
0x1376   :  { %10359 = shalt.err (!%p10356_p7)
}
0x1377   :  { %s10391_s30 = smov 128   ;;  %s10392_s12 = smov 8   ;;  %vm8268_vm6 = vcmask 517120  }
0x1378   :  { %8287 = dma.vmem_to_hbm [thread:$0]  %s8282_s6, 256, %s12003_s14, [#allocation3], %s10391_s30, %s10391_s30, %s10392_s12  }
0x1379   :  { %s10393_s3 = smov [#allocation4]  }
0x137a   :  { %s8294_s2 = sshll.u32 %s10393_s3, 4  ;;  %s8295_s2 = int_to_ptr.vmem [resolvable:$true] %s8294_s2 }
0x137b   :  { %s10360_s8 = scalar_lea.vmem %s8295_s2, 32  ;;  %p10365_p9 = scmp.lt.s32.totalorder %s8295_s2, %s8295_s2 }
0x137c   :  { %p10361_p8 = scmp.ne.s32.totalorder %s8295_s2, %s10360_s8  ;;  %p10366_p10 = scmp.lt.s32.totalorder %s10360_s8, %s10360_s8 }
0x137e   :  { %p10367_p11 = por %p10366_p10, %p10365_p9 }
0x1380   :  { %p10368_p12 = pnand %p10367_p11, %p10361_p8 }
0x143c   :  { %v8264_v28 = vpop.f32.mrb[100].mxu0 }
0x143d   :  { %8269 = vst.msk [vmem:[#allocation4] sm:$0x3] %vm8268_vm6, %v8264_v28  ;;  %v9851_v38 = vpop.f32.mrb[101].mxu0 }
0x143e   :  { %10371 = shalt.err (!%p10368_p12)
}
0x143f   :  { %s12004_s26 = sld [smem:[#allocation19_spill]] }
0x1445   :  { %s10372_s28 = scalar_lea.hbm %s12004_s26, 32 }
0x1446   :  { %p10373_p13 = scmp.ne.s32.totalorder %s12004_s26, %s10372_s28  ;;  %p10376_p0 = scmp.lt.u32.totalorder %s10372_s28, %s12004_s26 }
0x1448   :  { %p10378_p1 = pnand %p10376_p0, %p10373_p13 }
0x144a   :  { %10381 = shalt.err (!%p10378_p1)
}
0x144b   :  { %8297 = dma.vmem_to_hbm [thread:$0]  %s8295_s2, 32, %s12004_s26, [#allocation5]  }
0x144c   :  { %10382 = dma.done.wait [#allocation3], 256  }
0x144d   :  { %10383 = vsyncadd [#allocation3], 4294967040 }
0x144e   :  { %10384 = dma.done.wait [#allocation5], 32  }
0x144f   :  { %10385 = vsyncadd [#allocation5], 4294967264 }
0x1450   :  { %8310 = vsyncpa [#allocation3], 1 }
0x1451   :  { %8311 = vsyncpa [#allocation5], 1 }

</bundles_post_ra>
